<compile_context>
chip_gen: v6e
topology: v6e:2x2x1
jax: 0.10.0
libtpu: 0.0.40
codegen_flags: <defaults>
</compile_context>

<pallas_src>
import math
import numpy as np
import jax
import jax.numpy as jnp
from jax import lax
from jax.experimental import pallas as pl
from jax.experimental.pallas import tpu as pltpu

# Hyperparameters: TransformerPolicy(size=SEQ, width=32, n_heads=4, layers=2)
SEQ = 16          # number of board cells (sequence length)
WIDTH = 32
HEADS = 4
HEAD_DIM = WIDTH // HEADS
LAYERS = 2
FF = WIDTH * 4
BATCH = 2
LN_EPS = 1e-5

BS = BATCH * SEQ              # 32  rows of the packed (batch, seq) activation slab
BHS = BATCH * HEADS * SEQ     # 128 rows of the packed (head, batch, seq) attn slab
NEG_INF = -1e30

SEQ_SHIFT = SEQ.bit_length() - 1
BS_SHIFT = BS.bit_length() - 1
W_SHIFT = WIDTH.bit_length() - 1
assert (1 << SEQ_SHIFT) == SEQ and (1 << BS_SHIFT) == BS and (1 << W_SHIFT) == WIDTH
assert BS == WIDTH            # head-bias row is stored in the 32-lane slab

# ---------------- packed-parameter layout (row offsets, all multiples of 8) ---------
# 32-lane slab (p32): global section then per-layer blocks.
TOKM_OFF = 0                   # token embedding for cell == -1   (1 row used)
TOK0_OFF = 8                   # token embedding for cell ==  0
TOKP_OFF = 16                  # token embedding for cell == +1
POS_OFF = 24                   # positional embeddings pre-tiled over batch (BS rows)
HEADW_OFF = POS_OFF + BS       # output head weight (1 row)
HEADB_OFF = HEADW_OFF + 8      # output head bias pre-broadcast to BS lanes (1 row)
L32_BASE = HEADB_OFF + 8

OFF_WQ = 0                     # (H*W, 32): per-head Q weights stacked, scale folded
OFF_WK = OFF_WQ + HEADS * WIDTH
OFF_WVO = OFF_WK + HEADS * WIDTH   # (H*W, 32): Wv^T @ Wo_h^T (out_proj folded)
OFF_QB = OFF_WVO + HEADS * WIDTH   # (BHS, 32): Q bias tiled, lanes 0:Dh, scale folded
OFF_KB = OFF_QB + BHS
OFF_VOB = OFF_KB + BHS             # (BHS, 32): (bv @ Wo_h^T) tiled
OFF_OUTPB = OFF_VOB + BHS          # out_proj bias (1 row)
OFF_LN1G = OFF_OUTPB + 8
OFF_LN1B = OFF_LN1G + 8
OFF_LN2G = OFF_LN1B + 8
OFF_LN2B = OFF_LN2G + 8
OFF_FF2W = OFF_LN2B + 8            # (FF, 32)
OFF_FF2B = OFF_FF2W + FF
L32_SIZE = OFF_FF2B + 8
N32 = L32_BASE + LAYERS * L32_SIZE

# 128-lane slab (p128): per-layer blocks.
OFF_FF1W = 0                   # (W, FF)
OFF_FF1B = OFF_FF1W + WIDTH    # (1, FF)
L128_SIZE = OFF_FF1B + 8
N128 = LAYERS * L128_SIZE


def _layer_norm(x, g, b):
    # x: (BS, W); g, b: (1, W)
    mu = jnp.mean(x, axis=-1, keepdims=True)
    xc = x - mu
    var = jnp.mean(xc * xc, axis=-1, keepdims=True)
    return xc * lax.rsqrt(var + LN_EPS) * g + b


def transformer_policy_kernel(x_ref, p32_ref, p128_ref, o_ref):
    xrow = x_ref[...]                                           # (1, BS) raw board floats

    # ---------- fused preprocessing: round -> {-1,0,1} via threshold compares ----------
    # sublane-broadcast the row, then one 32x32 XLU transpose -> per-row cell value
    xcell = jnp.transpose(jnp.broadcast_to(xrow, (WIDTH, BS)))  # (BS, W)

    tok_m = p32_ref[TOKM_OFF:TOKM_OFF + 1, :]                   # (1, W)
    tok_0 = p32_ref[TOK0_OFF:TOK0_OFF + 1, :]
    tok_p = p32_ref[TOKP_OFF:TOKP_OFF + 1, :]
    pos = p32_ref[POS_OFF:POS_OFF + BS, :]                      # (BS, W) pre-tiled over batch
    hs = jnp.where(jnp.abs(xcell) < 0.5, tok_0,
                   jnp.where(xcell < 0.0, tok_m, tok_p)) + pos  # (BS, W)

    # ---------- masks generated in-kernel (no constant DMA) ----------
    rX = lax.broadcasted_iota(jnp.int32, (BHS, HEADS * WIDTH), 0)
    cX = lax.broadcasted_iota(jnp.int32, (BHS, HEADS * WIDTH), 1)
    head_blk = jnp.right_shift(rX, BS_SHIFT) == jnp.right_shift(cX, W_SHIFT)
    rS = lax.broadcasted_iota(jnp.int32, (BHS, BHS), 0)
    cS = lax.broadcasted_iota(jnp.int32, (BHS, BHS), 1)
    attn_bias = jnp.where(
        jnp.right_shift(rS, SEQ_SHIFT) == jnp.right_shift(cS, SEQ_SHIFT), 0.0, NEG_INF)

    for l in range(LAYERS):
        b32 = L32_BASE + l * L32_SIZE
        b128 = l * L128_SIZE

        wq = p32_ref[b32 + OFF_WQ:b32 + OFF_WQ + HEADS * WIDTH, :]      # (128, 32)
        wk = p32_ref[b32 + OFF_WK:b32 + OFF_WK + HEADS * WIDTH, :]
        wvo = p32_ref[b32 + OFF_WVO:b32 + OFF_WVO + HEADS * WIDTH, :]
        qb = p32_ref[b32 + OFF_QB:b32 + OFF_QB + BHS, :]                # (128, 32)
        kb = p32_ref[b32 + OFF_KB:b32 + OFF_KB + BHS, :]
        vob = p32_ref[b32 + OFF_VOB:b32 + OFF_VOB + BHS, :]

        # ---------- packed block-diagonal multi-head self-attention ----------
        # Block-replicated hidden slab: X[h*BS+r, g*W+c] = hs[r, c] iff h == g.
        xt = jnp.concatenate([hs] * HEADS, axis=1)                       # (BS, H*W)
        xt = jnp.concatenate([xt] * HEADS, axis=0)                       # (BHS, H*W)
        X = jnp.where(head_blk, xt, 0.0)

        # Three K=128 projections per layer (Q/K outputs live in lanes 0:Dh, rest 0).
        qp = jnp.dot(X, wq, preferred_element_type=jnp.float32) + qb     # (BHS, 32)
        kp = jnp.dot(X, wk, preferred_element_type=jnp.float32) + kb     # (BHS, 32)
        vop = jnp.dot(X, wvo, preferred_element_type=jnp.float32) + vob  # (BHS, 32)

        s = lax.dot_general(qp, kp, (((1,), (1,)), ((), ())),
                            preferred_element_type=jnp.float32)          # (BHS, BHS)
        s = s + attn_bias                     # mask cross-(head,batch) BEFORE row max
        m = jnp.max(s, axis=-1, keepdims=True)
        e = jnp.exp(s - m)
        p = e * (1.0 / jnp.sum(e, axis=-1, keepdims=True))
        ow = jnp.dot(p, vop, preferred_element_type=jnp.float32)         # (BHS, W)

        # sum the per-head (already out-projected) contributions back into the slab
        attn = ow[0:BS]
        for hh in range(1, HEADS):
            attn = attn + ow[hh * BS:(hh + 1) * BS]
        attn = attn + p32_ref[b32 + OFF_OUTPB:b32 + OFF_OUTPB + 1, :]    # (BS, W)
        hs = _layer_norm(hs + attn,
                         p32_ref[b32 + OFF_LN1G:b32 + OFF_LN1G + 1, :],
                         p32_ref[b32 + OFF_LN1B:b32 + OFF_LN1B + 1, :])

        # ---------- feed-forward ----------
        ff1w = p128_ref[b128 + OFF_FF1W:b128 + OFF_FF1W + WIDTH, :]      # (W, FF)
        ff1b = p128_ref[b128 + OFF_FF1B:b128 + OFF_FF1B + 1, :]          # (1, FF)
        ff = jnp.dot(hs, ff1w, preferred_element_type=jnp.float32) + ff1b
        ff = jnp.maximum(ff, 0.0)
        ff2w = p32_ref[b32 + OFF_FF2W:b32 + OFF_FF2W + FF, :]            # (FF, W)
        ff2b = p32_ref[b32 + OFF_FF2B:b32 + OFF_FF2B + 1, :]
        ff = jnp.dot(ff, ff2w, preferred_element_type=jnp.float32) + ff2b
        hs = _layer_norm(hs + ff,
                         p32_ref[b32 + OFF_LN2G:b32 + OFF_LN2G + 1, :],
                         p32_ref[b32 + OFF_LN2B:b32 + OFF_LN2B + 1, :])

    # ---------- output head: lane-dense (1, BS) logits ----------
    hs = jnp.maximum(hs, 0.0)                                            # ReLU
    headw = p32_ref[HEADW_OFF:HEADW_OFF + 1, :]                          # (1, W)
    headb = p32_ref[HEADB_OFF:HEADB_OFF + 1, :]                          # (1, BS) pre-bcast
    logits = lax.dot_general(headw, hs, (((1,), (1,)), ((), ())),
                             preferred_element_type=jnp.float32) + headb  # (1, BS)
    prob = 1.0 / (1.0 + jnp.exp(-logits))                                # sigmoid
    valid = (jnp.abs(xrow) < 0.5).astype(jnp.float32)                    # empty cells
    o_ref[...] = prob * valid


def make_params(key):
    # PyTorch-layout parameters (out_features, in_features), as in the nn.Module.
    ks = list(jax.random.split(key, 12))

    def nrm(k, shape, scale=0.1):
        return (scale * jax.random.normal(k, shape)).astype(jnp.float32)

    p = {}
    p['emb_pos'] = nrm(ks[0], (SEQ, WIDTH))               # nn.Embedding(size, width)
    p['emb_tok'] = nrm(ks[1], (3, WIDTH))                 # nn.Embedding(3, width)
    p['inpw'] = nrm(ks[2], (LAYERS, 3 * WIDTH, WIDTH))    # MHA in_proj_weight
    p['inpb'] = nrm(ks[3], (LAYERS, 3 * WIDTH), 0.01)
    p['outpw'] = nrm(ks[4], (LAYERS, WIDTH, WIDTH))       # MHA out_proj
    p['outpb'] = nrm(ks[5], (LAYERS, WIDTH), 0.01)
    p['ln1g'] = jnp.ones((LAYERS, WIDTH), jnp.float32)
    p['ln1b'] = jnp.zeros((LAYERS, WIDTH), jnp.float32)
    p['ln2g'] = jnp.ones((LAYERS, WIDTH), jnp.float32)
    p['ln2b'] = jnp.zeros((LAYERS, WIDTH), jnp.float32)
    p['ff1w'] = nrm(ks[6], (LAYERS, FF, WIDTH))           # linear1 (W -> 4W)
    p['ff1b'] = nrm(ks[7], (LAYERS, FF), 0.01)
    p['ff2w'] = nrm(ks[8], (LAYERS, WIDTH, FF))           # linear2 (4W -> W)
    p['ff2b'] = nrm(ks[9], (LAYERS, WIDTH), 0.01)
    p['headw'] = nrm(ks[10], (1, WIDTH))                  # output_layer Linear(W, 1)
    p['headb'] = nrm(ks[11], (1, 1), 0.01)
    return p


def pack_params(p):
    """One-time pre-permutation of PyTorch-layout params into two packed slabs."""
    scale = 1.0 / math.sqrt(HEAD_DIM)
    W, Dh = WIDTH, HEAD_DIM
    f = lambda a: np.asarray(a, np.float32)

    p32 = np.zeros((N32, W), np.float32)
    p128 = np.zeros((N128, FF), np.float32)

    emb_tok = f(p['emb_tok'])
    p32[TOKM_OFF] = emb_tok[0]
    p32[TOK0_OFF] = emb_tok[1]
    p32[TOKP_OFF] = emb_tok[2]
    p32[POS_OFF:POS_OFF + BS] = np.tile(f(p['emb_pos']), (BATCH, 1))
    p32[HEADW_OFF] = f(p['headw'])[0]
    p32[HEADB_OFF] = np.full((W,), float(f(p['headb'])[0, 0]), np.float32)

    inpw, inpb = f(p['inpw']), f(p['inpb'])
    outpw, outpb = f(p['outpw']), f(p['outpb'])

    for l in range(LAYERS):
        b = L32_BASE + l * L32_SIZE
        for hh in range(HEADS):
            lo, hi = hh * Dh, (hh + 1) * Dh
            Wq = inpw[l, lo:hi, :]                       # (Dh, W)
            Wk = inpw[l, W + lo:W + hi, :]
            Wv = inpw[l, 2 * W + lo:2 * W + hi, :]
            bq = inpb[l, lo:hi]
            bk = inpb[l, W + lo:W + hi]
            bv = inpb[l, 2 * W + lo:2 * W + hi]
            WoT = outpw[l][:, lo:hi].T                   # (Dh, W)
            rs = hh * W                                  # weight-stack row block
            p32[b + OFF_WQ + rs:b + OFF_WQ + rs + W, 0:Dh] = (scale * Wq).T
            p32[b + OFF_WK + rs:b + OFF_WK + rs + W, 0:Dh] = Wk.T
            p32[b + OFF_WVO + rs:b + OFF_WVO + rs + W, :] = Wv.T @ WoT
            rb = hh * BS                                 # bias-slab row block
            p32[b + OFF_QB + rb:b + OFF_QB + rb + BS, 0:Dh] = scale * bq
            p32[b + OFF_KB + rb:b + OFF_KB + rb + BS, 0:Dh] = bk
            p32[b + OFF_VOB + rb:b + OFF_VOB + rb + BS, :] = bv @ WoT
        p32[b + OFF_OUTPB] = outpb[l]
        p32[b + OFF_LN1G] = f(p['ln1g'])[l]
        p32[b + OFF_LN1B] = f(p['ln1b'])[l]
        p32[b + OFF_LN2G] = f(p['ln2g'])[l]
        p32[b + OFF_LN2B] = f(p['ln2b'])[l]
        p32[b + OFF_FF2W:b + OFF_FF2W + FF, :] = f(p['ff2w'])[l].T       # (FF, W)
        p32[b + OFF_FF2B] = f(p['ff2b'])[l]
        c = l * L128_SIZE
        p128[c + OFF_FF1W:c + OFF_FF1W + W, :] = f(p['ff1w'])[l].T       # (W, FF)
        p128[c + OFF_FF1B] = f(p['ff1b'])[l]

    return jnp.asarray(p32), jnp.asarray(p128)


@jax.jit
def transformer_policy_forward(x, p32, p128):
    # Only glue: present the board as one lane-dense row (round / valid mask / column
    # view are all derived inside the kernel).
    xrow = x.reshape(1, BS).astype(jnp.float32)
    vmem = pltpu.MemorySpace.VMEM
    out = pl.pallas_call(
        transformer_policy_kernel,
        out_shape=jax.ShapeDtypeStruct((1, BS), jnp.float32),
        in_specs=[pl.BlockSpec(memory_space=vmem),
                  pl.BlockSpec(memory_space=vmem),
                  pl.BlockSpec(memory_space=vmem)],
        out_specs=pl.BlockSpec(memory_space=vmem),
    )(xrow, p32, p128)
    return out.reshape(BATCH, SEQ)


def ref_forward(x, p):
    # Pure-JAX reference of the PyTorch forward (for self-check).
    xi = jnp.round(x).astype(jnp.int32)
    valid = (xi == 0).astype(jnp.float32)
    B, S = xi.shape
    h = p['emb_tok'][xi + 1] + p['emb_pos'][None]

    def ln(y, g, bb):
        mu = y.mean(-1, keepdims=True)
        var = ((y - mu) ** 2).mean(-1, keepdims=True)
        return (y - mu) / jnp.sqrt(var + LN_EPS) * g + bb

    for l in range(LAYERS):
        qkv = jnp.einsum('bsw,vw->bsv', h, p['inpw'][l]) + p['inpb'][l]
        q, k, v = qkv[..., :WIDTH], qkv[..., WIDTH:2 * WIDTH], qkv[..., 2 * WIDTH:]
        qh = q.reshape(B, S, HEADS, HEAD_DIM).transpose(0, 2, 1, 3) * (HEAD_DIM ** -0.5)
        kh = k.reshape(B, S, HEADS, HEAD_DIM).transpose(0, 2, 1, 3)
        vh = v.reshape(B, S, HEADS, HEAD_DIM).transpose(0, 2, 1, 3)
        sc = jnp.einsum('bhqd,bhkd->bhqk', qh, kh)
        pr = jax.nn.softmax(sc, axis=-1)
        ao = jnp.einsum('bhqk,bhkd->bhqd', pr, vh).transpose(0, 2, 1, 3).reshape(B, S, WIDTH)
        ao = jnp.einsum('bsw,vw->bsv', ao, p['outpw'][l]) + p['outpb'][l]
        h = ln(h + ao, p['ln1g'][l], p['ln1b'][l])
        ff = jax.nn.relu(jnp.einsum('bsw,fw->bsf', h, p['ff1w'][l]) + p['ff1b'][l])
        ff = jnp.einsum('bsf,wf->bsw', ff, p['ff2w'][l]) + p['ff2b'][l]
        h = ln(h + ff, p['ln2g'][l], p['ln2b'][l])
    h = jax.nn.relu(h)
    logits = jnp.einsum('bsw,ow->bso', h, p['headw'])[..., 0] + p['headb'][0, 0]
    return jax.nn.sigmoid(logits) * valid


if __name__ == "__main__":
    key = jax.random.PRNGKey(0)
    pkey, xkey = jax.random.split(key)
    params = make_params(pkey)
    p32, p128 = pack_params(params)       # one-time weight pre-permutation / packing
    # Hex board cells in {-1, 0, 1} (opponent / empty / player), given as floats.
    x = jax.random.randint(xkey, (BATCH, SEQ), -1, 2).astype(jnp.float32)

    out = transformer_policy_forward(x, p32, p128)
    out = jax.block_until_ready(out)

    ref = ref_forward(x, params)
    assert out.shape == (BATCH, SEQ)
    np.testing.assert_allclose(np.asarray(out), np.asarray(ref), atol=3e-4, rtol=3e-4)
    print("KERNEL_OK")
</pallas_src>

<mosaic_0001>
module attributes {stable_mosaic.version = 11 : i64} {
  func.func @transformer_policy_kernel(%arg0: memref<1x32xf32, #tpu.memory_space<vmem>>, %arg1: memref<1960x32xf32, #tpu.memory_space<vmem>>, %arg2: memref<80x128xf32, #tpu.memory_space<vmem>>, %arg3: memref<1x32xf32, #tpu.memory_space<vmem>>) attributes {dimension_semantics = [], scalar_prefetch = 0 : i64, scratch_operands = 0 : i64, tpu.core_type = #tpu.core_type<tc>} {
    %c0 = arith.constant 0 : index
    %c0_0 = arith.constant 0 : index
    %0 = vector.load %arg0[%c0, %c0_0] : memref<1x32xf32, #tpu.memory_space<vmem>>, vector<1x32xf32>
    %1 = vector.shape_cast %0 : vector<1x32xf32> to vector<1x32xf32>
    %2 = vector.broadcast %1 : vector<1x32xf32> to vector<32x32xf32>
    %3 = tpu.transpose %2, [1, 0] : vector<32x32xf32> -> vector<32x32xf32>
    %c0_1 = arith.constant 0 : index
    %c0_2 = arith.constant 0 : index
    %4 = vector.load %arg1[%c0_1, %c0_2] : memref<1960x32xf32, #tpu.memory_space<vmem>>, vector<1x32xf32>
    %c8 = arith.constant 8 : index
    %c0_3 = arith.constant 0 : index
    %5 = vector.load %arg1[%c8, %c0_3] : memref<1960x32xf32, #tpu.memory_space<vmem>>, vector<1x32xf32>
    %c16 = arith.constant 16 : index
    %c0_4 = arith.constant 0 : index
    %6 = vector.load %arg1[%c16, %c0_4] : memref<1960x32xf32, #tpu.memory_space<vmem>>, vector<1x32xf32>
    %c24 = arith.constant 24 : index
    %c0_5 = arith.constant 0 : index
    %7 = vector.load %arg1[%c24, %c0_5] : memref<1960x32xf32, #tpu.memory_space<vmem>>, vector<32x32xf32>
    %8 = math.absf %3 : vector<32x32xf32>
    %cst = arith.constant 5.000000e-01 : f32
    %9 = vector.broadcast %cst : f32 to vector<32x32xf32>
    %10 = arith.cmpf olt, %8, %9 : vector<32x32xf32>
    %cst_6 = arith.constant 0.000000e+00 : f32
    %11 = vector.broadcast %cst_6 : f32 to vector<32x32xf32>
    %12 = arith.cmpf olt, %3, %11 : vector<32x32xf32>
    %13 = vector.shape_cast %4 : vector<1x32xf32> to vector<1x32xf32>
    %14 = vector.broadcast %13 : vector<1x32xf32> to vector<32x32xf32>
    %15 = vector.shape_cast %6 : vector<1x32xf32> to vector<1x32xf32>
    %16 = vector.broadcast %15 : vector<1x32xf32> to vector<32x32xf32>
    %17 = arith.select %12, %14, %16 : vector<32x32xi1>, vector<32x32xf32>
    %18 = vector.shape_cast %5 : vector<1x32xf32> to vector<1x32xf32>
    %19 = vector.broadcast %18 : vector<1x32xf32> to vector<32x32xf32>
    %20 = arith.select %10, %19, %17 : vector<32x32xi1>, vector<32x32xf32>
    %21 = arith.addf %20, %7 : vector<32x32xf32>
    %22 = tpu.iota {dimensions = array<i32: 0>} : vector<128x128xi32>
    %23 = tpu.iota {dimensions = array<i32: 1>} : vector<128x128xi32>
    %c5_i32 = arith.constant 5 : i32
    %24 = vector.broadcast %c5_i32 : i32 to vector<128x128xi32>
    %25 = arith.shrsi %22, %24 : vector<128x128xi32>
    %c5_i32_7 = arith.constant 5 : i32
    %26 = vector.broadcast %c5_i32_7 : i32 to vector<128x128xi32>
    %27 = arith.shrsi %23, %26 : vector<128x128xi32>
    %28 = arith.cmpi eq, %25, %27 : vector<128x128xi32>
    %29 = tpu.iota {dimensions = array<i32: 0>} : vector<128x128xi32>
    %30 = tpu.iota {dimensions = array<i32: 1>} : vector<128x128xi32>
    %c4_i32 = arith.constant 4 : i32
    %31 = vector.broadcast %c4_i32 : i32 to vector<128x128xi32>
    %32 = arith.shrsi %29, %31 : vector<128x128xi32>
    %c4_i32_8 = arith.constant 4 : i32
    %33 = vector.broadcast %c4_i32_8 : i32 to vector<128x128xi32>
    %34 = arith.shrsi %30, %33 : vector<128x128xi32>
    %35 = arith.cmpi eq, %32, %34 : vector<128x128xi32>
    %cst_9 = arith.constant 0.000000e+00 : f32
    %cst_10 = arith.constant -1.000000e+30 : f32
    %36 = vector.broadcast %cst_9 : f32 to vector<128x128xf32>
    %37 = vector.broadcast %cst_10 : f32 to vector<128x128xf32>
    %38 = arith.select %35, %36, %37 : vector<128x128xi1>, vector<128x128xf32>
    %c72 = arith.constant 72 : index
    %c0_11 = arith.constant 0 : index
    %39 = vector.load %arg1[%c72, %c0_11] : memref<1960x32xf32, #tpu.memory_space<vmem>>, vector<128x32xf32>
    %c200 = arith.constant 200 : index
    %c0_12 = arith.constant 0 : index
    %40 = vector.load %arg1[%c200, %c0_12] : memref<1960x32xf32, #tpu.memory_space<vmem>>, vector<128x32xf32>
    %c328 = arith.constant 328 : index
    %c0_13 = arith.constant 0 : index
    %41 = vector.load %arg1[%c328, %c0_13] : memref<1960x32xf32, #tpu.memory_space<vmem>>, vector<128x32xf32>
    %c456 = arith.constant 456 : index
    %c0_14 = arith.constant 0 : index
    %42 = vector.load %arg1[%c456, %c0_14] : memref<1960x32xf32, #tpu.memory_space<vmem>>, vector<128x32xf32>
    %c584 = arith.constant 584 : index
    %c0_15 = arith.constant 0 : index
    %43 = vector.load %arg1[%c584, %c0_15] : memref<1960x32xf32, #tpu.memory_space<vmem>>, vector<128x32xf32>
    %c712 = arith.constant 712 : index
    %c0_16 = arith.constant 0 : index
    %44 = vector.load %arg1[%c712, %c0_16] : memref<1960x32xf32, #tpu.memory_space<vmem>>, vector<128x32xf32>
    %45 = tpu.concatenate %21, %21, %21, %21 in 1 : vector<32x32xf32>, vector<32x32xf32>, vector<32x32xf32>, vector<32x32xf32> -> vector<32x128xf32>
    %46 = tpu.concatenate %45, %45, %45, %45 in 0 : vector<32x128xf32>, vector<32x128xf32>, vector<32x128xf32>, vector<32x128xf32> -> vector<128x128xf32>
    %cst_17 = arith.constant 0.000000e+00 : f32
    %47 = vector.broadcast %cst_17 : f32 to vector<128x128xf32>
    %48 = arith.select %28, %46, %47 : vector<128x128xi1>, vector<128x128xf32>
    %cst_18 = arith.constant dense<0.000000e+00> : vector<128x32xf32>
    %49 = tpu.matmul %48, %39, %cst_18 {dimension_numbers = #tpu.dot_dimension_numbers<[1], [0], [0], [1], [0, 0, 1, 1], [], []>} : vector<128x128xf32>, vector<128x32xf32>, vector<128x32xf32> -> vector<128x32xf32>
    %50 = arith.addf %49, %42 : vector<128x32xf32>
    %cst_19 = arith.constant dense<0.000000e+00> : vector<128x32xf32>
    %51 = tpu.matmul %48, %40, %cst_19 {dimension_numbers = #tpu.dot_dimension_numbers<[1], [0], [0], [1], [0, 0, 1, 1], [], []>} : vector<128x128xf32>, vector<128x32xf32>, vector<128x32xf32> -> vector<128x32xf32>
    %52 = arith.addf %51, %43 : vector<128x32xf32>
    %cst_20 = arith.constant dense<0.000000e+00> : vector<128x32xf32>
    %53 = tpu.matmul %48, %41, %cst_20 {dimension_numbers = #tpu.dot_dimension_numbers<[1], [0], [0], [1], [0, 0, 1, 1], [], []>} : vector<128x128xf32>, vector<128x32xf32>, vector<128x32xf32> -> vector<128x32xf32>
    %54 = arith.addf %53, %44 : vector<128x32xf32>
    %cst_21 = arith.constant dense<0.000000e+00> : vector<128x128xf32>
    %55 = tpu.matmul %50, %52, %cst_21 {dimension_numbers = #tpu.dot_dimension_numbers<[1], [1], [0], [0], [0, 0, 1, 0], [], []>} : vector<128x32xf32>, vector<128x32xf32>, vector<128x128xf32> -> vector<128x128xf32>
    %56 = arith.addf %55, %38 : vector<128x128xf32>
    %cst_22 = arith.constant dense<0xFF800000> : vector<128xf32>
    %57 = vector.multi_reduction <maximumf>, %56, %cst_22 [1] : vector<128x128xf32> to vector<128xf32>
    %58 = vector.shape_cast %57 : vector<128xf32> to vector<128x1xf32>
    %59 = vector.broadcast %58 : vector<128x1xf32> to vector<128x128xf32>
    %60 = arith.subf %56, %59 : vector<128x128xf32>
    %61 = math.exp %60 : vector<128x128xf32>
    %cst_23 = arith.constant dense<0.000000e+00> : vector<128xf32>
    %62 = vector.multi_reduction <add>, %61, %cst_23 [1] : vector<128x128xf32> to vector<128xf32>
    %63 = vector.shape_cast %62 : vector<128xf32> to vector<128x1xf32>
    %cst_24 = arith.constant 1.000000e+00 : f32
    %64 = vector.broadcast %cst_24 : f32 to vector<128x1xf32>
    %65 = arith.divf %64, %63 : vector<128x1xf32>
    %66 = vector.broadcast %65 : vector<128x1xf32> to vector<128x128xf32>
    %67 = arith.mulf %61, %66 : vector<128x128xf32>
    %cst_25 = arith.constant dense<0.000000e+00> : vector<128x32xf32>
    %68 = tpu.matmul %67, %54, %cst_25 {dimension_numbers = #tpu.dot_dimension_numbers<[1], [0], [0], [1], [0, 0, 1, 1], [], []>} : vector<128x128xf32>, vector<128x32xf32>, vector<128x32xf32> -> vector<128x32xf32>
    %69 = vector.extract_strided_slice %68 {offsets = [0, 0], sizes = [32, 32], strides = [1, 1]} : vector<128x32xf32> to vector<32x32xf32>
    %70 = vector.extract_strided_slice %68 {offsets = [32, 0], sizes = [32, 32], strides = [1, 1]} : vector<128x32xf32> to vector<32x32xf32>
    %71 = arith.addf %69, %70 : vector<32x32xf32>
    %72 = vector.extract_strided_slice %68 {offsets = [64, 0], sizes = [32, 32], strides = [1, 1]} : vector<128x32xf32> to vector<32x32xf32>
    %73 = arith.addf %71, %72 : vector<32x32xf32>
    %74 = vector.extract_strided_slice %68 {offsets = [96, 0], sizes = [32, 32], strides = [1, 1]} : vector<128x32xf32> to vector<32x32xf32>
    %75 = arith.addf %73, %74 : vector<32x32xf32>
    %c840 = arith.constant 840 : index
    %c0_26 = arith.constant 0 : index
    %76 = vector.load %arg1[%c840, %c0_26] : memref<1960x32xf32, #tpu.memory_space<vmem>>, vector<1x32xf32>
    %77 = vector.broadcast %76 : vector<1x32xf32> to vector<32x32xf32>
    %78 = arith.addf %75, %77 : vector<32x32xf32>
    %79 = arith.addf %21, %78 : vector<32x32xf32>
    %c848 = arith.constant 848 : index
    %c0_27 = arith.constant 0 : index
    %80 = vector.load %arg1[%c848, %c0_27] : memref<1960x32xf32, #tpu.memory_space<vmem>>, vector<1x32xf32>
    %c856 = arith.constant 856 : index
    %c0_28 = arith.constant 0 : index
    %81 = vector.load %arg1[%c856, %c0_28] : memref<1960x32xf32, #tpu.memory_space<vmem>>, vector<1x32xf32>
    %cst_29 = arith.constant dense<0.000000e+00> : vector<32xf32>
    %82 = vector.multi_reduction <add>, %79, %cst_29 [1] : vector<32x32xf32> to vector<32xf32>
    %83 = vector.shape_cast %82 : vector<32xf32> to vector<32x1xf32>
    %cst_30 = arith.constant 3.200000e+01 : f32
    %84 = vector.broadcast %cst_30 : f32 to vector<32x1xf32>
    %85 = arith.divf %83, %84 : vector<32x1xf32>
    %86 = vector.broadcast %85 : vector<32x1xf32> to vector<32x32xf32>
    %87 = arith.subf %79, %86 : vector<32x32xf32>
    %88 = arith.mulf %87, %87 : vector<32x32xf32>
    %cst_31 = arith.constant dense<0.000000e+00> : vector<32xf32>
    %89 = vector.multi_reduction <add>, %88, %cst_31 [1] : vector<32x32xf32> to vector<32xf32>
    %90 = vector.shape_cast %89 : vector<32xf32> to vector<32x1xf32>
    %cst_32 = arith.constant 3.200000e+01 : f32
    %91 = vector.broadcast %cst_32 : f32 to vector<32x1xf32>
    %92 = arith.divf %90, %91 : vector<32x1xf32>
    %cst_33 = arith.constant 9.99999974E-6 : f32
    %93 = vector.broadcast %cst_33 : f32 to vector<32x1xf32>
    %94 = arith.addf %92, %93 : vector<32x1xf32>
    %95 = math.rsqrt %94 : vector<32x1xf32>
    %96 = vector.broadcast %95 : vector<32x1xf32> to vector<32x32xf32>
    %97 = arith.mulf %87, %96 : vector<32x32xf32>
    %98 = vector.broadcast %80 : vector<1x32xf32> to vector<32x32xf32>
    %99 = arith.mulf %97, %98 : vector<32x32xf32>
    %100 = vector.broadcast %81 : vector<1x32xf32> to vector<32x32xf32>
    %101 = arith.addf %99, %100 : vector<32x32xf32>
    %c0_34 = arith.constant 0 : index
    %c0_35 = arith.constant 0 : index
    %102 = vector.load %arg2[%c0_34, %c0_35] : memref<80x128xf32, #tpu.memory_space<vmem>>, vector<32x128xf32>
    %c32 = arith.constant 32 : index
    %c0_36 = arith.constant 0 : index
    %103 = vector.load %arg2[%c32, %c0_36] : memref<80x128xf32, #tpu.memory_space<vmem>>, vector<1x128xf32>
    %cst_37 = arith.constant dense<0.000000e+00> : vector<32x128xf32>
    %104 = tpu.matmul %101, %102, %cst_37 {dimension_numbers = #tpu.dot_dimension_numbers<[1], [0], [0], [1], [0, 0, 1, 1], [], []>} : vector<32x32xf32>, vector<32x128xf32>, vector<32x128xf32> -> vector<32x128xf32>
    %105 = vector.broadcast %103 : vector<1x128xf32> to vector<32x128xf32>
    %106 = arith.addf %104, %105 : vector<32x128xf32>
    %cst_38 = arith.constant 0.000000e+00 : f32
    %107 = vector.broadcast %cst_38 : f32 to vector<32x128xf32>
    %108 = arith.maximumf %106, %107 : vector<32x128xf32>
    %c880 = arith.constant 880 : index
    %c0_39 = arith.constant 0 : index
    %109 = vector.load %arg1[%c880, %c0_39] : memref<1960x32xf32, #tpu.memory_space<vmem>>, vector<128x32xf32>
    %c1008 = arith.constant 1008 : index
    %c0_40 = arith.constant 0 : index
    %110 = vector.load %arg1[%c1008, %c0_40] : memref<1960x32xf32, #tpu.memory_space<vmem>>, vector<1x32xf32>
    %cst_41 = arith.constant dense<0.000000e+00> : vector<32x32xf32>
    %111 = tpu.matmul %108, %109, %cst_41 {dimension_numbers = #tpu.dot_dimension_numbers<[1], [0], [0], [1], [0, 0, 1, 1], [], []>} : vector<32x128xf32>, vector<128x32xf32>, vector<32x32xf32> -> vector<32x32xf32>
    %112 = vector.broadcast %110 : vector<1x32xf32> to vector<32x32xf32>
    %113 = arith.addf %111, %112 : vector<32x32xf32>
    %114 = arith.addf %101, %113 : vector<32x32xf32>
    %c864 = arith.constant 864 : index
    %c0_42 = arith.constant 0 : index
    %115 = vector.load %arg1[%c864, %c0_42] : memref<1960x32xf32, #tpu.memory_space<vmem>>, vector<1x32xf32>
    %c872 = arith.constant 872 : index
    %c0_43 = arith.constant 0 : index
    %116 = vector.load %arg1[%c872, %c0_43] : memref<1960x32xf32, #tpu.memory_space<vmem>>, vector<1x32xf32>
    %cst_44 = arith.constant dense<0.000000e+00> : vector<32xf32>
    %117 = vector.multi_reduction <add>, %114, %cst_44 [1] : vector<32x32xf32> to vector<32xf32>
    %118 = vector.shape_cast %117 : vector<32xf32> to vector<32x1xf32>
    %cst_45 = arith.constant 3.200000e+01 : f32
    %119 = vector.broadcast %cst_45 : f32 to vector<32x1xf32>
    %120 = arith.divf %118, %119 : vector<32x1xf32>
    %121 = vector.broadcast %120 : vector<32x1xf32> to vector<32x32xf32>
    %122 = arith.subf %114, %121 : vector<32x32xf32>
    %123 = arith.mulf %122, %122 : vector<32x32xf32>
    %cst_46 = arith.constant dense<0.000000e+00> : vector<32xf32>
    %124 = vector.multi_reduction <add>, %123, %cst_46 [1] : vector<32x32xf32> to vector<32xf32>
    %125 = vector.shape_cast %124 : vector<32xf32> to vector<32x1xf32>
    %cst_47 = arith.constant 3.200000e+01 : f32
    %126 = vector.broadcast %cst_47 : f32 to vector<32x1xf32>
    %127 = arith.divf %125, %126 : vector<32x1xf32>
    %cst_48 = arith.constant 9.99999974E-6 : f32
    %128 = vector.broadcast %cst_48 : f32 to vector<32x1xf32>
    %129 = arith.addf %127, %128 : vector<32x1xf32>
    %130 = math.rsqrt %129 : vector<32x1xf32>
    %131 = vector.broadcast %130 : vector<32x1xf32> to vector<32x32xf32>
    %132 = arith.mulf %122, %131 : vector<32x32xf32>
    %133 = vector.broadcast %115 : vector<1x32xf32> to vector<32x32xf32>
    %134 = arith.mulf %132, %133 : vector<32x32xf32>
    %135 = vector.broadcast %116 : vector<1x32xf32> to vector<32x32xf32>
    %136 = arith.addf %134, %135 : vector<32x32xf32>
    %c1016 = arith.constant 1016 : index
    %c0_49 = arith.constant 0 : index
    %137 = vector.load %arg1[%c1016, %c0_49] : memref<1960x32xf32, #tpu.memory_space<vmem>>, vector<128x32xf32>
    %c1144 = arith.constant 1144 : index
    %c0_50 = arith.constant 0 : index
    %138 = vector.load %arg1[%c1144, %c0_50] : memref<1960x32xf32, #tpu.memory_space<vmem>>, vector<128x32xf32>
    %c1272 = arith.constant 1272 : index
    %c0_51 = arith.constant 0 : index
    %139 = vector.load %arg1[%c1272, %c0_51] : memref<1960x32xf32, #tpu.memory_space<vmem>>, vector<128x32xf32>
    %c1400 = arith.constant 1400 : index
    %c0_52 = arith.constant 0 : index
    %140 = vector.load %arg1[%c1400, %c0_52] : memref<1960x32xf32, #tpu.memory_space<vmem>>, vector<128x32xf32>
    %c1528 = arith.constant 1528 : index
    %c0_53 = arith.constant 0 : index
    %141 = vector.load %arg1[%c1528, %c0_53] : memref<1960x32xf32, #tpu.memory_space<vmem>>, vector<128x32xf32>
    %c1656 = arith.constant 1656 : index
    %c0_54 = arith.constant 0 : index
    %142 = vector.load %arg1[%c1656, %c0_54] : memref<1960x32xf32, #tpu.memory_space<vmem>>, vector<128x32xf32>
    %143 = tpu.concatenate %136, %136, %136, %136 in 1 : vector<32x32xf32>, vector<32x32xf32>, vector<32x32xf32>, vector<32x32xf32> -> vector<32x128xf32>
    %144 = tpu.concatenate %143, %143, %143, %143 in 0 : vector<32x128xf32>, vector<32x128xf32>, vector<32x128xf32>, vector<32x128xf32> -> vector<128x128xf32>
    %cst_55 = arith.constant 0.000000e+00 : f32
    %145 = vector.broadcast %cst_55 : f32 to vector<128x128xf32>
    %146 = arith.select %28, %144, %145 : vector<128x128xi1>, vector<128x128xf32>
    %cst_56 = arith.constant dense<0.000000e+00> : vector<128x32xf32>
    %147 = tpu.matmul %146, %137, %cst_56 {dimension_numbers = #tpu.dot_dimension_numbers<[1], [0], [0], [1], [0, 0, 1, 1], [], []>} : vector<128x128xf32>, vector<128x32xf32>, vector<128x32xf32> -> vector<128x32xf32>
    %148 = arith.addf %147, %140 : vector<128x32xf32>
    %cst_57 = arith.constant dense<0.000000e+00> : vector<128x32xf32>
    %149 = tpu.matmul %146, %138, %cst_57 {dimension_numbers = #tpu.dot_dimension_numbers<[1], [0], [0], [1], [0, 0, 1, 1], [], []>} : vector<128x128xf32>, vector<128x32xf32>, vector<128x32xf32> -> vector<128x32xf32>
    %150 = arith.addf %149, %141 : vector<128x32xf32>
    %cst_58 = arith.constant dense<0.000000e+00> : vector<128x32xf32>
    %151 = tpu.matmul %146, %139, %cst_58 {dimension_numbers = #tpu.dot_dimension_numbers<[1], [0], [0], [1], [0, 0, 1, 1], [], []>} : vector<128x128xf32>, vector<128x32xf32>, vector<128x32xf32> -> vector<128x32xf32>
    %152 = arith.addf %151, %142 : vector<128x32xf32>
    %cst_59 = arith.constant dense<0.000000e+00> : vector<128x128xf32>
    %153 = tpu.matmul %148, %150, %cst_59 {dimension_numbers = #tpu.dot_dimension_numbers<[1], [1], [0], [0], [0, 0, 1, 0], [], []>} : vector<128x32xf32>, vector<128x32xf32>, vector<128x128xf32> -> vector<128x128xf32>
    %154 = arith.addf %153, %38 : vector<128x128xf32>
    %cst_60 = arith.constant dense<0xFF800000> : vector<128xf32>
    %155 = vector.multi_reduction <maximumf>, %154, %cst_60 [1] : vector<128x128xf32> to vector<128xf32>
    %156 = vector.shape_cast %155 : vector<128xf32> to vector<128x1xf32>
    %157 = vector.broadcast %156 : vector<128x1xf32> to vector<128x128xf32>
    %158 = arith.subf %154, %157 : vector<128x128xf32>
    %159 = math.exp %158 : vector<128x128xf32>
    %cst_61 = arith.constant dense<0.000000e+00> : vector<128xf32>
    %160 = vector.multi_reduction <add>, %159, %cst_61 [1] : vector<128x128xf32> to vector<128xf32>
    %161 = vector.shape_cast %160 : vector<128xf32> to vector<128x1xf32>
    %cst_62 = arith.constant 1.000000e+00 : f32
    %162 = vector.broadcast %cst_62 : f32 to vector<128x1xf32>
    %163 = arith.divf %162, %161 : vector<128x1xf32>
    %164 = vector.broadcast %163 : vector<128x1xf32> to vector<128x128xf32>
    %165 = arith.mulf %159, %164 : vector<128x128xf32>
    %cst_63 = arith.constant dense<0.000000e+00> : vector<128x32xf32>
    %166 = tpu.matmul %165, %152, %cst_63 {dimension_numbers = #tpu.dot_dimension_numbers<[1], [0], [0], [1], [0, 0, 1, 1], [], []>} : vector<128x128xf32>, vector<128x32xf32>, vector<128x32xf32> -> vector<128x32xf32>
    %167 = vector.extract_strided_slice %166 {offsets = [0, 0], sizes = [32, 32], strides = [1, 1]} : vector<128x32xf32> to vector<32x32xf32>
    %168 = vector.extract_strided_slice %166 {offsets = [32, 0], sizes = [32, 32], strides = [1, 1]} : vector<128x32xf32> to vector<32x32xf32>
    %169 = arith.addf %167, %168 : vector<32x32xf32>
    %170 = vector.extract_strided_slice %166 {offsets = [64, 0], sizes = [32, 32], strides = [1, 1]} : vector<128x32xf32> to vector<32x32xf32>
    %171 = arith.addf %169, %170 : vector<32x32xf32>
    %172 = vector.extract_strided_slice %166 {offsets = [96, 0], sizes = [32, 32], strides = [1, 1]} : vector<128x32xf32> to vector<32x32xf32>
    %173 = arith.addf %171, %172 : vector<32x32xf32>
    %c1784 = arith.constant 1784 : index
    %c0_64 = arith.constant 0 : index
    %174 = vector.load %arg1[%c1784, %c0_64] : memref<1960x32xf32, #tpu.memory_space<vmem>>, vector<1x32xf32>
    %175 = vector.broadcast %174 : vector<1x32xf32> to vector<32x32xf32>
    %176 = arith.addf %173, %175 : vector<32x32xf32>
    %177 = arith.addf %136, %176 : vector<32x32xf32>
    %c1792 = arith.constant 1792 : index
    %c0_65 = arith.constant 0 : index
    %178 = vector.load %arg1[%c1792, %c0_65] : memref<1960x32xf32, #tpu.memory_space<vmem>>, vector<1x32xf32>
    %c1800 = arith.constant 1800 : index
    %c0_66 = arith.constant 0 : index
    %179 = vector.load %arg1[%c1800, %c0_66] : memref<1960x32xf32, #tpu.memory_space<vmem>>, vector<1x32xf32>
    %cst_67 = arith.constant dense<0.000000e+00> : vector<32xf32>
    %180 = vector.multi_reduction <add>, %177, %cst_67 [1] : vector<32x32xf32> to vector<32xf32>
    %181 = vector.shape_cast %180 : vector<32xf32> to vector<32x1xf32>
    %cst_68 = arith.constant 3.200000e+01 : f32
    %182 = vector.broadcast %cst_68 : f32 to vector<32x1xf32>
    %183 = arith.divf %181, %182 : vector<32x1xf32>
    %184 = vector.broadcast %183 : vector<32x1xf32> to vector<32x32xf32>
    %185 = arith.subf %177, %184 : vector<32x32xf32>
    %186 = arith.mulf %185, %185 : vector<32x32xf32>
    %cst_69 = arith.constant dense<0.000000e+00> : vector<32xf32>
    %187 = vector.multi_reduction <add>, %186, %cst_69 [1] : vector<32x32xf32> to vector<32xf32>
    %188 = vector.shape_cast %187 : vector<32xf32> to vector<32x1xf32>
    %cst_70 = arith.constant 3.200000e+01 : f32
    %189 = vector.broadcast %cst_70 : f32 to vector<32x1xf32>
    %190 = arith.divf %188, %189 : vector<32x1xf32>
    %cst_71 = arith.constant 9.99999974E-6 : f32
    %191 = vector.broadcast %cst_71 : f32 to vector<32x1xf32>
    %192 = arith.addf %190, %191 : vector<32x1xf32>
    %193 = math.rsqrt %192 : vector<32x1xf32>
    %194 = vector.broadcast %193 : vector<32x1xf32> to vector<32x32xf32>
    %195 = arith.mulf %185, %194 : vector<32x32xf32>
    %196 = vector.broadcast %178 : vector<1x32xf32> to vector<32x32xf32>
    %197 = arith.mulf %195, %196 : vector<32x32xf32>
    %198 = vector.broadcast %179 : vector<1x32xf32> to vector<32x32xf32>
    %199 = arith.addf %197, %198 : vector<32x32xf32>
    %c40 = arith.constant 40 : index
    %c0_72 = arith.constant 0 : index
    %200 = vector.load %arg2[%c40, %c0_72] : memref<80x128xf32, #tpu.memory_space<vmem>>, vector<32x128xf32>
    %c72_73 = arith.constant 72 : index
    %c0_74 = arith.constant 0 : index
    %201 = vector.load %arg2[%c72_73, %c0_74] : memref<80x128xf32, #tpu.memory_space<vmem>>, vector<1x128xf32>
    %cst_75 = arith.constant dense<0.000000e+00> : vector<32x128xf32>
    %202 = tpu.matmul %199, %200, %cst_75 {dimension_numbers = #tpu.dot_dimension_numbers<[1], [0], [0], [1], [0, 0, 1, 1], [], []>} : vector<32x32xf32>, vector<32x128xf32>, vector<32x128xf32> -> vector<32x128xf32>
    %203 = vector.broadcast %201 : vector<1x128xf32> to vector<32x128xf32>
    %204 = arith.addf %202, %203 : vector<32x128xf32>
    %cst_76 = arith.constant 0.000000e+00 : f32
    %205 = vector.broadcast %cst_76 : f32 to vector<32x128xf32>
    %206 = arith.maximumf %204, %205 : vector<32x128xf32>
    %c1824 = arith.constant 1824 : index
    %c0_77 = arith.constant 0 : index
    %207 = vector.load %arg1[%c1824, %c0_77] : memref<1960x32xf32, #tpu.memory_space<vmem>>, vector<128x32xf32>
    %c1952 = arith.constant 1952 : index
    %c0_78 = arith.constant 0 : index
    %208 = vector.load %arg1[%c1952, %c0_78] : memref<1960x32xf32, #tpu.memory_space<vmem>>, vector<1x32xf32>
    %cst_79 = arith.constant dense<0.000000e+00> : vector<32x32xf32>
    %209 = tpu.matmul %206, %207, %cst_79 {dimension_numbers = #tpu.dot_dimension_numbers<[1], [0], [0], [1], [0, 0, 1, 1], [], []>} : vector<32x128xf32>, vector<128x32xf32>, vector<32x32xf32> -> vector<32x32xf32>
    %210 = vector.broadcast %208 : vector<1x32xf32> to vector<32x32xf32>
    %211 = arith.addf %209, %210 : vector<32x32xf32>
    %212 = arith.addf %199, %211 : vector<32x32xf32>
    %c1808 = arith.constant 1808 : index
    %c0_80 = arith.constant 0 : index
    %213 = vector.load %arg1[%c1808, %c0_80] : memref<1960x32xf32, #tpu.memory_space<vmem>>, vector<1x32xf32>
    %c1816 = arith.constant 1816 : index
    %c0_81 = arith.constant 0 : index
    %214 = vector.load %arg1[%c1816, %c0_81] : memref<1960x32xf32, #tpu.memory_space<vmem>>, vector<1x32xf32>
    %cst_82 = arith.constant dense<0.000000e+00> : vector<32xf32>
    %215 = vector.multi_reduction <add>, %212, %cst_82 [1] : vector<32x32xf32> to vector<32xf32>
    %216 = vector.shape_cast %215 : vector<32xf32> to vector<32x1xf32>
    %cst_83 = arith.constant 3.200000e+01 : f32
    %217 = vector.broadcast %cst_83 : f32 to vector<32x1xf32>
    %218 = arith.divf %216, %217 : vector<32x1xf32>
    %219 = vector.broadcast %218 : vector<32x1xf32> to vector<32x32xf32>
    %220 = arith.subf %212, %219 : vector<32x32xf32>
    %221 = arith.mulf %220, %220 : vector<32x32xf32>
    %cst_84 = arith.constant dense<0.000000e+00> : vector<32xf32>
    %222 = vector.multi_reduction <add>, %221, %cst_84 [1] : vector<32x32xf32> to vector<32xf32>
    %223 = vector.shape_cast %222 : vector<32xf32> to vector<32x1xf32>
    %cst_85 = arith.constant 3.200000e+01 : f32
    %224 = vector.broadcast %cst_85 : f32 to vector<32x1xf32>
    %225 = arith.divf %223, %224 : vector<32x1xf32>
    %cst_86 = arith.constant 9.99999974E-6 : f32
    %226 = vector.broadcast %cst_86 : f32 to vector<32x1xf32>
    %227 = arith.addf %225, %226 : vector<32x1xf32>
    %228 = math.rsqrt %227 : vector<32x1xf32>
    %229 = vector.broadcast %228 : vector<32x1xf32> to vector<32x32xf32>
    %230 = arith.mulf %220, %229 : vector<32x32xf32>
    %231 = vector.broadcast %213 : vector<1x32xf32> to vector<32x32xf32>
    %232 = arith.mulf %230, %231 : vector<32x32xf32>
    %233 = vector.broadcast %214 : vector<1x32xf32> to vector<32x32xf32>
    %234 = arith.addf %232, %233 : vector<32x32xf32>
    %cst_87 = arith.constant 0.000000e+00 : f32
    %235 = vector.broadcast %cst_87 : f32 to vector<32x32xf32>
    %236 = arith.maximumf %234, %235 : vector<32x32xf32>
    %c56 = arith.constant 56 : index
    %c0_88 = arith.constant 0 : index
    %237 = vector.load %arg1[%c56, %c0_88] : memref<1960x32xf32, #tpu.memory_space<vmem>>, vector<1x32xf32>
    %c64 = arith.constant 64 : index
    %c0_89 = arith.constant 0 : index
    %238 = vector.load %arg1[%c64, %c0_89] : memref<1960x32xf32, #tpu.memory_space<vmem>>, vector<1x32xf32>
    %cst_90 = arith.constant dense<0.000000e+00> : vector<1x32xf32>
    %239 = tpu.matmul %237, %236, %cst_90 {dimension_numbers = #tpu.dot_dimension_numbers<[1], [1], [0], [0], [0, 0, 1, 0], [], []>} : vector<1x32xf32>, vector<32x32xf32>, vector<1x32xf32> -> vector<1x32xf32>
    %240 = arith.addf %239, %238 : vector<1x32xf32>
    %cst_91 = arith.constant 0.000000e+00 : f32
    %241 = vector.broadcast %cst_91 : f32 to vector<1x32xf32>
    %242 = arith.subf %241, %240 : vector<1x32xf32>
    %243 = math.exp %242 : vector<1x32xf32>
    %cst_92 = arith.constant 1.000000e+00 : f32
    %244 = vector.broadcast %cst_92 : f32 to vector<1x32xf32>
    %245 = arith.addf %244, %243 : vector<1x32xf32>
    %cst_93 = arith.constant 1.000000e+00 : f32
    %246 = vector.broadcast %cst_93 : f32 to vector<1x32xf32>
    %247 = arith.divf %246, %245 : vector<1x32xf32>
    %248 = math.absf %0 : vector<1x32xf32>
    %cst_94 = arith.constant 5.000000e-01 : f32
    %249 = vector.broadcast %cst_94 : f32 to vector<1x32xf32>
    %250 = arith.cmpf olt, %248, %249 : vector<1x32xf32>
    %251 = arith.extui %250 : vector<1x32xi1> to vector<1x32xi32>
    %252 = arith.sitofp %251 : vector<1x32xi32> to vector<1x32xf32>
    %253 = arith.mulf %247, %252 : vector<1x32xf32>
    %c0_95 = arith.constant 0 : index
    %c0_96 = arith.constant 0 : index
    %254 = vector.load %arg3[%c0_95, %c0_96] : memref<1x32xf32, #tpu.memory_space<vmem>>, vector<1x32xf32>
    tpu.vector_store %arg3[%c0_95, %c0_96], %253 {strides = array<i32>} : memref<1x32xf32, #tpu.memory_space<vmem>>, vector<1x32xf32>,
    return
  }
}

</mosaic_0001>

<bundles_post_ra>
// kernel: transformer_policy_forward.1
= control target key start
LH: loop header
LB: loop body
LE: loop exit
PB: predicated region body
PF: predicated region fallthrough
CT: control target
= control target key end

     0   :  { %v16_v0 = vlaneseq  ;;  %s4788_s28 = smov 96   ;;  %s4789_s29 = smov 32   ;;  %vm6898_vm8 = vcmask 261120   ;;  %vm6897_vm9 = vcmask 523264   ;;  %vm6896_vm10 = vcmask 785408   ;;  %s6892_s0 = inlined_call_operand.vmem [shape: f32[1,32], index: 0, kind: input, shape index: {}]   ;;  %s6893_s1 = inlined_call_operand.vmem [shape: f32[1960,32], index: 1, kind: input, shape index: {}]   ;;  %s6894_s2 = inlined_call_operand.vmem [shape: f32[80,128], index: 2, kind: input, shape index: {}]   ;;  %s6895_s3 = inlined_call_operand.vmem [shape: f32[1,32], index: 3, kind: output, shape index: {}]  }
   0x1   :  { %v4787_v2 = vld [vmem:[%s6892_s0] ss:$0 sm:$0xff]  ;;  %v211_v5 = vld [vmem:[%s6893_s1 + $0xb8] sm:$0xff]  ;;  %v210_v7 = vld [vmem:[%s6893_s1 + $0xb0] sm:$0xff]  ;;  %s4790_s9 = smov 64  }
   0x2   :  { %v4815_v1 = vshrl.u32 %v16_v0, 7  ;;  %21 = vxpose.xlu0.b32.start [1/4] (short) (narrow) %v4787_v2, 32  ;;  %v212_v3 = vld [vmem:[%s6893_s1 + $0xc0] sm:$0xff]  ;;  %v227_v6 = vld [vmem:[%s6893_s1 + $0x138] sm:$0xff]  ;;  %v226_v8 = vld [vmem:[%s6893_s1 + $0x130] sm:$0xff]  ;;  %v4991_v63 = vand.u32 127, %v16_v0 }
   0x3   :  { %v228_v4 = vld [vmem:[%s6893_s1 + $0x140] sm:$0xff]  ;;  %3941 = vmatprep.subr.mxu0 %v212_v3  ;;  %v209_v9 = vld [vmem:[%s6893_s1 + $0xa8] sm:$0xff]  ;;  %v207_v13 = vld [vmem:[%s6893_s1 + $0x98] sm:$0xff] }
   0x4   :  { %3997 = vmatprep.subr.mxu1 %v228_v4  ;;  %3942 = vmatpush3.msra.mxu0 %v212_v3  ;;  %v225_v10 = vld [vmem:[%s6893_s1 + $0x128] sm:$0xff]  ;;  %v208_v11 = vld [vmem:[%s6893_s1 + $0xa0] sm:$0xff]  ;;  %v223_v14 = vld [vmem:[%s6893_s1 + $0x118] sm:$0xff]  ;;  %v115_v3 = vshra.s32 %v4815_v1, 5 }
   0x5   :  { %3998 = vmatpush3.msra.mxu1 %v228_v4  ;;  %3943 = vmatprep.subr.mxu0 %v211_v5  ;;  %v224_v12 = vld [vmem:[%s6893_s1 + $0x120] sm:$0xff]  ;;  %v206_v15 = vld [vmem:[%s6893_s1 + $0x90] sm:$0xff]  ;;  %v205_v17 = vld [vmem:[%s6893_s1 + $0x88] sm:$0xff]  ;;  %v4995_v4 = vshra.s32 %v4991_v63, 5 }
   0x6   :  { %22 = vxpose.xlu0.b32.cont [2/4] (short) (narrow) %v4787_v2, 32  ;;  %3999 = vmatprep.subr.mxu1 %v227_v6  ;;  %v222_v16 = vld [vmem:[%s6893_s1 + $0x110] sm:$0xff]  ;;  %v221_v18 = vld [vmem:[%s6893_s1 + $0x108] sm:$0xff]  ;;  %v204_v19 = vld [vmem:[%s6893_s1 + $0x80] sm:$0xff] }
   0x7   :  { %3944 = vmatpush3.msra.mxu0 %v211_v5  ;;  %4000 = vmatpush3.msra.mxu1 %v227_v6  ;;  %v220_v20 = vld [vmem:[%s6893_s1 + $0x100] sm:$0xff]  ;;  %v203_v21 = vld [vmem:[%s6893_s1 + $0x78] sm:$0xff]  ;;  %v202_v23 = vld [vmem:[%s6893_s1 + $0x70] sm:$0xff]  ;;  %vm5000_vm11 = vcmp.eq.s32.totalorder %v115_v3, %v4995_v4  ;;  %v5149_v3 = vadd.s32 72, %v4815_v1 }
   0x8   :  { %3945 = vmatprep.subr.mxu0 %v210_v7  ;;  %4001 = vmatprep.subr.mxu1 %v226_v8  ;;  %v219_v22 = vld [vmem:[%s6893_s1 + $0xf8] sm:$0xff]  ;;  %v218_v24 = vld [vmem:[%s6893_s1 + $0xf0] sm:$0xff]  ;;  %v4889_v25 = vld [vmem:[%s6893_s1] ss:$0 sm:$0xff] }
   0x9   :  { %3946 = vmatpush3.msra.mxu0 %v210_v7  ;;  %4002 = vmatpush3.msra.mxu1 %v226_v8  ;;  %v4894_v26 = vld [vmem:[%s6893_s1 + $0x10] ss:$0 sm:$0xff]  ;;  %v201_v28 = vld [vmem:[%s6893_s1 + $0x68] sm:$0xff]  ;;  %v56_v31 = vld [vmem:[%s6893_s1 + $0x18] sm:$0xff]  ;;  %v6955_v7 = vmov 0 }
   0xa   :  { %23 = vxpose.xlu0.b32.cont [3/4] (short) (narrow) %v4787_v2, 32  ;;  %3947 = vmatprep.subr.mxu0 %v209_v9  ;;  %v217_v29 = vld [vmem:[%s6893_s1 + $0xe8] sm:$0xff]  ;;  %v200_v34 = vld [vmem:[%s6893_s1 + $0x60] sm:$0xff]  ;;  %v199_v36 = vld [vmem:[%s6893_s1 + $0x58] sm:$0xff]  ;;  %v6956_v7 = vsel %vm5000_vm11, 4294967295, %v6955_v7 }
   0xb   :  { %4003 = vmatprep.subr.mxu1 %v225_v10  ;;  %3948 = vmatpush3.msra.mxu0 %v209_v9  ;;  %v4905_v30 = vld [vmem:[%s6893_s1 + $0x8] ss:$0 sm:$0xff]  ;;  %v216_v35 = vld [vmem:[%s6893_s1 + $0xe0] sm:$0xff]  ;;  %v215_v37 = vld [vmem:[%s6893_s1 + $0xd8] sm:$0xff]  ;;  %6957 = vst [vmem:[#allocation6_spill] sm:$0xff] %v6956_v7 }
   0xc   :  { %4004 = vmatpush3.msra.mxu1 %v225_v10  ;;  %3949 = vmatprep.subr.mxu0 %v208_v11  ;;  %v198_v43 = vld [vmem:[%s6893_s1 + $0x50] sm:$0xff]  ;;  %v197_v45 = vld [vmem:[%s6893_s1 + $0x48] sm:$0xff]  ;;  %v57_v47 = vld [vmem:[%s6893_s1 + $0x20] sm:$0xff]  ;;  %v5015_v10 = vadd.s32 8, %v4815_v1 }
   0xd   :  { %4005 = vmatprep.subr.mxu1 %v224_v12  ;;  %3950 = vmatpush3.msra.mxu0 %v208_v11  ;;  %v214_v44 = vld [vmem:[%s6893_s1 + $0xd0] sm:$0xff]  ;;  %v213_v46 = vld [vmem:[%s6893_s1 + $0xc8] sm:$0xff]  ;;  %v244_v59 = vld [vmem:[%s6893_s1 + $0x1c0] sm:$0xff] }
   0xe   :  { %24 = vxpose.xlu0.b32.end [4/4] (short) (narrow) %v4787_v2, 32  ;;  %4006 = vmatpush3.msra.mxu1 %v224_v12  ;;  %v58_v53 = vld [vmem:[%s6893_s1 + $0x28] sm:$0xff]  ;;  %v59_v60 = vld [vmem:[%s6893_s1 + $0x30] sm:$0xff]  ;;  %v116_v12 = vshra.s32 %v5015_v10, 5 }
   0xf   :  { %3951 = vmatprep.subr.mxu0 %v207_v13  ;;  %4007 = vmatprep.subr.mxu1 %v223_v14 }
  0x10   :  { %3952 = vmatpush3.msra.mxu0 %v207_v13  ;;  %4008 = vmatpush3.msra.mxu1 %v223_v14  ;;  %vm5021_vm12 = vcmp.eq.s32.totalorder %v116_v12, %v4995_v4  ;;  %v124_v12 = vshra.s32 %v5149_v3, 5 }
  0x11   :  { %3953 = vmatprep.subr.mxu0 %v206_v15  ;;  %4009 = vmatprep.subr.mxu1 %v222_v16 }
  0x12   :  { %3954 = vmatpush3.msra.mxu0 %v206_v15  ;;  %4010 = vmatpush3.msra.mxu1 %v222_v16  ;;  %v6958_v15 = vmov 0 }
  0x13   :  { %3955 = vmatprep.subr.mxu0 %v205_v17  ;;  %4011 = vmatprep.subr.mxu1 %v221_v18  ;;  %v6959_v15 = vsel %vm5021_vm12, 4294967295, %v6958_v15 }
  0x14   :  { %3956 = vmatpush3.msra.mxu0 %v205_v17  ;;  %4012 = vmatpush3.msra.mxu1 %v221_v18  ;;  %6960 = vst [vmem:[#allocation7_spill] sm:$0xff] %v6959_v15 }
  0x15   :  { %3957 = vmatprep.subr.mxu0 %v204_v19  ;;  %4013 = vmatprep.subr.mxu1 %v220_v20 }
  0x16   :  { %3958 = vmatpush3.msra.mxu0 %v204_v19  ;;  %4014 = vmatpush3.msra.mxu1 %v220_v20  ;;  %v243_v19 = vld [vmem:[%s6893_s1 + $0x1b8] sm:$0xff]  ;;  %v5039_v20 = vadd.s32 16, %v4815_v1 }
  0x17   :  { %3959 = vmatprep.subr.mxu0 %v203_v21  ;;  %4015 = vmatprep.subr.mxu1 %v219_v22 }
  0x18   :  { %3960 = vmatpush3.msra.mxu0 %v203_v21  ;;  %4016 = vmatpush3.msra.mxu1 %v219_v22  ;;  %v242_v21 = vld [vmem:[%s6893_s1 + $0x1b0] sm:$0xff] }
  0x19   :  { %3961 = vmatprep.subr.mxu0 %v202_v23  ;;  %4017 = vmatprep.subr.mxu1 %v218_v24 }
  0x1a   :  { %3962 = vmatpush3.msra.mxu0 %v202_v23  ;;  %4018 = vmatpush3.msra.mxu1 %v218_v24  ;;  %v241_v23 = vld [vmem:[%s6893_s1 + $0x1a8] sm:$0xff]  ;;  %v117_v24 = vshra.s32 %v5039_v20, 5 }
  0x1b   :  { %3963 = vmatprep.subr.mxu0 %v201_v28  ;;  %4019 = vmatprep.subr.mxu1 %v217_v29 }
  0x1c   :  { %3964 = vmatpush3.msra.mxu0 %v201_v28  ;;  %4020 = vmatpush3.msra.mxu1 %v217_v29  ;;  %vm5057_vm13 = vcmp.eq.s32.totalorder %v117_v24, %v4995_v4  ;;  %v6961_v29 = vmov 0  ;;  %v6985_v24 = vmov 0 }
  0x1d   :  { %3965 = vmatprep.subr.mxu0 %v200_v34  ;;  %4021 = vmatprep.subr.mxu1 %v216_v35  ;;  %v6962_v29 = vsel %vm5057_vm13, 4294967295, %v6961_v29 }
  0x1e   :  { %3966 = vmatpush3.msra.mxu0 %v200_v34  ;;  %4022 = vmatpush3.msra.mxu1 %v216_v35  ;;  %6963 = vst [vmem:[#allocation8_spill] sm:$0xff] %v6962_v29  ;;  %v237_v34 = vld [vmem:[%s6893_s1 + $0x188] sm:$0xff]  ;;  %v5078_v35 = vadd.s32 24, %v4815_v1 }
  0x1f   :  { %3967 = vmatprep.subr.mxu0 %v199_v36  ;;  %4023 = vmatprep.subr.mxu1 %v215_v37 }
  0x20   :  { %3968 = vmatpush3.msra.mxu0 %v199_v36  ;;  %4024 = vmatpush3.msra.mxu1 %v215_v37  ;;  %v5081_v37 = vadd.s32 32, %v4815_v1 }
  0x21   :  { %3969 = vmatprep.subr.mxu0 %v198_v43  ;;  %4025 = vmatprep.subr.mxu1 %v214_v44 }
  0x22   :  { %3970 = vmatpush3.msra.mxu0 %v198_v43  ;;  %4026 = vmatpush3.msra.mxu1 %v214_v44  ;;  %v119_v44 = vshra.s32 %v5081_v37, 5 }
  0x23   :  { %3971 = vmatprep.subr.mxu0 %v197_v45  ;;  %4027 = vmatprep.subr.mxu1 %v213_v46 }
  0x24   :  { %3972 = vmatpush3.msra.mxu0 %v197_v45  ;;  %4028 = vmatpush3.msra.mxu1 %v213_v46  ;;  %v5095_v45 = vadd.s32 48, %v4815_v1  ;;  %v234_v46 = vld [vmem:[%s6893_s1 + $0x170] sm:$0xff]  ;;  %vm5116_vm15 = vcmp.eq.s32.totalorder %v119_v44, %v4995_v4 }
  0x25   :  { %4053 = vmatprep.subr.mxu0 %v244_v59 }
  0x7e   :  { %v37_v27 = vpop.trf.xlu0 }
  0x7f   :  { %v60_v32 = vand.u32 2147483647, %v37_v27  ;;  %vm68_vm0 = vcmp.lt.f32.partialorder %v37_v27, 0.0  ;;  %v239_v27 = vld [vmem:[%s6893_s1 + $0x198] sm:$0xff] }
  0x80   :  { %v80_v33 = vsel %vm68_vm0, %v4889_v25, %v4894_v26 }
  0x81   :  { %vm64_vm1 = vcmp.lt.f32.partialorder %v60_v32, 0.5  ;;  %v238_v32 = vld [vmem:[%s6893_s1 + $0x190] sm:$0xff] }
  0x82   :  { %v88_v38 = vsel %vm64_vm1, %v4905_v30, %v80_v33  ;;  %v38_v39 = vpop.trf.xlu0 }
  0x83   :  { %v4925_v40 = vadd.f32 %v88_v38, %v56_v31  ;;  %v61_v41 = vand.u32 2147483647, %v38_v39  ;;  %vm69_vm2 = vcmp.lt.f32.partialorder %v38_v39, 0.0  ;;  %v236_v38 = vld [vmem:[%s6893_s1 + $0x180] sm:$0xff]  ;;  %v235_v39 = vld [vmem:[%s6893_s1 + $0x178] sm:$0xff] }
  0x84   :  { %v81_v42 = vsel %vm69_vm2, %v4889_v25, %v4894_v26 }
  0x85   :  { %6951 = vst [vmem:[#allocation2_spill] sm:$0xff] %v4925_v40  ;;  %321 = vrot.lane.b32.xlu0 %v4925_v40, %s4788_s28  ;;  %297 = vrot.lane.b32.xlu1 %v4925_v40, %s4789_s29  ;;  %vm65_vm3 = vcmp.lt.f32.partialorder %v61_v41, 0.5  ;;  %v118_v41 = vshra.s32 %v5078_v35, 5 }
  0x86   :  { %v89_v48 = vsel %vm65_vm3, %v4905_v30, %v81_v42  ;;  %v39_v49 = vpop.trf.xlu0  ;;  %v5091_v42 = vadd.s32 40, %v4815_v1 }
  0x87   :  { %v4949_v50 = vadd.f32 %v89_v48, %v57_v47  ;;  %v62_v51 = vand.u32 2147483647, %v39_v49  ;;  %vm70_vm4 = vcmp.lt.f32.partialorder %v39_v49, 0.0  ;;  %v233_v47 = vld [vmem:[%s6893_s1 + $0x168] sm:$0xff]  ;;  %vm5106_vm14 = vcmp.eq.s32.totalorder %v118_v41, %v4995_v4 }
  0x88   :  { %v82_v52 = vsel %vm70_vm4, %v4889_v25, %v4894_v26  ;;  %v6964_v49 = vmov 0  ;;  %vm5209_vm4 = vcmp.eq.s32.totalorder %v124_v12, %v4995_v4  ;;  %v7001_v41 = vmov 0 }
  0x89   :  { %6952 = vst [vmem:[#allocation3_spill] sm:$0xff] %v4949_v50  ;;  %309 = vrot.lane.b32.xlu1 %v4925_v40, %s4790_s9  ;;  %vm66_vm5 = vcmp.lt.f32.partialorder %v62_v51, 0.5  ;;  %v6965_v49 = vsel %vm5106_vm14, 4294967295, %v6964_v49  ;;  %v120_v51 = vshra.s32 %v5091_v42, 5 }
  0x8a   :  { %v90_v54 = vsel %vm66_vm5, %v4905_v30, %v82_v52  ;;  %v40_v55 = vpop.trf.xlu0  ;;  %6966 = vst [vmem:[#allocation9_spill] sm:$0xff] %v6965_v49  ;;  %v5112_v52 = vadd.s32 56, %v4815_v1 }
  0x8b   :  { %v4963_v56 = vadd.f32 %v90_v54, %v58_v53  ;;  %v63_v57 = vand.u32 2147483647, %v40_v55  ;;  %vm71_vm6 = vcmp.lt.f32.partialorder %v40_v55, 0.0  ;;  %v6967_v55 = vmov 0 }
  0x8c   :  { %v83_v58 = vsel %vm71_vm6, %v4889_v25, %v4894_v26  ;;  %v240_v25 = vld [vmem:[%s6893_s1 + $0x1a0] sm:$0xff]  ;;  %v6968_v55 = vsel %vm5116_vm15, 4294967295, %v6967_v55  ;;  %vm5143_vm0 = vcmp.eq.s32.totalorder %v120_v51, %v4995_v4 }
  0x8d   :  { %299 = vrot.lane.b32.xlu1 %v4949_v50, %s4789_s29  ;;  %6953 = vst [vmem:[#allocation4_spill] sm:$0xff] %v4963_v56  ;;  %vm67_vm7 = vcmp.lt.f32.partialorder %v63_v57, 0.5  ;;  %6969 = vst [vmem:[#allocation10_spill] sm:$0xff] %v6968_v55  ;;  %v121_v57 = vshra.s32 %v5095_v45, 5 }
  0x8e   :  { %v91_v61 = vsel %vm67_vm7, %v4905_v30, %v83_v58  ;;  %v5122_v58 = vadd.s32 64, %v4815_v1 }
  0x8f   :  { %v4980_v62 = vadd.f32 %v91_v61, %v59_v60  ;;  %v232_v60 = vld [vmem:[%s6893_s1 + $0x160] sm:$0xff]  ;;  %v6970_v61 = vmov 0  ;;  %vm5152_vm1 = vcmp.eq.s32.totalorder %v121_v57, %v4995_v4 }
  0x90   :  { %v6971_v61 = vsel %vm5143_vm0, 4294967295, %v6970_v61 }
  0x91   :  { %311 = vrot.lane.b32.xlu1 %v4949_v50, %s4790_s9  ;;  %6954 = vst [vmem:[#allocation5_spill] sm:$0xff] %v4980_v62  ;;  %6972 = vst [vmem:[#allocation11_spill] sm:$0xff] %v6971_v61 }
  0x95   :  { %323 = vrot.lane.b32.xlu1 %v4949_v50, %s4788_s28 }
  0x99   :  { %301 = vrot.lane.b32.xlu1 %v4963_v56, %s4789_s29 }
  0x9d   :  { %313 = vrot.lane.b32.xlu1 %v4963_v56, %s4790_s9 }
  0xa1   :  { %325 = vrot.lane.b32.xlu1 %v4963_v56, %s4788_s28 }
  0xa5   :  { %303 = vrot.lane.b32.xlu1 %v4980_v62, %s4789_s29 }
  0xa9   :  { %315 = vrot.lane.b32.xlu1 %v4980_v62, %s4790_s9 }
  0xad   :  { %327 = vrot.lane.b32.xlu1 %v4980_v62, %s4788_s28 }
  0xf7   :  { %v298_v2 = vpop.permute.xlu1 %297  ;;  %v322_v0 = vpop.permute.xlu0 %321 }
  0xf8   :  { %v334_v5 = vsel %vm6898_vm8, %v4925_v40, %v298_v2  ;;  %v122_v2 = vshra.s32 %v5112_v52, 5  ;;  %v290_v40 = vld [vmem:[%s6893_s1 + $0x330] sm:$0xff] }
  0xfa   :  { %vm5176_vm2 = vcmp.eq.s32.totalorder %v122_v2, %v4995_v4 }
  0xfb   :  { %v310_v6 = vpop.permute.xlu1 %309 }
  0xfc   :  { %v339_v8 = vsel %vm6897_vm9, %v334_v5, %v310_v6  ;;  %v6973_v5 = vmov 0  ;;  %v123_v6 = vshra.s32 %v5122_v58, 5 }
  0xfd   :  { %v5006_v9 = vsel %vm6896_vm10, %v339_v8, %v322_v0  ;;  %v6974_v5 = vsel %vm5152_vm1, 4294967295, %v6973_v5  ;;  %v5158_v0 = vadd.s32 80, %v4815_v1  ;;  %v231_v8 = vld [vmem:[%s6893_s1 + $0x158] sm:$0xff] }
  0xfe   :  { %3973 = vmatprep.mubr.msk.f32.mxu0 %vm5000_vm11, %v5006_v9  ;;  %4029 = vmatprep.mubr.msk.f32.mxu1 %vm5000_vm11, %v5006_v9  ;;  %6975 = vst [vmem:[#allocation12_spill] sm:$0xff] %v6974_v5  ;;  %vm5185_vm3 = vcmp.eq.s32.totalorder %v123_v6, %v4995_v4 }
  0xff   :  { %v300_v11 = vpop.permute.xlu1 %299 }
 0x100   :  { %v335_v14 = vsel %vm6898_vm8, %v4949_v50, %v300_v11  ;;  %v6976_v11 = vmov 0 }
 0x101   :  { %v6977_v11 = vsel %vm5176_vm2, 4294967295, %v6976_v11 }
 0x102   :  { %6978 = vst [vmem:[#allocation13_spill] sm:$0xff] %v6977_v11  ;;  %v274_v11 = vld [vmem:[%s6893_s1 + $0x2b0] sm:$0xff] }
 0x103   :  { %v312_v13 = vpop.permute.xlu1 %311 }
 0x104   :  { %v340_v16 = vsel %vm6897_vm9, %v335_v14, %v312_v13  ;;  %v5182_v13 = vadd.s32 88, %v4815_v1  ;;  %v6979_v14 = vmov 0 }
 0x105   :  { %v6980_v14 = vsel %vm5185_vm3, 4294967295, %v6979_v14 }
 0x106   :  { %6981 = vst [vmem:[#allocation14_spill] sm:$0xff] %v6980_v14 }
 0x107   :  { %v324_v17 = vpop.permute.xlu1 %323 }
 0x108   :  { %v5027_v18 = vsel %vm6896_vm10, %v340_v16, %v324_v17  ;;  %v125_v16 = vshra.s32 %v5158_v0, 5  ;;  %v5191_v17 = vadd.s32 96, %v4815_v1 }
 0x109   :  { %3974 = vmatmul.mubr.msk.f32.vlgmr.msra.gmra.mxu0 %vm5021_vm12, %v5027_v18  ;;  %4030 = vmatmul.mubr.msk.f32.vlgmr.msra.gmra.mxu1 %vm5021_vm12, %v5027_v18 }
 0x10a   :  { %4054 = vmatpush3.msra.mxu0 %v244_v59  ;;  %vm5218_vm5 = vcmp.eq.s32.totalorder %v125_v16, %v4995_v4 }
 0x10b   :  { %v302_v22 = vpop.permute.xlu1 %301  ;;  %4055 = vmatprep.subr.mxu0 %v243_v19  ;;  %v6986_v24 = vsel %vm5218_vm5, 4294967295, %v6985_v24 }
 0x10c   :  { %4056 = vmatpush3.msra.mxu0 %v243_v19  ;;  %v336_v28 = vsel %vm6898_vm8, %v4963_v56, %v302_v22  ;;  %v230_v19 = vld [vmem:[%s6893_s1 + $0x150] sm:$0xff]  ;;  %v126_v22 = vshra.s32 %v5182_v13, 5  ;;  %6987 = vst [vmem:[#allocation16_spill] sm:$0xff] %v6986_v24  ;;  %v268_v56 = vld [vmem:[%s6893_s1 + $0x280] sm:$0xff] }
 0x10d   :  { %4057 = vmatprep.subr.mxu0 %v242_v21 }
 0x10e   :  { %4058 = vmatpush3.msra.mxu0 %v242_v21  ;;  %v6982_v21 = vmov 0  ;;  %vm5242_vm6 = vcmp.eq.s32.totalorder %v126_v22, %v4995_v4 }
 0x10f   :  { %v314_v26 = vpop.permute.xlu1 %313  ;;  %4059 = vmatprep.subr.mxu0 %v241_v23  ;;  %v6983_v21 = vsel %vm5209_vm4, 4294967295, %v6982_v21 }
 0x110   :  { %4060 = vmatpush3.msra.mxu0 %v241_v23  ;;  %v341_v30 = vsel %vm6897_vm9, %v336_v28, %v314_v26  ;;  %6984 = vst [vmem:[#allocation15_spill] sm:$0xff] %v6983_v21  ;;  %v5215_v23 = vadd.s32 104, %v4815_v1  ;;  %v5224_v26 = vadd.s32 112, %v4815_v1  ;;  %v6988_v28 = vmov 0 }
 0x111   :  { %4061 = vmatprep.subr.mxu0 %v240_v25  ;;  %v6989_v28 = vsel %vm5242_vm6, 4294967295, %v6988_v28 }
 0x112   :  { %4062 = vmatpush3.msra.mxu0 %v240_v25  ;;  %v127_v25 = vshra.s32 %v5191_v17, 5  ;;  %6990 = vst [vmem:[#allocation17_spill] sm:$0xff] %v6989_v28 }
 0x113   :  { %v326_v31 = vpop.permute.xlu1 %325  ;;  %4063 = vmatprep.subr.mxu0 %v239_v27 }
 0x114   :  { %v5066_v33 = vsel %vm6896_vm10, %v341_v30, %v326_v31  ;;  %4064 = vmatpush3.msra.mxu0 %v239_v27  ;;  %v229_v27 = vld [vmem:[%s6893_s1 + $0x148] sm:$0xff]  ;;  %v128_v30 = vshra.s32 %v5215_v23, 5  ;;  %v5248_v31 = vadd.s32 120, %v4815_v1  ;;  %vm5251_vm7 = vcmp.eq.s32.totalorder %v127_v25, %v4995_v4 }
 0x115   :  { %3976 = vmatprep.mubr.msk.f32.mxu0 %vm5057_vm13, %v5066_v33  ;;  %4032 = vmatprep.mubr.msk.f32.mxu1 %vm5057_vm13, %v5066_v33 }
 0x116   :  { %4065 = vmatprep.subr.mxu0 %v238_v32  ;;  %6991 = vst [vmem:[#allocation18_spill] sm:$0xff] %v5248_v31 }
 0x117   :  { %v304_v36 = vpop.permute.xlu1 %303  ;;  %4066 = vmatpush3.msra.mxu0 %v238_v32  ;;  %v6992_v32 = vmov 0 }
 0x118   :  { %4067 = vmatprep.subr.mxu0 %v237_v34  ;;  %v337_v48 = vsel %vm6898_vm8, %v4980_v62, %v304_v36  ;;  %v6993_v32 = vsel %vm5251_vm7, 4294967295, %v6992_v32  ;;  %v6995_v36 = vmov 0 }
 0x119   :  { %4068 = vmatpush3.msra.mxu0 %v237_v34  ;;  %6994 = vst [vmem:[#allocation19_spill] sm:$0xff] %v6993_v32  ;;  %v129_v34 = vshra.s32 %v5224_v26, 5  ;;  %v275_v32 = vld [vmem:[%s6893_s1 + $0x2b8] sm:$0xff] }
 0x11a   :  { %4069 = vmatprep.subr.mxu0 %v236_v38 }
 0x11b   :  { %v316_v43 = vpop.permute.xlu1 %315  ;;  %4070 = vmatpush3.msra.mxu0 %v236_v38  ;;  %v130_v38 = vshra.s32 %v5248_v31, 5  ;;  %v289_v31 = vld [vmem:[%s6893_s1 + $0x328] sm:$0xff] }
 0x11c   :  { %4071 = vmatprep.subr.mxu0 %v235_v39  ;;  %v342_v53 = vsel %vm6897_vm9, %v337_v48, %v316_v43  ;;  %vm5275_vm9 = vcmp.eq.s32.totalorder %v129_v34, %v4995_v4  ;;  %v245_v43 = vld [vmem:[%s6893_s1 + $0x1c8] sm:$0xff] }
 0x11d   :  { %4072 = vmatpush3.msra.mxu0 %v235_v39  ;;  %v6998_v39 = vmov 0  ;;  %vm5292_vm8 = vcmp.eq.s32.totalorder %v130_v38, %v4995_v4 }
 0x11e   :  { %4073 = vmatprep.subr.mxu0 %v234_v46  ;;  %v6999_v39 = vsel %vm5275_vm9, 4294967295, %v6998_v39  ;;  %v7002_v41 = vsel %vm5292_vm8, 4294967295, %v7001_v41 }
 0x11f   :  { %v328_v54 = vpop.permute.xlu1 %327  ;;  %4074 = vmatpush3.msra.mxu0 %v234_v46  ;;  %7000 = vst [vmem:[#allocation21_spill] sm:$0xff] %v6999_v39  ;;  %7003 = vst [vmem:[#allocation22_spill] sm:$0xff] %v7002_v41  ;;  %v276_v41 = vld [vmem:[%s6893_s1 + $0x2c0] sm:$0xff] }
 0x120   :  { %v5125_v59 = vsel %vm6896_vm10, %v342_v53, %v328_v54  ;;  %4075 = vmatprep.subr.mxu0 %v233_v47  ;;  %vm5269_vm10 = vcmp.eq.s32.totalorder %v128_v30, %v4995_v4 }
 0x121   :  { %3977 = vmatmul.mubr.msk.f32.gmra.mxu0 %vm5106_vm14, %v5125_v59  ;;  %4033 = vmatmul.mubr.msk.f32.gmra.mxu1 %vm5106_vm14, %v5125_v59  ;;  %v6996_v36 = vsel %vm5269_vm10, 4294967295, %v6995_v36 }
 0x122   :  { %3979 = vmatprep.mubr.msk.f32.mxu0 %vm5116_vm15, %v5006_v9  ;;  %4035 = vmatprep.mubr.msk.f32.mxu1 %vm5116_vm15, %v5006_v9  ;;  %6997 = vst [vmem:[#allocation20_spill] sm:$0xff] %v6996_v36 }
 0x123   :  { %4076 = vmatpush3.msra.mxu0 %v233_v47 }
 0x124   :  { %4077 = vmatprep.subr.mxu0 %v232_v60 }
 0x125   :  { %3980 = vmatmul.mubr.msk.f32.gmra.mxu0 %vm5143_vm0, %v5027_v18  ;;  %4036 = vmatmul.mubr.msk.f32.gmra.mxu1 %vm5143_vm0, %v5027_v18 }
 0x126   :  { %3982 = vmatprep.mubr.msk.f32.mxu0 %vm5152_vm1, %v5066_v33  ;;  %4038 = vmatprep.mubr.msk.f32.mxu1 %vm5152_vm1, %v5066_v33 }
 0x127   :  { %4078 = vmatpush3.msra.mxu0 %v232_v60 }
 0x128   :  { %4079 = vmatprep.subr.mxu0 %v231_v8 }
 0x129   :  { %3983 = vmatmul.mubr.msk.f32.gmra.mxu0 %vm5176_vm2, %v5125_v59  ;;  %4039 = vmatmul.mubr.msk.f32.gmra.mxu1 %vm5176_vm2, %v5125_v59 }
 0x12a   :  { %3985 = vmatprep.mubr.msk.f32.mxu0 %vm5185_vm3, %v5006_v9  ;;  %4041 = vmatprep.mubr.msk.f32.mxu1 %vm5185_vm3, %v5006_v9 }
 0x12b   :  { %4080 = vmatpush3.msra.mxu0 %v231_v8 }
 0x12c   :  { %4081 = vmatprep.subr.mxu0 %v230_v19 }
 0x12d   :  { %3986 = vmatmul.mubr.msk.f32.gmra.mxu0 %vm5209_vm4, %v5027_v18  ;;  %4042 = vmatmul.mubr.msk.f32.gmra.mxu1 %vm5209_vm4, %v5027_v18 }
 0x12e   :  { %3988 = vmatprep.mubr.msk.f32.mxu0 %vm5218_vm5, %v5066_v33  ;;  %4044 = vmatprep.mubr.msk.f32.mxu1 %vm5218_vm5, %v5066_v33 }
 0x12f   :  { %4082 = vmatpush3.msra.mxu0 %v230_v19 }
 0x130   :  { %4083 = vmatprep.subr.mxu0 %v229_v27 }
 0x131   :  { %3989 = vmatmul.mubr.msk.f32.gmra.mxu0 %vm5242_vm6, %v5125_v59  ;;  %4045 = vmatmul.mubr.msk.f32.gmra.mxu1 %vm5242_vm6, %v5125_v59 }
 0x132   :  { %3991 = vmatprep.mubr.msk.f32.mxu0 %vm5251_vm7, %v5006_v9  ;;  %4047 = vmatprep.mubr.msk.f32.mxu1 %vm5251_vm7, %v5006_v9 }
 0x133   :  { %4084 = vmatpush3.msra.mxu0 %v229_v27 }
 0x135   :  { %3992 = vmatmul.mubr.msk.f32.gmra.mxu0 %vm5269_vm10, %v5027_v18  ;;  %4048 = vmatmul.mubr.msk.f32.gmra.mxu1 %vm5269_vm10, %v5027_v18 }
 0x136   :  { %3994 = vmatprep.mubr.msk.f32.mxu0 %vm5275_vm9, %v5066_v33  ;;  %4050 = vmatprep.mubr.msk.f32.mxu1 %vm5275_vm9, %v5066_v33 }
 0x139   :  { %3995 = vmatmul.mubr.msk.f32.gmra.mxu0 %vm5292_vm8, %v5125_v59  ;;  %4051 = vmatmul.mubr.msk.f32.gmra.mxu1 %vm5292_vm8, %v5125_v59 }
 0x13a   :  { %4085 = vmatprep.mubr.msk.f32.mxu0 %vm5000_vm11, %v5006_v9 }
 0x13d   :  { %4086 = vmatmul.mubr.msk.f32.vlgmr.msra.gmra.mxu0 %vm5021_vm12, %v5027_v18 }
 0x13e   :  { %4088 = vmatprep.mubr.msk.f32.mxu0 %vm5057_vm13, %v5066_v33 }
 0x141   :  { %4089 = vmatmul.mubr.msk.f32.gmra.mxu0 %vm5106_vm14, %v5125_v59 }
 0x142   :  { %4091 = vmatprep.mubr.msk.f32.mxu0 %vm5116_vm15, %v5006_v9 }
 0x145   :  { %4092 = vmatmul.mubr.msk.f32.gmra.mxu0 %vm5143_vm0, %v5027_v18 }
 0x146   :  { %4094 = vmatprep.mubr.msk.f32.mxu0 %vm5152_vm1, %v5066_v33 }
 0x149   :  { %4095 = vmatmul.mubr.msk.f32.gmra.mxu0 %vm5176_vm2, %v5125_v59 }
 0x14a   :  { %4097 = vmatprep.mubr.msk.f32.mxu0 %vm5185_vm3, %v5006_v9 }
 0x14d   :  { %4098 = vmatmul.mubr.msk.f32.gmra.mxu0 %vm5209_vm4, %v5027_v18 }
 0x14e   :  { %4100 = vmatprep.mubr.msk.f32.mxu0 %vm5218_vm5, %v5066_v33 }
 0x151   :  { %4101 = vmatmul.mubr.msk.f32.gmra.mxu0 %vm5242_vm6, %v5125_v59 }
 0x152   :  { %4103 = vmatprep.mubr.msk.f32.mxu0 %vm5251_vm7, %v5006_v9  ;;  %vm7004_vm7 = vcmask 261120  }
 0x153   :  { %vm7039_vm6 = vmmov %vm7004_vm7 }
 0x155   :  { %4104 = vmatmul.mubr.msk.f32.gmra.mxu0 %vm5269_vm10, %v5027_v18  ;;  %vm7007_vm10 = vmmov %vm7004_vm7 }
 0x156   :  { %4106 = vmatprep.mubr.msk.f32.mxu0 %vm5275_vm9, %v5066_v33  ;;  %vm7006_vm9 = vmmov %vm7004_vm7 }
 0x159   :  { %4107 = vmatmul.mubr.msk.f32.gmra.mxu0 %vm5292_vm8, %v5125_v59  ;;  %vm7005_vm8 = vmmov %vm7004_vm7 }
 0x1c9   :  { %v5350_v4 = vpop.f32.mrf.mxu0  ;;  %v5356_v46 = vpop.f32.mrf.mxu1 }
 0x1cb   :  { %v430_v44 = vpop.f32.mrf.mxu0  ;;  %v5358_v18 = vpop.f32.mrf.mxu1 }
 0x1cc   :  { %v431_v9 = vadd.f32 %v430_v44, %v245_v43 }
 0x1ce   :  { %4141 = vmatprep.mubr.msk.f32.mxu1 %vm7004_vm7, %v431_v9 }
 0x1e1   :  { %v5360_v47 = vpop.f32.mrf.mxu0  ;;  %v5362_v33 = vpop.f32.mrf.mxu1 }
 0x1e3   :  { %v5364_v48 = vpop.f32.mrf.mxu0  ;;  %v5366_v51 = vpop.f32.mrf.mxu1 }
 0x1e5   :  { %v5368_v53 = vpop.f32.mrf.mxu0  ;;  %v5370_v54 = vpop.f32.mrf.mxu1 }
 0x1e7   :  { %v5372_v57 = vpop.f32.mrf.mxu0  ;;  %v5374_v59 = vpop.f32.mrf.mxu1 }
 0x1e9   :  { %v5376_v60 = vpop.f32.mrf.mxu0  ;;  %v5378_v2 = vpop.f32.mrf.mxu1 }
 0x1eb   :  { %v5380_v6 = vpop.f32.mrf.mxu0  ;;  %v5382_v8 = vpop.f32.mrf.mxu1 }
 0x1ed   :  { %v5384_v12 = vpop.f32.mrf.mxu0  ;;  %v4043_v16 = vpop.f32.mrf.mxu1 }
 0x1ef   :  { %v5386_v19 = vpop.f32.mrf.mxu0  ;;  %v615_v22 = vpop.f32.mrf.mxu1 }
 0x1f1   :  { %v5388_v25 = vpop.f32.mrf.mxu0  ;;  %v4046_v27 = vpop.f32.mrf.mxu1 }
 0x1f3   :  { %v5390_v30 = vpop.f32.mrf.mxu0  ;;  %v625_v34 = vpop.f32.mrf.mxu1 }
 0x1f5   :  { %v5392_v38 = vpop.f32.mrf.mxu0  ;;  %v4049_v43 = vpop.f32.mrf.mxu1 }
 0x1f6   :  { %v641_v55 = vadd.f32 %v4049_v43, %v274_v11 }
 0x1f7   :  { %v5394_v44 = vpop.f32.mrf.mxu0  ;;  %v635_v9 = vpop.f32.mrf.mxu1 }
 0x1f9   :  { %v5399_v39 = vpop.f32.mrf.mxu0  ;;  %v4052_v36 = vpop.f32.mrf.mxu1 }
 0x1fa   :  { %v651_v28 = vadd.f32 %v4052_v36, %v276_v41  ;;  %v273_v36 = vld [vmem:[%s6893_s1 + $0x2a8] sm:$0xff] }
 0x1fb   :  { %v5404_v24 = vpop.f32.mrf.mxu0  ;;  %v645_v21 = vpop.f32.mrf.mxu1  ;;  %v636_v41 = vadd.f32 %v635_v9, %v273_v36 }
 0x1fc   :  { %v646_v14 = vadd.f32 %v645_v21, %v275_v32  ;;  %4109 = vmatprep.subr.msk.mxu1 %vm7004_vm7, %v651_v28 }
 0x1fd   :  { %v5410_v5 = vpop.f32.mrf.mxu0  ;;  %4110 = vmatpush3.xpose.msk.msra.mxu1 %vm7005_vm8, %v651_v28  ;;  %v272_v28 = vld [vmem:[%s6893_s1 + $0x2a0] sm:$0xff]  ;;  %vm7008_vm8 = vmmov %vm7004_vm7 }
 0x1fe   :  { %4111 = vmatprep.subr.msk.mxu1 %vm7006_vm9, %v646_v14  ;;  %vm7009_vm9 = vmmov %vm7004_vm7  ;;  %v631_v43 = vadd.f32 %v4046_v27, %v272_v28 }
 0x1ff   :  { %v5414_v61 = vpop.f32.mrf.mxu0 }
 0x201   :  { %v5419_v21 = vpop.f32.mrf.mxu0  ;;  %4112 = vmatpush3.xpose.msk.msra.mxu1 %vm7004_vm7, %v646_v14  ;;  %v271_v14 = vld [vmem:[%s6893_s1 + $0x298] sm:$0xff] }
 0x202   :  { %4113 = vmatprep.subr.msk.mxu1 %vm7007_vm10, %v641_v55  ;;  %vm7010_vm10 = vmmov %vm7004_vm7  ;;  %v626_v36 = vadd.f32 %v625_v34, %v271_v14 }
 0x203   :  { %v5423_v32 = vpop.f32.mrf.mxu0 }
 0x205   :  { %v5428_v49 = vpop.f32.mrf.mxu0  ;;  %4114 = vmatpush3.xpose.msk.msra.mxu1 %vm7008_vm8, %v641_v55  ;;  %v270_v55 = vld [vmem:[%s6893_s1 + $0x290] sm:$0xff]  ;;  %vm7011_vm8 = vmmov %vm7004_vm7 }
 0x206   :  { %4115 = vmatprep.subr.msk.mxu1 %vm7009_vm9, %v636_v41  ;;  %vm7012_vm9 = vmmov %vm7004_vm7  ;;  %v621_v28 = vadd.f32 %v4043_v16, %v270_v55  ;;  %v292_v55 = vld [vmem:[%s6893_s1 + $0x340] sm:$0xff] }
 0x207   :  { %v5432_v11 = vpop.f32.mrf.mxu0 }
 0x209   :  { %v5437_v29 = vpop.f32.mrf.mxu0  ;;  %4116 = vmatpush3.xpose.msk.msra.mxu1 %vm7010_vm10, %v636_v41  ;;  %v269_v41 = vld [vmem:[%s6893_s1 + $0x288] sm:$0xff]  ;;  %vm7013_vm10 = vmmov %vm7004_vm7 }
 0x20a   :  { %4117 = vmatprep.subr.msk.mxu1 %vm7004_vm7, %v631_v43  ;;  %v616_v14 = vadd.f32 %v615_v22, %v269_v41  ;;  %v267_v22 = vld [vmem:[%s6893_s1 + $0x278] sm:$0xff] }
 0x20b   :  { %v5441_v9 = vpop.f32.mrf.mxu0 }
 0x20d   :  { %v4099_v15 = vpop.f32.mrf.mxu0  ;;  %4118 = vmatpush3.xpose.msk.msra.mxu1 %vm7011_vm8, %v631_v43  ;;  %vm7014_vm8 = vmmov %vm7004_vm7 }
 0x20e   :  { %4119 = vmatprep.subr.msk.mxu1 %vm7012_vm9, %v626_v36  ;;  %vm7015_vm9 = vmmov %vm7004_vm7 }
 0x20f   :  { %v760_v27 = vpop.f32.mrf.mxu0 }
 0x211   :  { %v4102_v7 = vpop.f32.mrf.mxu0  ;;  %4120 = vmatpush3.xpose.msk.msra.mxu1 %vm7013_vm10, %v626_v36  ;;  %v611_v36 = vadd.f32 %v5378_v2, %v268_v56  ;;  %vm7016_vm10 = vmmov %vm7004_vm7  ;;  %v606_v56 = vadd.f32 %v5382_v8, %v267_v22 }
 0x212   :  { %4121 = vmatprep.subr.msk.mxu1 %vm7004_vm7, %v621_v28 }
 0x213   :  { %v770_v34 = vpop.f32.mrf.mxu0 }
 0x215   :  { %v4105_v43 = vpop.f32.mrf.mxu0  ;;  %4122 = vmatpush3.xpose.msk.msra.mxu1 %vm7014_vm8, %v621_v28  ;;  %v291_v28 = vld [vmem:[%s6893_s1 + $0x338] sm:$0xff]  ;;  %vm7017_vm8 = vmmov %vm7004_vm7 }
 0x216   :  { %4123 = vmatprep.subr.msk.mxu1 %vm7015_vm9, %v616_v14  ;;  %vm7018_vm9 = vmmov %vm7004_vm7 }
 0x217   :  { %v780_v16 = vpop.f32.mrf.mxu0 }
 0x218   :  { %v781_v22 = vadd.f32 %v780_v16, %v289_v31  ;;  %v286_v31 = vld [vmem:[%s6893_s1 + $0x310] sm:$0xff]  ;;  %v264_v16 = vld [vmem:[%s6893_s1 + $0x260] sm:$0xff] }
 0x219   :  { %v4108_v41 = vpop.f32.mrf.mxu0  ;;  %4124 = vmatpush3.xpose.msk.msra.mxu1 %vm7016_vm10, %v616_v14  ;;  %v266_v14 = vld [vmem:[%s6893_s1 + $0x270] sm:$0xff]  ;;  %vm7019_vm10 = vmmov %vm7004_vm7 }
 0x21a   :  { %v796_v62 = vadd.f32 %v4108_v41, %v292_v55  ;;  %4125 = vmatprep.subr.msk.mxu1 %vm7004_vm7, %v611_v36  ;;  %v786_v55 = vadd.f32 %v4105_v43, %v290_v40  ;;  %v601_v8 = vadd.f32 %v5370_v54, %v266_v14  ;;  %v265_v41 = vld [vmem:[%s6893_s1 + $0x268] sm:$0xff]  ;;  %v287_v40 = vld [vmem:[%s6893_s1 + $0x318] sm:$0xff] }
 0x21b   :  { %v790_v50 = vpop.f32.mrf.mxu0  ;;  %v596_v54 = vadd.f32 %v5374_v59, %v265_v41  ;;  %v771_v43 = vadd.f32 %v770_v34, %v287_v40  ;;  %v284_v59 = vld [vmem:[%s6893_s1 + $0x300] sm:$0xff]  ;;  %v591_v34 = vadd.f32 %v5362_v33, %v264_v16  ;;  %v282_v33 = vld [vmem:[%s6893_s1 + $0x2f0] sm:$0xff]  ;;  %v249_v16 = vld [vmem:[%s6893_s1 + $0x1e8] sm:$0xff] }
 0x21c   :  { %v791_v2 = vadd.f32 %v790_v50, %v291_v28  ;;  %4165 = vmatprep.subr.mxu0 %v796_v62  ;;  %v288_v50 = vld [vmem:[%s6893_s1 + $0x320] sm:$0xff] }
 0x21d   :  { %4126 = vmatpush3.xpose.msk.msra.mxu1 %vm7017_vm8, %v611_v36  ;;  %4166 = vmatpush3.msra.mxu0 %v796_v62  ;;  %v776_v62 = vadd.f32 %v4102_v7, %v288_v50  ;;  %v285_v7 = vld [vmem:[%s6893_s1 + $0x308] sm:$0xff]  ;;  %vm7020_vm8 = vmmov %vm7004_vm7  ;;  %v766_v36 = vadd.f32 %v4099_v15, %v286_v31  ;;  %v283_v15 = vld [vmem:[%s6893_s1 + $0x2f8] sm:$0xff]  ;;  %v746_v50 = vadd.f32 %v5428_v49, %v282_v33 }
 0x21e   :  { %4127 = vmatprep.subr.msk.mxu1 %vm7018_vm9, %v606_v56  ;;  %4167 = vmatprep.subr.mxu0 %v791_v2  ;;  %vm7021_vm9 = vmmov %vm7004_vm7  ;;  %v761_v28 = vadd.f32 %v760_v27, %v285_v7  ;;  %v751_v14 = vadd.f32 %v5441_v9, %v283_v15  ;;  %v279_v49 = vld [vmem:[%s6893_s1 + $0x2d8] sm:$0xff]  ;;  %v246_v31 = vld [vmem:[%s6893_s1 + $0x1d0] sm:$0xff]  ;;  %v451_v7 = vadd.f32 %v5372_v57, %v249_v16 }
 0x21f   :  { %4168 = vmatpush3.msra.mxu0 %v791_v2  ;;  %v756_v2 = vadd.f32 %v5437_v29, %v284_v59  ;;  %v281_v29 = vld [vmem:[%s6893_s1 + $0x2e8] sm:$0xff]  ;;  %v731_v40 = vadd.f32 %v5423_v32, %v279_v49 }
 0x220   :  { %4169 = vmatprep.subr.mxu0 %v786_v55  ;;  %v253_v57 = vld [vmem:[%s6893_s1 + $0x208] sm:$0xff] }
 0x221   :  { %4128 = vmatpush3.xpose.msk.msra.mxu1 %vm7019_vm10, %v606_v56  ;;  %4170 = vmatpush3.msra.mxu0 %v786_v55  ;;  %v263_v56 = vld [vmem:[%s6893_s1 + $0x258] sm:$0xff]  ;;  %vm7022_vm10 = vmmov %vm7004_vm7  ;;  %v262_v55 = vld [vmem:[%s6893_s1 + $0x250] sm:$0xff] }
 0x222   :  { %4129 = vmatprep.subr.msk.mxu1 %vm7004_vm7, %v601_v8  ;;  %4171 = vmatprep.subr.mxu0 %v781_v22  ;;  %v586_v27 = vadd.f32 %v5366_v51, %v263_v56  ;;  %v280_v51 = vld [vmem:[%s6893_s1 + $0x2e0] sm:$0xff]  ;;  %v581_v9 = vadd.f32 %v5356_v46, %v262_v55  ;;  %v278_v46 = vld [vmem:[%s6893_s1 + $0x2d0] sm:$0xff]  ;;  %v149_v55 = vshra.s32 %v5015_v10, 4 }
 0x223   :  { %4172 = vmatpush3.msra.mxu0 %v781_v22  ;;  %v261_v22 = vld [vmem:[%s6893_s1 + $0x248] sm:$0xff]  ;;  %v736_v41 = vadd.f32 %v5419_v21, %v280_v51  ;;  %v726_v21 = vadd.f32 %v5410_v5, %v278_v46  ;;  %v436_v5 = vadd.f32 %v5350_v4, %v246_v31  ;;  %v250_v4 = vld [vmem:[%s6893_s1 + $0x1f0] sm:$0xff] }
 0x224   :  { %4173 = vmatprep.subr.mxu0 %v776_v62 }
 0x225   :  { %4130 = vmatpush3.xpose.msk.msra.mxu1 %vm7020_vm8, %v601_v8  ;;  %4174 = vmatpush3.msra.mxu0 %v776_v62  ;;  %vm7023_vm8 = vmmov %vm7004_vm7  ;;  %v741_v8 = vadd.f32 %v5432_v11, %v281_v29  ;;  %v576_v11 = vadd.f32 %v5358_v18, %v261_v22  ;;  %v277_v62 = vld [vmem:[%s6893_s1 + $0x2c8] sm:$0xff]  ;;  %v247_v18 = vld [vmem:[%s6893_s1 + $0x1d8] sm:$0xff]  ;;  %v5637_v29 = vshra.s32 %v4991_v63, 4  ;;  %v151_v63 = vshra.s32 %v5078_v35, 4 }
 0x226   :  { %4131 = vmatprep.subr.msk.mxu1 %vm7021_vm9, %v596_v54  ;;  %4175 = vmatprep.subr.mxu0 %v771_v43  ;;  %vm7024_vm9 = vmmov %vm7004_vm7  ;;  %v721_v32 = vadd.f32 %v5414_v61, %v277_v62  ;;  %v153_v35 = vshra.s32 %v5091_v42, 4  ;;  %v155_v42 = vshra.s32 %v5112_v52, 4  ;;  %v157_v52 = vshra.s32 %v5149_v3, 4 }
 0x227   :  { %4176 = vmatpush3.msra.mxu0 %v771_v43  ;;  %v441_v43 = vadd.f32 %v5364_v48, %v247_v18  ;;  %v251_v48 = vld [vmem:[%s6893_s1 + $0x1f8] sm:$0xff]  ;;  %v159_v3 = vshra.s32 %v5182_v13, 4  ;;  %v161_v13 = vshra.s32 %v5215_v23, 4  ;;  %v7040_v23 = vld [vmem:[#allocation18_spill] sm:$0xff] }
 0x228   :  { %4177 = vmatprep.subr.mxu0 %v766_v36  ;;  %v461_v59 = vadd.f32 %v5380_v6, %v251_v48  ;;  %v255_v6 = vld [vmem:[%s6893_s1 + $0x218] sm:$0xff] }
 0x229   :  { %4132 = vmatpush3.xpose.msk.msra.mxu1 %vm7022_vm10, %v596_v54  ;;  %4178 = vmatpush3.msra.mxu0 %v766_v36  ;;  %vm7025_vm10 = vmmov %vm7004_vm7  ;;  %v248_v54 = vld [vmem:[%s6893_s1 + $0x1e0] sm:$0xff]  ;;  %v456_v36 = vadd.f32 %v5368_v53, %v250_v4  ;;  %v254_v53 = vld [vmem:[%s6893_s1 + $0x210] sm:$0xff]  ;;  %v481_v15 = vadd.f32 %v5390_v30, %v255_v6 }
 0x22a   :  { %4133 = vmatprep.subr.msk.mxu1 %vm7004_vm7, %v591_v34  ;;  %4179 = vmatprep.subr.mxu0 %v761_v28  ;;  %v446_v61 = vadd.f32 %v5360_v47, %v248_v54  ;;  %v252_v47 = vld [vmem:[%s6893_s1 + $0x200] sm:$0xff]  ;;  %v476_v56 = vadd.f32 %v5384_v12, %v254_v53  ;;  %v258_v12 = vld [vmem:[%s6893_s1 + $0x230] sm:$0xff]  ;;  %v259_v30 = vld [vmem:[%s6893_s1 + $0x238] sm:$0xff] }
 0x22b   :  { %4180 = vmatpush3.msra.mxu0 %v761_v28  ;;  %v471_v28 = vadd.f32 %v5386_v19, %v253_v57  ;;  %v257_v19 = vld [vmem:[%s6893_s1 + $0x228] sm:$0xff] }
 0x22c   :  { %4181 = vmatprep.subr.mxu0 %v756_v2  ;;  %v491_v33 = vadd.f32 %v5394_v44, %v257_v19 }
 0x22d   :  { %4134 = vmatpush3.xpose.msk.msra.mxu1 %vm7023_vm8, %v591_v34  ;;  %4182 = vmatpush3.msra.mxu0 %v756_v2  ;;  %vm7026_vm8 = vmmov %vm7004_vm7  ;;  %v466_v34 = vadd.f32 %v5376_v60, %v252_v47  ;;  %v256_v60 = vld [vmem:[%s6893_s1 + $0x220] sm:$0xff] }
 0x22e   :  { %4135 = vmatprep.subr.msk.mxu1 %vm7024_vm9, %v586_v27  ;;  %4183 = vmatprep.subr.mxu0 %v751_v14  ;;  %vm7027_vm9 = vmmov %vm7004_vm7  ;;  %v486_v2 = vadd.f32 %v5388_v25, %v256_v60  ;;  %v260_v25 = vld [vmem:[%s6893_s1 + $0x240] sm:$0xff] }
 0x22f   :  { %4184 = vmatpush3.msra.mxu0 %v751_v14  ;;  %v501_v14 = vadd.f32 %v5404_v24, %v259_v30  ;;  %v506_v44 = vadd.f32 %v5399_v39, %v260_v25  ;;  %v150_v24 = vshra.s32 %v5039_v20, 4 }
 0x230   :  { %4185 = vmatprep.subr.mxu0 %v746_v50 }
 0x231   :  { %4136 = vmatpush3.xpose.msk.msra.mxu1 %vm7025_vm10, %v586_v27  ;;  %4186 = vmatpush3.msra.mxu0 %v746_v50  ;;  %vm7028_vm10 = vmmov %vm7004_vm7  ;;  %v496_v27 = vadd.f32 %v5392_v38, %v258_v12  ;;  %v148_v38 = vshra.s32 %v4815_v1, 4  ;;  %v4791_v50 = vmov -1e+30   ;;  %v152_v1 = vshra.s32 %v5081_v37, 4 }
 0x232   :  { %4137 = vmatprep.subr.msk.mxu1 %vm7004_vm7, %v581_v9  ;;  %4187 = vmatprep.subr.mxu0 %v741_v8  ;;  %v154_v37 = vshra.s32 %v5095_v45, 4  ;;  %v156_v45 = vshra.s32 %v5122_v58, 4  ;;  %v158_v58 = vshra.s32 %v5158_v0, 4  ;;  %v160_v0 = vshra.s32 %v5191_v17, 4 }
 0x233   :  { %4188 = vmatpush3.msra.mxu0 %v741_v8  ;;  %v162_v17 = vshra.s32 %v5224_v26, 4  ;;  %v163_v26 = vshra.s32 %v7040_v23, 4 }
 0x234   :  { %4189 = vmatprep.subr.mxu0 %v736_v41 }
 0x235   :  { %4138 = vmatpush3.xpose.msk.msra.mxu1 %vm7026_vm8, %v581_v9  ;;  %4190 = vmatpush3.msra.mxu0 %v736_v41  ;;  %vm7029_vm8 = vmmov %vm7004_vm7 }
 0x236   :  { %4139 = vmatprep.subr.msk.mxu1 %vm7027_vm9, %v576_v11  ;;  %4191 = vmatprep.subr.mxu0 %v731_v40  ;;  %vm7030_vm9 = vmmov %vm7004_vm7 }
 0x237   :  { %4192 = vmatpush3.msra.mxu0 %v731_v40 }
 0x238   :  { %4193 = vmatprep.subr.mxu0 %v726_v21 }
 0x239   :  { %4140 = vmatpush3.xpose.msk.msra.mxu1 %vm7028_vm10, %v576_v11  ;;  %4194 = vmatpush3.msra.mxu0 %v726_v21  ;;  %vm7031_vm10 = vmmov %vm7004_vm7 }
 0x23a   :  { %4195 = vmatprep.subr.mxu0 %v721_v32 }
 0x23b   :  { %4196 = vmatpush3.msra.mxu0 %v721_v32 }
 0x23c   :  { %4142 = vmatmul.mubr.msk.f32.vlgmr.msra.gmra.mxu1 %vm7004_vm7, %v436_v5 }
 0x23d   :  { %4144 = vmatprep.mubr.msk.f32.mxu1 %vm7029_vm8, %v441_v43  ;;  %vm7032_vm8 = vmmov %vm7004_vm7 }
 0x240   :  { %4145 = vmatmul.mubr.msk.f32.gmra.mxu1 %vm7030_vm9, %v446_v61  ;;  %vm7033_vm9 = vmmov %vm7004_vm7 }
 0x241   :  { %4147 = vmatprep.mubr.msk.f32.mxu1 %vm7031_vm10, %v451_v7  ;;  %vm7034_vm10 = vmmov %vm7004_vm7 }
 0x244   :  { %4148 = vmatmul.mubr.msk.f32.gmra.mxu1 %vm7004_vm7, %v456_v36 }
 0x245   :  { %4150 = vmatprep.mubr.msk.f32.mxu1 %vm7032_vm8, %v461_v59  ;;  %vm7035_vm8 = vmmov %vm7004_vm7 }
 0x248   :  { %4151 = vmatmul.mubr.msk.f32.gmra.mxu1 %vm7033_vm9, %v466_v34  ;;  %vm7036_vm9 = vmmov %vm7004_vm7 }
 0x249   :  { %4153 = vmatprep.mubr.msk.f32.mxu1 %vm7034_vm10, %v471_v28  ;;  %vm7037_vm10 = vmmov %vm7004_vm7 }
 0x24c   :  { %4154 = vmatmul.mubr.msk.f32.gmra.mxu1 %vm7004_vm7, %v476_v56 }
 0x24d   :  { %4156 = vmatprep.mubr.msk.f32.mxu1 %vm7035_vm8, %v481_v15  ;;  %vm7038_vm8 = vmmov %vm7004_vm7 }
 0x250   :  { %4157 = vmatmul.mubr.msk.f32.gmra.mxu1 %vm7036_vm9, %v486_v2  ;;  %vm166_vm9 = vcmp.eq.s32.totalorder %v149_v55, %v5637_v29 }
 0x251   :  { %4159 = vmatprep.mubr.msk.f32.mxu1 %vm7037_vm10, %v491_v33  ;;  %vm165_vm10 = vcmp.eq.s32.totalorder %v148_v38, %v5637_v29  ;;  %v5644_v51 = vsel %vm166_vm9, 0.0, %v4791_v50  ;;  %vm170_vm9 = vcmp.eq.s32.totalorder %v153_v35, %v5637_v29 }
 0x252   :  { %v5647_v9 = vsel %vm165_vm10, 0.0, %v4791_v50  ;;  %vm171_vm10 = vcmp.eq.s32.totalorder %v154_v37, %v5637_v29  ;;  %v5688_v32 = vsel %vm170_vm9, 0.0, %v4791_v50  ;;  %vm175_vm9 = vcmp.eq.s32.totalorder %v158_v58, %v5637_v29 }
 0x253   :  { %v5691_v54 = vsel %vm171_vm10, 0.0, %v4791_v50  ;;  %v5727_v53 = vsel %vm175_vm9, 0.0, %v4791_v50  ;;  %vm176_vm10 = vcmp.eq.s32.totalorder %v159_v3, %v5637_v29  ;;  %vm180_vm9 = vcmp.eq.s32.totalorder %v163_v26, %v5637_v29 }
 0x254   :  { %4160 = vmatmul.mubr.msk.f32.gmra.mxu1 %vm7004_vm7, %v496_v27  ;;  %vm168_vm7 = vcmp.eq.s32.totalorder %v151_v63, %v5637_v29  ;;  %v5742_v60 = vsel %vm176_vm10, 0.0, %v4791_v50  ;;  %v5774_v38 = vsel %vm180_vm9, 0.0, %v4791_v50  ;;  %vm7042_vm10 = vcmask 261120  }
 0x255   :  { %4162 = vmatprep.mubr.msk.f32.mxu1 %vm7038_vm8, %v501_v14  ;;  %vm169_vm8 = vcmp.eq.s32.totalorder %v152_v1, %v5637_v29  ;;  %v5671_v11 = vsel %vm168_vm7, 0.0, %v4791_v50  ;;  %vm173_vm7 = vcmp.eq.s32.totalorder %v156_v45, %v5637_v29 }
 0x256   :  { %v5674_v62 = vsel %vm169_vm8, 0.0, %v4791_v50  ;;  %v5709_v48 = vsel %vm173_vm7, 0.0, %v4791_v50  ;;  %vm174_vm8 = vcmp.eq.s32.totalorder %v157_v52, %v5637_v29  ;;  %vm178_vm7 = vcmp.eq.s32.totalorder %v161_v13, %v5637_v29 }
 0x257   :  { %v5724_v57 = vsel %vm174_vm8, 0.0, %v4791_v50  ;;  %vm179_vm8 = vcmp.eq.s32.totalorder %v162_v17, %v5637_v29  ;;  %v5759_v30 = vsel %vm178_vm7, 0.0, %v4791_v50 }
 0x258   :  { %4163 = vmatmul.mubr.msk.f32.gmra.mxu1 %vm7039_vm6, %v506_v44  ;;  %vm167_vm6 = vcmp.eq.s32.totalorder %v150_v24, %v5637_v29  ;;  %v5762_v25 = vsel %vm179_vm8, 0.0, %v4791_v50 }
 0x259   :  { %v5660_v49 = vsel %vm167_vm6, 0.0, %v4791_v50  ;;  %vm172_vm6 = vcmp.eq.s32.totalorder %v155_v42, %v5637_v29 }
 0x25a   :  { %v5706_v4 = vsel %vm172_vm6, 0.0, %v4791_v50  ;;  %vm177_vm6 = vcmp.eq.s32.totalorder %v160_v0, %v5637_v29 }
 0x25b   :  { %v5745_v19 = vsel %vm177_vm6, 0.0, %v4791_v50  ;;  %vm7044_vm6 = vmmov %vm7042_vm10 }
 0x25c   :  { %vm7046_vm7 = vmmov %vm7044_vm6 }
 0x25d   :  { %vm7048_vm8 = vmmov %vm7044_vm6 }
 0x25e   :  { %vm7049_vm9 = vmmov %vm7044_vm6 }
 0x2fc   :  { %v4143_v39 = vpop.f32.mrf.mxu1 }
 0x2fd   :  { %v5650_v10 = vadd.f32 %v4143_v39, %v5644_v51 }
 0x2fe   :  { %v961_v8 = vpop.f32.mrf.mxu1 }
 0x2ff   :  { %v5656_v20 = vadd.f32 %v961_v8, %v5647_v9  ;;  %1042 = vmax.xlane.f32.xlu0 %v5650_v10 }
 0x300   :  { %v4146_v22 = vpop.f32.mrf.mxu1 }
 0x301   :  { %1040 = vmax.xlane.f32.xlu1 %v5656_v20  ;;  %v5682_v31 = vadd.f32 %v4146_v22, %v5671_v11 }
 0x302   :  { %v971_v41 = vpop.f32.mrf.mxu1 }
 0x303   :  { %v5668_v46 = vadd.f32 %v971_v41, %v5660_v49 }
 0x304   :  { %v4149_v40 = vpop.f32.mrf.mxu1 }
 0x305   :  { %1044 = vmax.xlane.f32.xlu1 %v5668_v46  ;;  %v5700_v16 = vadd.f32 %v4149_v40, %v5688_v32 }
 0x306   :  { %v981_v21 = vpop.f32.mrf.mxu1 }
 0x307   :  { %v5685_v18 = vadd.f32 %v981_v21, %v5674_v62 }
 0x308   :  { %v4152_v5 = vpop.f32.mrf.mxu1 }
 0x309   :  { %1048 = vmax.xlane.f32.xlu0 %v5685_v18  ;;  %1046 = vmax.xlane.f32.xlu1 %v5682_v31  ;;  %v5718_v47 = vadd.f32 %v4152_v5, %v5706_v4 }
 0x30a   :  { %v991_v43 = vpop.f32.mrf.mxu1 }
 0x30b   :  { %v5703_v61 = vadd.f32 %v991_v43, %v5691_v54 }
 0x30c   :  { %v4155_v7 = vpop.f32.mrf.mxu1 }
 0x30d   :  { %1052 = vmax.xlane.f32.xlu0 %v5703_v61  ;;  %1050 = vmax.xlane.f32.xlu1 %v5700_v16  ;;  %v5736_v6 = vadd.f32 %v4155_v7, %v5724_v57 }
 0x30e   :  { %v1001_v36 = vpop.f32.mrf.mxu1 }
 0x30f   :  { %v5721_v59 = vadd.f32 %v1001_v36, %v5709_v48 }
 0x310   :  { %v4158_v34 = vpop.f32.mrf.mxu1 }
 0x311   :  { %1056 = vmax.xlane.f32.xlu0 %v5721_v59  ;;  %1054 = vmax.xlane.f32.xlu1 %v5718_v47  ;;  %v5753_v12 = vadd.f32 %v4158_v34, %v5742_v60 }
 0x312   :  { %v1011_v28 = vpop.f32.mrf.mxu1 }
 0x313   :  { %v5739_v56 = vadd.f32 %v1011_v28, %v5727_v53 }
 0x314   :  { %v4161_v15 = vpop.f32.mrf.mxu1 }
 0x315   :  { %1060 = vmax.xlane.f32.xlu0 %v5739_v56  ;;  %1058 = vmax.xlane.f32.xlu1 %v5736_v6  ;;  %v5768_v44 = vadd.f32 %v4161_v15, %v5759_v30 }
 0x316   :  { %v1021_v2 = vpop.f32.mrf.mxu1 }
 0x317   :  { %v5756_v33 = vadd.f32 %v1021_v2, %v5745_v19 }
 0x318   :  { %v4164_v27 = vpop.f32.mrf.mxu1 }
 0x319   :  { %1064 = vmax.xlane.f32.xlu0 %v5756_v33  ;;  %1062 = vmax.xlane.f32.xlu1 %v5753_v12  ;;  %v5779_v29 = vadd.f32 %v4164_v27, %v5774_v38 }
 0x31a   :  { %v1031_v14 = vpop.f32.mrf.mxu1 }
 0x31b   :  { %v5771_v55 = vadd.f32 %v1031_v14, %v5762_v25 }
 0x31d   :  { %1068 = vmax.xlane.f32.xlu0 %v5771_v55  ;;  %1066 = vmax.xlane.f32.xlu1 %v5768_v44 }
 0x321   :  { %1070 = vmax.xlane.f32.xlu1 %v5779_v29 }
 0x388   :  { %v1043_v24 = vpop.xlane.xlu0 %1042 }
 0x389   :  { %v1073_v39 = vsub.f32 %v5650_v10, %v1043_v24 }
 0x38a   :  { %v1041_v63 = vpop.xlane.xlu1 %1040 }
 0x38b   :  { %v1090_v1 = vmul.f32 1.442695, %v1073_v39  ;;  %v1072_v8 = vsub.f32 %v5656_v20, %v1041_v63 }
 0x38d   :  { %4622 = vpow2.f32 %v1090_v1  ;;  %v1088_v22 = vmul.f32 1.442695, %v1072_v8 }
 0x38e   :  { %v1045_v50 = vpop.xlane.xlu1 %1044 }
 0x38f   :  { %4624 = vpow2.f32 %v1088_v22  ;;  %v1074_v35 = vsub.f32 %v5668_v46, %v1045_v50 }
 0x391   :  { %v1092_v37 = vmul.f32 1.442695, %v1074_v35 }
 0x392   :  { %v1049_v41 = vpop.xlane.xlu0 %1048  ;;  %v1047_v40 = vpop.xlane.xlu1 %1046 }
 0x393   :  { %4626 = vpow2.f32 %v1092_v37  ;;  %v1076_v42 = vsub.f32 %v5685_v18, %v1049_v41  ;;  %v1075_v45 = vsub.f32 %v5682_v31, %v1047_v40 }
 0x395   :  { %v1096_v21 = vmul.f32 1.442695, %v1076_v42  ;;  %v1094_v10 = vmul.f32 1.442695, %v1075_v45 }
 0x396   :  { %v1053_v5 = vpop.xlane.xlu0 %1052  ;;  %v1051_v52 = vpop.xlane.xlu1 %1050 }
 0x397   :  { %4628 = vpow2.f32 %v1096_v21  ;;  %v1078_v20 = vsub.f32 %v5703_v61, %v1053_v5  ;;  %v1077_v58 = vsub.f32 %v5700_v16, %v1051_v52 }
 0x398   :  { %4630 = vpow2.f32 %v1094_v10 }
 0x399   :  { %v1100_v43 = vmul.f32 1.442695, %v1078_v20  ;;  %v1098_v46 = vmul.f32 1.442695, %v1077_v58 }
 0x39a   :  { %v5789_v7 = vpop.eup %4622  ;;  %v1057_v3 = vpop.xlane.xlu0 %1056 }
 0x39b   :  { %v1055_v0 = vpop.xlane.xlu1 %1054  ;;  %4632 = vpow2.f32 %v1100_v43  ;;  %v1080_v18 = vsub.f32 %v5721_v59, %v1057_v3  ;;  %1122 = vadd.xlane.f32.xlu1 %v5789_v7 }
 0x39c   :  { %v1079_v31 = vsub.f32 %v5718_v47, %v1055_v0  ;;  %v5794_v36 = vpop.eup %4624  ;;  %4634 = vpow2.f32 %v1098_v46 }
 0x39d   :  { %v1104_v61 = vmul.f32 1.442695, %v1080_v18  ;;  %1120 = vadd.xlane.f32.xlu0 %v5794_v36 }
 0x39e   :  { %v1102_v34 = vmul.f32 1.442695, %v1079_v31  ;;  %v1061_v16 = vpop.xlane.xlu0 %1060 }
 0x39f   :  { %v1059_v13 = vpop.xlane.xlu1 %1058  ;;  %4636 = vpow2.f32 %v1104_v61  ;;  %v1082_v17 = vsub.f32 %v5739_v56, %v1061_v16 }
 0x3a0   :  { %v1081_v28 = vsub.f32 %v5736_v6, %v1059_v13  ;;  %v5799_v15 = vpop.eup %4626  ;;  %4638 = vpow2.f32 %v1102_v34 }
 0x3a1   :  { %v1108_v47 = vmul.f32 1.442695, %v1082_v17  ;;  %1124 = vadd.xlane.f32.xlu0 %v5799_v15 }
 0x3a2   :  { %v1106_v59 = vmul.f32 1.442695, %v1081_v28  ;;  %v1065_v23 = vpop.xlane.xlu0 %1064 }
 0x3a3   :  { %v1063_v26 = vpop.xlane.xlu1 %1062  ;;  %4640 = vpow2.f32 %v1108_v47  ;;  %v1084_v2 = vsub.f32 %v5756_v33, %v1065_v23 }
 0x3a4   :  { %v1083_v27 = vsub.f32 %v5753_v12, %v1063_v26  ;;  %v5804_v14 = vpop.eup %4628  ;;  %4642 = vpow2.f32 %v1106_v59 }
 0x3a5   :  { %v5806_v56 = vpop.eup %4630  ;;  %v1112_v6 = vmul.f32 1.442695, %v1084_v2  ;;  %1128 = vadd.xlane.f32.xlu0 %v5804_v14 }
 0x3a6   :  { %v1110_v24 = vmul.f32 1.442695, %v1083_v27  ;;  %1126 = vadd.xlane.f32.xlu1 %v5806_v56  ;;  %v1069_v39 = vpop.xlane.xlu0 %1068 }
 0x3a7   :  { %v1067_v63 = vpop.xlane.xlu1 %1066  ;;  %4644 = vpow2.f32 %v1112_v6  ;;  %v1086_v1 = vsub.f32 %v5771_v55, %v1069_v39 }
 0x3a8   :  { %v1085_v33 = vsub.f32 %v5768_v44, %v1067_v63  ;;  %v5812_v8 = vpop.eup %4632  ;;  %4646 = vpow2.f32 %v1110_v24 }
 0x3a9   :  { %v5814_v12 = vpop.eup %4634  ;;  %v1116_v22 = vmul.f32 1.442695, %v1086_v1  ;;  %1132 = vadd.xlane.f32.xlu0 %v5812_v8 }
 0x3aa   :  { %v1114_v50 = vmul.f32 1.442695, %v1085_v33  ;;  %1130 = vadd.xlane.f32.xlu1 %v5814_v12 }
 0x3ab   :  { %v1071_v35 = vpop.xlane.xlu1 %1070  ;;  %4648 = vpow2.f32 %v1116_v22 }
 0x3ac   :  { %v1087_v37 = vsub.f32 %v5779_v29, %v1071_v35  ;;  %v5819_v41 = vpop.eup %4636  ;;  %4650 = vpow2.f32 %v1114_v50 }
 0x3ad   :  { %v5821_v55 = vpop.eup %4638  ;;  %1136 = vadd.xlane.f32.xlu0 %v5819_v41 }
 0x3ae   :  { %v1118_v44 = vmul.f32 1.442695, %v1087_v37  ;;  %1134 = vadd.xlane.f32.xlu1 %v5821_v55 }
 0x3b0   :  { %4652 = vpow2.f32 %v1118_v44  ;;  %v5825_v40 = vpop.eup %4640 }
 0x3b1   :  { %v5827_v42 = vpop.eup %4642  ;;  %1140 = vadd.xlane.f32.xlu0 %v5825_v40 }
 0x3b2   :  { %1138 = vadd.xlane.f32.xlu1 %v5827_v42 }
 0x3b4   :  { %v5831_v29 = vpop.eup %4644 }
 0x3b5   :  { %v5833_v45 = vpop.eup %4646  ;;  %1144 = vadd.xlane.f32.xlu0 %v5831_v29 }
 0x3b6   :  { %1142 = vadd.xlane.f32.xlu1 %v5833_v45 }
 0x3b8   :  { %v5837_v21 = vpop.eup %4648 }
 0x3b9   :  { %v5839_v10 = vpop.eup %4650  ;;  %1148 = vadd.xlane.f32.xlu0 %v5837_v21 }
 0x3ba   :  { %1146 = vadd.xlane.f32.xlu1 %v5839_v10 }
 0x3bd   :  { %v5843_v5 = vpop.eup %4652 }
 0x3be   :  { %1150 = vadd.xlane.f32.xlu1 %v5843_v5 }
 0x424   :  { %v1123_v52 = vpop.xlane.xlu1 %1122 }
 0x425   :  { %4654 = vrcp.f32 %v1123_v52 }
 0x426   :  { %v1121_v20 = vpop.xlane.xlu0 %1120 }
 0x427   :  { %4656 = vrcp.f32 %v1121_v20 }
 0x42a   :  { %v1125_v58 = vpop.xlane.xlu0 %1124 }
 0x42b   :  { %4658 = vrcp.f32 %v1125_v58 }
 0x42e   :  { %v1129_v43 = vpop.xlane.xlu0 %1128 }
 0x42f   :  { %4660 = vrcp.f32 %v1129_v43  ;;  %v1127_v46 = vpop.xlane.xlu1 %1126 }
 0x430   :  { %4662 = vrcp.f32 %v1127_v46 }
 0x432   :  { %v1133_v3 = vpop.xlane.xlu0 %1132  ;;  %v4655_v0 = vpop.eup %4654 }
 0x433   :  { %4664 = vrcp.f32 %v1133_v3  ;;  %v1131_v18 = vpop.xlane.xlu1 %1130  ;;  %v1185_v16 = vmul.f32 %v4655_v0, %v5789_v7 }
 0x434   :  { %v4657_v31 = vpop.eup %4656  ;;  %4666 = vrcp.f32 %v1131_v18 }
 0x435   :  { %v1184_v61 = vmul.f32 %v4657_v31, %v5794_v36 }
 0x436   :  { %v1137_v34 = vpop.xlane.xlu0 %1136 }
 0x437   :  { %4668 = vrcp.f32 %v1137_v34  ;;  %v1135_v13 = vpop.xlane.xlu1 %1134  ;;  %4197 = vmatprep.mubr.f32.mxu0 %v1184_v61 }
 0x438   :  { %v4659_v17 = vpop.eup %4658  ;;  %4670 = vrcp.f32 %v1135_v13  ;;  %4198 = vmatmul.mubr.f32.vlgmr.msra.gmra.mxu0 %v1185_v16 }
 0x439   :  { %v1186_v28 = vmul.f32 %v4659_v17, %v5799_v15 }
 0x43a   :  { %v1141_v47 = vpop.xlane.xlu0 %1140 }
 0x43b   :  { %4672 = vrcp.f32 %v1141_v47  ;;  %v1139_v59 = vpop.xlane.xlu1 %1138  ;;  %4200 = vmatprep.mubr.f32.mxu0 %v1186_v28 }
 0x43c   :  { %v4661_v23 = vpop.eup %4660  ;;  %4674 = vrcp.f32 %v1139_v59 }
 0x43d   :  { %v4663_v26 = vpop.eup %4662  ;;  %v1188_v36 = vmul.f32 %v4661_v23, %v5804_v14 }
 0x43e   :  { %v1145_v2 = vpop.xlane.xlu0 %1144  ;;  %v1187_v7 = vmul.f32 %v4663_v26, %v5806_v56 }
 0x43f   :  { %4676 = vrcp.f32 %v1145_v2  ;;  %v1143_v27 = vpop.xlane.xlu1 %1142 }
 0x440   :  { %v4665_v6 = vpop.eup %4664  ;;  %4678 = vrcp.f32 %v1143_v27  ;;  %4201 = vmatmul.mubr.f32.gmra.mxu0 %v1187_v7 }
 0x441   :  { %v4667_v24 = vpop.eup %4666  ;;  %4203 = vmatprep.mubr.f32.mxu0 %v1188_v36  ;;  %v1190_v15 = vmul.f32 %v4665_v6, %v5812_v8 }
 0x442   :  { %v1149_v39 = vpop.xlane.xlu0 %1148  ;;  %v1189_v63 = vmul.f32 %v4667_v24, %v5814_v12 }
 0x443   :  { %4680 = vrcp.f32 %v1149_v39  ;;  %v1147_v1 = vpop.xlane.xlu1 %1146 }
 0x444   :  { %v4669_v33 = vpop.eup %4668  ;;  %4682 = vrcp.f32 %v1147_v1  ;;  %4204 = vmatmul.mubr.f32.gmra.mxu0 %v1189_v63 }
 0x445   :  { %v4671_v14 = vpop.eup %4670  ;;  %4206 = vmatprep.mubr.f32.mxu0 %v1190_v15  ;;  %v1192_v56 = vmul.f32 %v4669_v33, %v5819_v41  ;;  %v7041_v33 = vld [vmem:[#allocation3_spill] sm:$0xff] }
 0x446   :  { %v1191_v22 = vmul.f32 %v4671_v14, %v5821_v55 }
 0x447   :  { %v1151_v50 = vpop.xlane.xlu1 %1150 }
 0x448   :  { %v4673_v35 = vpop.eup %4672  ;;  %4684 = vrcp.f32 %v1151_v50  ;;  %4207 = vmatmul.mubr.f32.gmra.mxu0 %v1191_v22 }
 0x449   :  { %v4675_v37 = vpop.eup %4674  ;;  %4209 = vmatprep.mubr.f32.mxu0 %v1192_v56  ;;  %v1194_v8 = vmul.f32 %v4673_v35, %v5825_v40 }
 0x44a   :  { %v1193_v12 = vmul.f32 %v4675_v37, %v5827_v42  ;;  %v7043_v37 = vld [vmem:[#allocation2_spill] sm:$0xff] }
 0x44c   :  { %v4677_v44 = vpop.eup %4676  ;;  %4210 = vmatmul.mubr.f32.gmra.mxu0 %v1193_v12 }
 0x44d   :  { %v4679_v52 = vpop.eup %4678  ;;  %4212 = vmatprep.mubr.f32.mxu0 %v1194_v8  ;;  %v1196_v20 = vmul.f32 %v4677_v44, %v5831_v29 }
 0x44e   :  { %v1195_v41 = vmul.f32 %v4679_v52, %v5833_v45  ;;  %v7045_v52 = vld [vmem:[#allocation5_spill] sm:$0xff] }
 0x450   :  { %v4681_v58 = vpop.eup %4680  ;;  %4213 = vmatmul.mubr.f32.gmra.mxu0 %v1195_v41 }
 0x451   :  { %v4683_v55 = vpop.eup %4682  ;;  %4215 = vmatprep.mubr.f32.mxu0 %v1196_v20  ;;  %v1198_v43 = vmul.f32 %v4681_v58, %v5837_v21  ;;  %v7047_v58 = vld [vmem:[#allocation4_spill] sm:$0xff] }
 0x452   :  { %v1197_v46 = vmul.f32 %v4683_v55, %v5839_v10 }
 0x454   :  { %4216 = vmatmul.mubr.f32.gmra.mxu0 %v1197_v46  ;;  %v1444_v46 = vld [vmem:[%s6894_s2 + $0x18] sm:$0xff] }
 0x455   :  { %v4685_v40 = vpop.eup %4684  ;;  %4218 = vmatprep.mubr.f32.mxu0 %v1198_v43  ;;  %4221 = vmatprep.subr.mxu0 %v1444_v46 }
 0x456   :  { %v1199_v42 = vmul.f32 %v4685_v40, %v5843_v5  ;;  %v3452_v5 = vld [vmem:[%s6893_s1 + $0x348] ss:$0 sm:$0xff]  ;;  %4222 = vmatpush3.msra.mxu0 %v1444_v46 }
 0x458   :  { %4219 = vmatmul.mubr.f32.gmra.mxu0 %v1199_v42 }
 0x4f8   :  { %v4199_v3 = vpop.f32.mrf.mxu0 }
 0x4fa   :  { %v1266_v0 = vpop.f32.mrf.mxu0 }
 0x500   :  { %v4202_v18 = vpop.f32.mrf.mxu0 }
 0x502   :  { %v1276_v29 = vpop.f32.mrf.mxu0 }
 0x504   :  { %v4205_v31 = vpop.f32.mrf.mxu0 }
 0x505   :  { %v1346_v21 = vadd.f32 %v4205_v31, %v4199_v3 }
 0x506   :  { %v1286_v45 = vpop.f32.mrf.mxu0 }
 0x507   :  { %v1345_v10 = vadd.f32 %v1286_v45, %v1266_v0 }
 0x508   :  { %v4208_v61 = vpop.f32.mrf.mxu0 }
 0x509   :  { %v1348_v23 = vadd.f32 %v4208_v61, %v4202_v18 }
 0x50a   :  { %v1296_v34 = vpop.f32.mrf.mxu0 }
 0x50b   :  { %v1347_v7 = vadd.f32 %v1296_v34, %v1276_v29 }
 0x50c   :  { %v4211_v16 = vpop.f32.mrf.mxu0 }
 0x50d   :  { %v1350_v47 = vadd.f32 %v4211_v16, %v1346_v21 }
 0x50e   :  { %v1306_v13 = vpop.f32.mrf.mxu0 }
 0x50f   :  { %v1349_v26 = vadd.f32 %v1345_v10, %v1306_v13 }
 0x510   :  { %v4214_v17 = vpop.f32.mrf.mxu0 }
 0x511   :  { %v1352_v27 = vadd.f32 %v4214_v17, %v1348_v23 }
 0x512   :  { %v1316_v28 = vpop.f32.mrf.mxu0 }
 0x513   :  { %v1351_v39 = vadd.f32 %v1347_v7, %v1316_v28  ;;  %v1566_v7 = vld [vmem:[%s6893_s1 + $0x3e8] sm:$0xff] }
 0x514   :  { %v4217_v59 = vpop.f32.mrf.mxu0  ;;  %4235 = vmatprep.subr.mxu1 %v1566_v7 }
 0x515   :  { %v1354_v36 = vadd.f32 %v4217_v59, %v1350_v47  ;;  %4236 = vmatpush3.msra.mxu1 %v1566_v7 }
 0x516   :  { %v1326_v2 = vpop.f32.mrf.mxu0 }
 0x517   :  { %v1363_v6 = vadd.f32 %v3452_v5, %v1354_v36  ;;  %v1353_v24 = vadd.f32 %v1349_v26, %v1326_v2  ;;  %v1443_v26 = vld [vmem:[%s6894_s2 + $0x10] sm:$0xff]  ;;  %v1442_v36 = vld [vmem:[%s6894_s2 + $0x8] sm:$0xff]  ;;  %v1441_v2 = vld [vmem:[%s6894_s2] sm:$0xff] }
 0x518   :  { %v4220_v15 = vpop.f32.mrf.mxu0  ;;  %4223 = vmatprep.subr.mxu0 %v1443_v26 }
 0x519   :  { %v1362_v63 = vadd.f32 %v3452_v5, %v1353_v24  ;;  %v1356_v1 = vadd.f32 %v4220_v15, %v1352_v27  ;;  %v1367_v14 = vadd.f32 %v1363_v6, %v7041_v33  ;;  %4224 = vmatpush3.msra.mxu0 %v1443_v26  ;;  %v1565_v27 = vld [vmem:[%s6893_s1 + $0x3e0] sm:$0xff]  ;;  %v1564_v6 = vld [vmem:[%s6893_s1 + $0x3d8] sm:$0xff]  ;;  %v1563_v24 = vld [vmem:[%s6893_s1 + $0x3d0] sm:$0xff] }
 0x51a   :  { %v1336_v56 = vpop.f32.mrf.mxu0  ;;  %4225 = vmatprep.subr.mxu0 %v1442_v36  ;;  %4237 = vmatprep.subr.mxu1 %v1565_v27  ;;  %v1562_v15 = vld [vmem:[%s6893_s1 + $0x3c8] sm:$0xff]  ;;  %v1551_v26 = vld [vmem:[%s6893_s1 + $0x370] sm:$0xff] }
 0x51b   :  { %v1365_v22 = vadd.f32 %v3452_v5, %v1356_v1  ;;  %v1355_v50 = vadd.f32 %v1351_v39, %v1336_v56  ;;  %v1375_v35 = vsel %vm7042_vm10, %v1367_v14, 0.0  ;;  %v1366_v8 = vadd.f32 %v1362_v63, %v7043_v37  ;;  %vm7050_vm10 = vmmov %vm7044_vm6  ;;  %4226 = vmatpush3.msra.mxu0 %v1442_v36  ;;  %4238 = vmatpush3.msra.mxu1 %v1565_v27  ;;  %v1561_v39 = vld [vmem:[%s6893_s1 + $0x3c0] sm:$0xff]  ;;  %v1560_v63 = vld [vmem:[%s6893_s1 + $0x3b8] sm:$0xff] }
 0x51c   :  { %1376 = vadd.xlane.f32.xlu1 %v1375_v35  ;;  %4227 = vmatprep.subr.mxu0 %v1441_v2  ;;  %v1559_v1 = vld [vmem:[%s6893_s1 + $0x3b0] sm:$0xff]  ;;  %v1558_v33 = vld [vmem:[%s6893_s1 + $0x3a8] sm:$0xff]  ;;  %v1556_v56 = vld [vmem:[%s6893_s1 + $0x398] sm:$0xff] }
 0x51d   :  { %v1364_v12 = vadd.f32 %v3452_v5, %v1355_v50  ;;  %v1372_v44 = vsel %vm7044_vm6, %v1366_v8, 0.0  ;;  %v1369_v20 = vadd.f32 %v1365_v22, %v7045_v52  ;;  %4228 = vmatpush3.msra.mxu0 %v1441_v2  ;;  %4239 = vmatprep.subr.mxu1 %v1564_v6  ;;  %v1555_v22 = vld [vmem:[%s6893_s1 + $0x390] sm:$0xff]  ;;  %v1554_v50 = vld [vmem:[%s6893_s1 + $0x388] sm:$0xff]  ;;  %v3455_v36 = vld [vmem:[%s6894_s2 + $0x20] ss:$0 sm:$0xff] }
 0x51e   :  { %1373 = vadd.xlane.f32.xlu0 %v1372_v44  ;;  %4240 = vmatpush3.msra.mxu1 %v1564_v6 }
 0x51f   :  { %v1381_v41 = vsel %vm7046_vm7, %v1369_v20, 0.0  ;;  %v1368_v55 = vadd.f32 %v1364_v12, %v7047_v58  ;;  %vm7051_vm7 = vmmov %vm7044_vm6  ;;  %4241 = vmatprep.subr.mxu1 %v1563_v24 }
 0x520   :  { %1382 = vadd.xlane.f32.xlu1 %v1381_v41  ;;  %4242 = vmatpush3.msra.mxu1 %v1563_v24 }
 0x521   :  { %v1378_v43 = vsel %vm7048_vm8, %v1368_v55, 0.0  ;;  %4243 = vmatprep.subr.mxu1 %v1562_v15  ;;  %vm7052_vm8 = vmmov %vm7044_vm6 }
 0x522   :  { %1379 = vadd.xlane.f32.xlu0 %v1378_v43  ;;  %4244 = vmatpush3.msra.mxu1 %v1562_v15 }
 0x523   :  { %4245 = vmatprep.subr.mxu1 %v1561_v39 }
 0x524   :  { %4246 = vmatpush3.msra.mxu1 %v1561_v39 }
 0x525   :  { %4247 = vmatprep.subr.mxu1 %v1560_v63 }
 0x526   :  { %4248 = vmatpush3.msra.mxu1 %v1560_v63 }
 0x527   :  { %4249 = vmatprep.subr.mxu1 %v1559_v1 }
 0x528   :  { %4250 = vmatpush3.msra.mxu1 %v1559_v1 }
 0x529   :  { %4251 = vmatprep.subr.mxu1 %v1558_v33 }
 0x52a   :  { %4252 = vmatpush3.msra.mxu1 %v1558_v33 }
 0x5a5   :  { %v1377_v40 = vpop.xlane.xlu1 %1376 }
 0x5a6   :  { %v1386_v42 = vmul.f32 0.03125, %v1377_v40 }
 0x5a7   :  { %v1374_v3 = vpop.xlane.xlu0 %1373 }
 0x5a8   :  { %v5876_v0 = vsub.f32 %v1367_v14, %v1386_v42  ;;  %v1385_v18 = vmul.f32 0.03125, %v1374_v3  ;;  %v1557_v14 = vld [vmem:[%s6893_s1 + $0x3a0] sm:$0xff]  ;;  %v3453_v3 = vld [vmem:[%s6893_s1 + $0x350] ss:$0 sm:$0xff] }
 0x5a9   :  { %v1383_v29 = vpop.xlane.xlu1 %1382  ;;  %4253 = vmatprep.subr.mxu1 %v1557_v14 }
 0x5aa   :  { %v5878_v31 = vsub.f32 %v1366_v8, %v1385_v18  ;;  %v1388_v45 = vmul.f32 0.03125, %v1383_v29  ;;  %v1394_v61 = vmul.f32 %v5876_v0, %v5876_v0  ;;  %4254 = vmatpush3.msra.mxu1 %v1557_v14 }
 0x5ab   :  { %v1380_v34 = vpop.xlane.xlu0 %1379  ;;  %4255 = vmatprep.subr.mxu1 %v1556_v56 }
 0x5ac   :  { %v5882_v16 = vsub.f32 %v1369_v20, %v1388_v45  ;;  %v1387_v13 = vmul.f32 0.03125, %v1380_v34  ;;  %v1400_v17 = vsel %vm7049_vm9, %v1394_v61, 0.0  ;;  %v1393_v21 = vmul.f32 %v5878_v31, %v5878_v31  ;;  %4256 = vmatpush3.msra.mxu1 %v1556_v56  ;;  %v3454_v34 = vld [vmem:[%s6893_s1 + $0x358] ss:$0 sm:$0xff]  ;;  %vm7053_vm9 = vmmov %vm7044_vm6 }
 0x5ad   :  { %1401 = vadd.xlane.f32.xlu1 %v1400_v17  ;;  %4257 = vmatprep.subr.mxu1 %v1555_v22 }
 0x5ae   :  { %v5887_v28 = vsub.f32 %v1368_v55, %v1387_v13  ;;  %v1397_v10 = vsel %vm7050_vm10, %v1393_v21, 0.0  ;;  %v1396_v47 = vmul.f32 %v5882_v16, %v5882_v16  ;;  %4258 = vmatpush3.msra.mxu1 %v1555_v22  ;;  %vm7054_vm10 = vmmov %vm7044_vm6  ;;  %v3460_v22 = vld [vmem:[%s6893_s1 + $0x3f0] ss:$0 sm:$0xff] }
 0x5af   :  { %1398 = vadd.xlane.f32.xlu0 %v1397_v10  ;;  %4259 = vmatprep.subr.mxu1 %v1554_v50 }
 0x5b0   :  { %v1406_v59 = vsel %vm7044_vm6, %v1396_v47, 0.0  ;;  %v1395_v5 = vmul.f32 %v5887_v28, %v5887_v28  ;;  %4260 = vmatpush3.msra.mxu1 %v1554_v50 }
 0x5b1   :  { %1407 = vadd.xlane.f32.xlu1 %v1406_v59 }
 0x5b2   :  { %v1403_v23 = vsel %vm7051_vm7, %v1395_v5, 0.0  ;;  %vm7055_vm7 = vmmov %vm7044_vm6 }
 0x5b3   :  { %1404 = vadd.xlane.f32.xlu0 %v1403_v23 }
 0x636   :  { %v1402_v35 = vpop.xlane.xlu1 %1401 }
 0x637   :  { %v1410_v37 = vmul.f32 0.03125, %v1402_v35 }
 0x638   :  { %v1399_v8 = vpop.xlane.xlu0 %1398 }
 0x639   :  { %v1414_v12 = vadd.f32 1e-05, %v1410_v37  ;;  %v1409_v44 = vmul.f32 0.03125, %v1399_v8 }
 0x63a   :  { %v1408_v52 = vpop.xlane.xlu1 %1407 }
 0x63b   :  { %4686 = vrsqrt.f32 %v1414_v12  ;;  %v1413_v20 = vadd.f32 1e-05, %v1409_v44  ;;  %v1412_v41 = vmul.f32 0.03125, %v1408_v52 }
 0x63c   :  { %v1405_v58 = vpop.xlane.xlu0 %1404 }
 0x63d   :  { %4688 = vrsqrt.f32 %v1413_v20  ;;  %v1416_v55 = vadd.f32 1e-05, %v1412_v41  ;;  %v1411_v43 = vmul.f32 0.03125, %v1405_v58 }
 0x63f   :  { %4690 = vrsqrt.f32 %v1416_v55  ;;  %v1415_v46 = vadd.f32 1e-05, %v1411_v43 }
 0x641   :  { %4692 = vrsqrt.f32 %v1415_v46 }
 0x648   :  { %v4687_v40 = vpop.eup %4686 }
 0x649   :  { %v1422_v42 = vmul.f32 %v4687_v40, %v5876_v0 }
 0x64a   :  { %v4689_v18 = vpop.eup %4688 }
 0x64b   :  { %v1421_v29 = vmul.f32 %v4689_v18, %v5878_v31  ;;  %v1430_v61 = vmul.f32 %v3453_v3, %v1422_v42 }
 0x64c   :  { %v4691_v45 = vpop.eup %4690 }
 0x64d   :  { %v1429_v13 = vmul.f32 %v3453_v3, %v1421_v29  ;;  %v1424_v17 = vmul.f32 %v4691_v45, %v5882_v16  ;;  %v1438_v47 = vadd.f32 %v3454_v34, %v1430_v61  ;;  %v1553_v16 = vld [vmem:[%s6893_s1 + $0x380] sm:$0xff] }
 0x64e   :  { %v4693_v21 = vpop.eup %4692  ;;  %4261 = vmatprep.subr.mxu1 %v1553_v16 }
 0x64f   :  { %v1437_v10 = vadd.f32 %v3454_v34, %v1429_v13  ;;  %v1423_v0 = vmul.f32 %v4693_v21, %v5887_v28  ;;  %v1432_v59 = vmul.f32 %v3453_v3, %v1424_v17  ;;  %4262 = vmatpush3.msra.mxu1 %v1553_v16  ;;  %v1552_v28 = vld [vmem:[%s6893_s1 + $0x378] sm:$0xff] }
 0x650   :  { %4263 = vmatprep.subr.mxu1 %v1552_v28 }
 0x651   :  { %4229 = vmatprep.mubr.msk.f32.mxu0 %vm7052_vm8, %v1437_v10  ;;  %v1431_v5 = vmul.f32 %v3453_v3, %v1423_v0  ;;  %v1440_v23 = vadd.f32 %v3454_v34, %v1432_v59  ;;  %4264 = vmatpush3.msra.mxu1 %v1552_v28  ;;  %vm7056_vm8 = vmmov %vm7044_vm6 }
 0x652   :  { %4230 = vmatmul.mubr.msk.f32.vlgmr.msra.gmra.mxu0 %vm7053_vm9, %v1438_v47  ;;  %4265 = vmatprep.subr.mxu1 %v1551_v26  ;;  %vm7057_vm9 = vmmov %vm7044_vm6 }
 0x653   :  { %v1439_v31 = vadd.f32 %v3454_v34, %v1431_v5  ;;  %4266 = vmatpush3.msra.mxu1 %v1551_v26 }
 0x655   :  { %4232 = vmatprep.mubr.msk.f32.mxu0 %vm7054_vm10, %v1439_v31  ;;  %vm7058_vm10 = vmmov %vm7044_vm6 }
 0x656   :  { %4233 = vmatmul.mubr.msk.f32.gmra.mxu0 %vm7044_vm6, %v1440_v23 }
 0x712   :  { %v4231_v2 = vpop.f32.mrf.mxu0 }
 0x713   :  { %v1534_v7 = vadd.f32 %v4231_v2, %v3455_v36 }
 0x714   :  { %v1528_v27 = vpop.f32.mrf.mxu0 }
 0x715   :  { %v1529_v6 = vadd.f32 %v3455_v36, %v1528_v27  ;;  %v1548_v39 = vmax.f32 %v1534_v7, 0.0  ;;  %v1746_v7 = vld [vmem:[%s6893_s1 + $0x470] sm:$0xff] }
 0x716   :  { %v4234_v24 = vpop.f32.mrf.mxu0  ;;  %v1762_v27 = vld [vmem:[%s6893_s1 + $0x4f0] sm:$0xff]  ;;  %4273 = vmatprep.subr.mxu0 %v1746_v7 }
 0x717   :  { %v1547_v15 = vmax.f32 %v1529_v6, 0.0  ;;  %v1544_v63 = vadd.f32 %v4234_v24, %v3455_v36  ;;  %v1745_v6 = vld [vmem:[%s6893_s1 + $0x468] sm:$0xff]  ;;  %4329 = vmatprep.subr.mxu1 %v1762_v27  ;;  %4274 = vmatpush3.msra.mxu0 %v1746_v7 }
 0x718   :  { %v1538_v1 = vpop.f32.mrf.mxu0  ;;  %v1761_v24 = vld [vmem:[%s6893_s1 + $0x4e8] sm:$0xff]  ;;  %4275 = vmatprep.subr.mxu0 %v1745_v6 }
 0x719   :  { %v1539_v33 = vadd.f32 %v3455_v36, %v1538_v1  ;;  %4267 = vmatprep.mubr.f32.mxu1 %v1547_v15  ;;  %v1550_v56 = vmax.f32 %v1544_v63, 0.0  ;;  %v1744_v15 = vld [vmem:[%s6893_s1 + $0x460] sm:$0xff]  ;;  %4276 = vmatpush3.msra.mxu0 %v1745_v6  ;;  %v1743_v63 = vld [vmem:[%s6893_s1 + $0x458] sm:$0xff]  ;;  %v1749_v7 = vld [vmem:[%s6893_s1 + $0x488] sm:$0xff] }
 0x71a   :  { %4268 = vmatmul.mubr.f32.vlgmr.msra.gmra.mxu1 %v1548_v39  ;;  %v1760_v39 = vld [vmem:[%s6893_s1 + $0x4e0] sm:$0xff]  ;;  %v1759_v1 = vld [vmem:[%s6893_s1 + $0x4d8] sm:$0xff]  ;;  %4277 = vmatprep.subr.mxu0 %v1744_v15 }
 0x71b   :  { %v1549_v14 = vmax.f32 %v1539_v33, 0.0  ;;  %4330 = vmatpush3.msra.mxu1 %v1762_v27  ;;  %4278 = vmatpush3.msra.mxu0 %v1744_v15  ;;  %v1742_v33 = vld [vmem:[%s6893_s1 + $0x450] sm:$0xff]  ;;  %v1732_v6 = vld [vmem:[%s6893_s1 + $0x400] sm:$0xff] }
 0x71c   :  { %4331 = vmatprep.subr.mxu1 %v1761_v24  ;;  %4279 = vmatprep.subr.mxu0 %v1743_v63 }
 0x71d   :  { %4270 = vmatprep.mubr.f32.mxu1 %v1549_v14  ;;  %4332 = vmatpush3.msra.mxu1 %v1761_v24  ;;  %v1758_v14 = vld [vmem:[%s6893_s1 + $0x4d0] sm:$0xff]  ;;  %v1748_v24 = vld [vmem:[%s6893_s1 + $0x480] sm:$0xff] }
 0x71e   :  { %4271 = vmatmul.mubr.f32.gmra.mxu1 %v1550_v56  ;;  %4333 = vmatprep.subr.mxu1 %v1760_v39  ;;  %v1741_v56 = vld [vmem:[%s6893_s1 + $0x448] sm:$0xff] }
 0x71f   :  { %4334 = vmatpush3.msra.mxu1 %v1760_v39  ;;  %4280 = vmatpush3.msra.mxu0 %v1743_v63 }
 0x720   :  { %4335 = vmatprep.subr.mxu1 %v1759_v1  ;;  %4281 = vmatprep.subr.mxu0 %v1742_v33 }
 0x721   :  { %4336 = vmatpush3.msra.mxu1 %v1759_v1  ;;  %4282 = vmatpush3.msra.mxu0 %v1742_v33  ;;  %v1747_v1 = vld [vmem:[%s6893_s1 + $0x478] sm:$0xff] }
 0x722   :  { %4337 = vmatprep.subr.mxu1 %v1758_v14  ;;  %4283 = vmatprep.subr.mxu0 %v1741_v56 }
 0x723   :  { %4338 = vmatpush3.msra.mxu1 %v1758_v14  ;;  %4284 = vmatpush3.msra.mxu0 %v1741_v56 }
 0x7da   :  { %v4269_v50 = vpop.f32.mrf.mxu1 }
 0x7db   :  { %v1644_v35 = vadd.f32 %v4269_v50, %v3460_v22  ;;  %v1740_v50 = vld [vmem:[%s6893_s1 + $0x440] sm:$0xff] }
 0x7dc   :  { %v1638_v37 = vpop.f32.mrf.mxu1  ;;  %4285 = vmatprep.subr.mxu0 %v1740_v50 }
 0x7dd   :  { %v1639_v8 = vadd.f32 %v3460_v22, %v1638_v37  ;;  %v1658_v12 = vadd.f32 %v1644_v35, %v1438_v47  ;;  %v1756_v35 = vld [vmem:[%s6893_s1 + $0x4c0] sm:$0xff]  ;;  %v1739_v37 = vld [vmem:[%s6893_s1 + $0x438] sm:$0xff]  ;;  %4286 = vmatpush3.msra.mxu0 %v1740_v50 }
 0x7de   :  { %v4272_v44 = vpop.f32.mrf.mxu1  ;;  %4287 = vmatprep.subr.mxu0 %v1739_v37 }
 0x7df   :  { %v1654_v52 = vadd.f32 %v4272_v44, %v3460_v22  ;;  %v1666_v20 = vsel %vm7055_vm7, %v1658_v12, 0.0  ;;  %v1657_v41 = vadd.f32 %v1639_v8, %v1437_v10  ;;  %vm7059_vm7 = vmmov %vm7044_vm6  ;;  %v1755_v8 = vld [vmem:[%s6893_s1 + $0x4b8] sm:$0xff]  ;;  %v1754_v44 = vld [vmem:[%s6893_s1 + $0x4b0] sm:$0xff]  ;;  %4288 = vmatpush3.msra.mxu0 %v1739_v37 }
 0x7e0   :  { %1667 = vadd.xlane.f32.xlu1 %v1666_v20  ;;  %v1648_v58 = vpop.f32.mrf.mxu1 }
 0x7e1   :  { %v1649_v55 = vadd.f32 %v3460_v22, %v1648_v58  ;;  %v1663_v43 = vsel %vm7056_vm8, %v1657_v41, 0.0  ;;  %v1660_v46 = vadd.f32 %v1654_v52, %v1440_v23  ;;  %vm7060_vm8 = vmmov %vm7044_vm6  ;;  %v1757_v22 = vld [vmem:[%s6893_s1 + $0x4c8] sm:$0xff] }
 0x7e2   :  { %1664 = vadd.xlane.f32.xlu0 %v1663_v43  ;;  %4339 = vmatprep.subr.mxu1 %v1757_v22 }
 0x7e3   :  { %v1672_v40 = vsel %vm7057_vm9, %v1660_v46, 0.0  ;;  %v1659_v42 = vadd.f32 %v1649_v55, %v1439_v31  ;;  %vm7061_vm9 = vmmov %vm7044_vm6  ;;  %4340 = vmatpush3.msra.mxu1 %v1757_v22 }
 0x7e4   :  { %1673 = vadd.xlane.f32.xlu1 %v1672_v40  ;;  %4341 = vmatprep.subr.mxu1 %v1756_v35 }
 0x7e5   :  { %v1669_v3 = vsel %vm7058_vm10, %v1659_v42, 0.0  ;;  %4342 = vmatpush3.msra.mxu1 %v1756_v35  ;;  %vm7065_vm10 = vmmov %vm7044_vm6 }
 0x7e6   :  { %1670 = vadd.xlane.f32.xlu0 %v1669_v3  ;;  %4343 = vmatprep.subr.mxu1 %v1755_v8 }
 0x7e7   :  { %4344 = vmatpush3.msra.mxu1 %v1755_v8 }
 0x7e8   :  { %4345 = vmatprep.subr.mxu1 %v1754_v44 }
 0x7e9   :  { %4346 = vmatpush3.msra.mxu1 %v1754_v44 }
 0x869   :  { %v1668_v18 = vpop.xlane.xlu1 %1667 }
 0x86a   :  { %v1676_v29 = vmul.f32 0.03125, %v1668_v18 }
 0x86b   :  { %v1665_v45 = vpop.xlane.xlu0 %1664 }
 0x86c   :  { %v5977_v61 = vsub.f32 %v1658_v12, %v1676_v29  ;;  %v1675_v34 = vmul.f32 0.03125, %v1665_v45  ;;  %v1738_v12 = vld [vmem:[%s6893_s1 + $0x430] sm:$0xff]  ;;  %v1737_v45 = vld [vmem:[%s6893_s1 + $0x428] sm:$0xff] }
 0x86d   :  { %v1674_v13 = vpop.xlane.xlu1 %1673  ;;  %4289 = vmatprep.subr.mxu0 %v1738_v12 }
 0x86e   :  { %v5979_v17 = vsub.f32 %v1657_v41, %v1675_v34  ;;  %v1678_v21 = vmul.f32 0.03125, %v1674_v13  ;;  %v1684_v10 = vmul.f32 %v5977_v61, %v5977_v61  ;;  %4290 = vmatpush3.msra.mxu0 %v1738_v12  ;;  %v1753_v34 = vld [vmem:[%s6893_s1 + $0x4a8] sm:$0xff]  ;;  %v1736_v13 = vld [vmem:[%s6893_s1 + $0x420] sm:$0xff] }
 0x86f   :  { %v1671_v0 = vpop.xlane.xlu0 %1670  ;;  %4291 = vmatprep.subr.mxu0 %v1737_v45  ;;  %4347 = vmatprep.subr.mxu1 %v1753_v34 }
 0x870   :  { %v5983_v47 = vsub.f32 %v1660_v46, %v1678_v21  ;;  %v1677_v59 = vmul.f32 0.03125, %v1671_v0  ;;  %v1690_v5 = vsel %vm7044_vm6, %v1684_v10, 0.0  ;;  %v1683_v31 = vmul.f32 %v5979_v17, %v5979_v17  ;;  %4292 = vmatpush3.msra.mxu0 %v1737_v45  ;;  %4348 = vmatpush3.msra.mxu1 %v1753_v34  ;;  %v1752_v21 = vld [vmem:[%s6893_s1 + $0x4a0] sm:$0xff]  ;;  %v1735_v10 = vld [vmem:[%s6893_s1 + $0x418] sm:$0xff]  ;;  %v1777_v45 = vld [vmem:[%s6893_s1 + $0x568] sm:$0xff] }
 0x871   :  { %1691 = vadd.xlane.f32.xlu1 %v1690_v5  ;;  %4293 = vmatprep.subr.mxu0 %v1736_v13  ;;  %v1751_v0 = vld [vmem:[%s6893_s1 + $0x498] sm:$0xff]  ;;  %v1750_v5 = vld [vmem:[%s6893_s1 + $0x490] sm:$0xff] }
 0x872   :  { %v5988_v23 = vsub.f32 %v1659_v42, %v1677_v59  ;;  %v1687_v16 = vsel %vm7059_vm7, %v1683_v31, 0.0  ;;  %v1686_v28 = vmul.f32 %v5983_v47, %v5983_v47  ;;  %4349 = vmatprep.subr.mxu1 %v1752_v21  ;;  %4294 = vmatpush3.msra.mxu0 %v1736_v13  ;;  %v1734_v59 = vld [vmem:[%s6893_s1 + $0x410] sm:$0xff]  ;;  %vm7066_vm7 = vcmask 523264  }
 0x873   :  { %1688 = vadd.xlane.f32.xlu0 %v1687_v16  ;;  %4350 = vmatpush3.msra.mxu1 %v1752_v21  ;;  %v3461_v16 = vld [vmem:[%s6893_s1 + $0x360] ss:$0 sm:$0xff] }
 0x874   :  { %v1696_v26 = vsel %vm7060_vm8, %v1686_v28, 0.0  ;;  %v1685_v36 = vmul.f32 %v5988_v23, %v5988_v23  ;;  %4295 = vmatprep.subr.mxu0 %v1735_v10  ;;  %4351 = vmatprep.subr.mxu1 %v1751_v0  ;;  %vm7067_vm8 = vmmov %vm7066_vm7 }
 0x875   :  { %1697 = vadd.xlane.f32.xlu1 %v1696_v26  ;;  %4296 = vmatpush3.msra.mxu0 %v1735_v10 }
 0x876   :  { %v1693_v2 = vsel %vm7061_vm9, %v1685_v36, 0.0  ;;  %4352 = vmatpush3.msra.mxu1 %v1751_v0  ;;  %4297 = vmatprep.subr.mxu0 %v1734_v59  ;;  %v3462_v36 = vld [vmem:[%s6893_s1 + $0x368] ss:$0 sm:$0xff]  ;;  %vm7068_vm9 = vcmask 785408  }
 0x877   :  { %1694 = vadd.xlane.f32.xlu0 %v1693_v2  ;;  %4353 = vmatprep.subr.mxu1 %v1750_v5  ;;  %v1733_v2 = vld [vmem:[%s6893_s1 + $0x408] sm:$0xff]  ;;  %vm7069_vm5 = vmmov %vm7068_vm9 }
 0x878   :  { %4298 = vmatpush3.msra.mxu0 %v1734_v59  ;;  %4354 = vmatpush3.msra.mxu1 %v1750_v5  ;;  %v1776_v59 = vld [vmem:[%s6893_s1 + $0x560] sm:$0xff] }
 0x879   :  { %4299 = vmatprep.subr.mxu0 %v1733_v2  ;;  %4355 = vmatprep.subr.mxu1 %v1749_v7 }
 0x87a   :  { %4300 = vmatpush3.msra.mxu0 %v1733_v2  ;;  %4356 = vmatpush3.msra.mxu1 %v1749_v7 }
 0x87b   :  { %4301 = vmatprep.subr.mxu0 %v1732_v6  ;;  %4357 = vmatprep.subr.mxu1 %v1748_v24 }
 0x87c   :  { %4302 = vmatpush3.msra.mxu0 %v1732_v6  ;;  %4358 = vmatpush3.msra.mxu1 %v1748_v24  ;;  %v1773_v6 = vld [vmem:[%s6893_s1 + $0x548] sm:$0xff] }
 0x87d   :  { %4359 = vmatprep.subr.mxu1 %v1747_v1 }
 0x87e   :  { %4360 = vmatpush3.msra.mxu1 %v1747_v1 }
 0x8fa   :  { %v1692_v52 = vpop.xlane.xlu1 %1691 }
 0x8fb   :  { %v1700_v20 = vmul.f32 0.03125, %v1692_v52 }
 0x8fc   :  { %v1689_v41 = vpop.xlane.xlu0 %1688 }
 0x8fd   :  { %v1704_v58 = vadd.f32 1e-05, %v1700_v20  ;;  %v1699_v55 = vmul.f32 0.03125, %v1689_v41 }
 0x8fe   :  { %v1698_v43 = vpop.xlane.xlu1 %1697 }
 0x8ff   :  { %4694 = vrsqrt.f32 %v1704_v58  ;;  %v1703_v46 = vadd.f32 1e-05, %v1699_v55  ;;  %v1702_v42 = vmul.f32 0.03125, %v1698_v43 }
 0x900   :  { %v1695_v40 = vpop.xlane.xlu0 %1694 }
 0x901   :  { %4696 = vrsqrt.f32 %v1703_v46  ;;  %v1701_v3 = vmul.f32 0.03125, %v1695_v40  ;;  %v1706_v29 = vadd.f32 1e-05, %v1702_v42 }
 0x903   :  { %v1705_v18 = vadd.f32 1e-05, %v1701_v3 }
 0x905   :  { %4698 = vrsqrt.f32 %v1705_v18 }
 0x906   :  { %4700 = vrsqrt.f32 %v1706_v29  ;;  %v1779_v29 = vld [vmem:[%s6893_s1 + $0x578] sm:$0xff] }
 0x90c   :  { %v4695_v31 = vpop.eup %4694 }
 0x90d   :  { %v1712_v28 = vmul.f32 %v4695_v31, %v5977_v61 }
 0x90e   :  { %v4697_v26 = vpop.eup %4696 }
 0x90f   :  { %v1711_v27 = vmul.f32 %v4697_v26, %v5979_v17  ;;  %v1720_v61 = vmul.f32 %v3461_v16, %v1712_v28  ;;  %v1731_v17 = vld [vmem:[%s6893_s1 + $0x3f8] sm:$0xff]  ;;  %v1774_v26 = vld [vmem:[%s6893_s1 + $0x550] sm:$0xff] }
 0x910   :  { %4303 = vmatprep.subr.mxu0 %v1731_v17  ;;  %v1775_v28 = vld [vmem:[%s6893_s1 + $0x558] sm:$0xff] }
 0x911   :  { %v6095_v15 = vadd.f32 %v3462_v36, %v1720_v61  ;;  %v1719_v39 = vmul.f32 %v3461_v16, %v1711_v27  ;;  %4304 = vmatpush3.msra.mxu0 %v1731_v17 }
 0x912   :  { %v4699_v63 = vpop.eup %4698 }
 0x913   :  { %v1713_v33 = vmul.f32 %v4699_v63, %v5988_v23  ;;  %1833 = vrot.lane.b32.xlu1 %v6095_v15, %s4789_s29  ;;  %v6106_v14 = vadd.f32 %v3462_v36, %v1719_v39  ;;  %v4701_v56 = vpop.eup %4700  ;;  %v1778_v23 = vld [vmem:[%s6893_s1 + $0x570] sm:$0xff]  ;;  %v1772_v63 = vld [vmem:[%s6893_s1 + $0x540] sm:$0xff] }
 0x914   :  { %v1714_v50 = vmul.f32 %v4701_v56, %v5983_v47  ;;  %4385 = vmatprep.subr.mxu0 %v1778_v23 }
 0x915   :  { %7062 = vst [vmem:[#allocation18_spill] sm:$0xff] %v6106_v14  ;;  %1831 = vrot.lane.b32.xlu0 %v6106_v14, %s4789_s29  ;;  %v1721_v22 = vmul.f32 %v3461_v16, %v1713_v33  ;;  %v1771_v33 = vld [vmem:[%s6893_s1 + $0x538] sm:$0xff] }
 0x916   :  { %v1722_v37 = vmul.f32 %v3461_v16, %v1714_v50 }
 0x917   :  { %1845 = vrot.lane.b32.xlu1 %v6095_v15, %s4790_s9  ;;  %v6120_v35 = vadd.f32 %v3462_v36, %v1721_v22  ;;  %v1770_v22 = vld [vmem:[%s6893_s1 + $0x530] sm:$0xff] }
 0x918   :  { %v6128_v47 = vadd.f32 %v3462_v36, %v1722_v37  ;;  %v7085_v37 = vld [vmem:[#allocation16_spill] sm:$0xff] }
 0x919   :  { %1855 = vrot.lane.b32.xlu0 %v6106_v14, %s4788_s28  ;;  %7063 = vst [vmem:[#allocation3_spill] sm:$0xff] %v6120_v35 }
 0x91a   :  { %7064 = vst [vmem:[#allocation2_spill] sm:$0xff] %v6128_v47 }
 0x91b   :  { %1857 = vrot.lane.b32.xlu1 %v6095_v15, %s4788_s28 }
 0x91d   :  { %1835 = vrot.lane.b32.xlu0 %v6120_v35, %s4789_s29 }
 0x91f   :  { %1843 = vrot.lane.b32.xlu1 %v6106_v14, %s4790_s9 }
 0x921   :  { %1847 = vrot.lane.b32.xlu0 %v6120_v35, %s4790_s9 }
 0x923   :  { %1837 = vrot.lane.b32.xlu1 %v6128_v47, %s4789_s29 }
 0x925   :  { %1859 = vrot.lane.b32.xlu0 %v6120_v35, %s4788_s28 }
 0x927   :  { %1849 = vrot.lane.b32.xlu1 %v6128_v47, %s4790_s9 }
 0x92b   :  { %1861 = vrot.lane.b32.xlu1 %v6128_v47, %s4788_s28 }
 0x985   :  { %v1834_v8 = vpop.permute.xlu1 %1833 }
 0x986   :  { %v1868_v43 = vsel %vm7044_vm6, %v6095_v15, %v1834_v8  ;;  %v1768_v8 = vld [vmem:[%s6893_s1 + $0x520] sm:$0xff] }
 0x987   :  { %v1832_v12 = vpop.permute.xlu0 %1831 }
 0x988   :  { %v1867_v58 = vsel %vm7065_vm10, %v6106_v14, %v1832_v12  ;;  %vm7073_vm10 = vmmov %vm7066_vm7  ;;  %v7087_v12 = vld [vmem:[#allocation17_spill] sm:$0xff] }
 0x989   :  { %v1846_v44 = vpop.permute.xlu1 %1845 }
 0x98a   :  { %v1872_v40 = vsel %vm7067_vm8, %v1868_v43, %v1846_v44  ;;  %v7089_v44 = vld [vmem:[#allocation19_spill] sm:$0xff]  ;;  %v1764_v43 = vld [vmem:[%s6893_s1 + $0x500] sm:$0xff] }
 0x98b   :  { %v1856_v52 = vpop.permute.xlu0 %1855 }
 0x98d   :  { %v1858_v20 = vpop.permute.xlu1 %1857 }
 0x98e   :  { %v6148_v18 = vsel %vm7069_vm5, %v1872_v40, %v1858_v20  ;;  %vm7072_vm5 = vmmov %vm7044_vm6  ;;  %v1766_v20 = vld [vmem:[%s6893_s1 + $0x510] sm:$0xff]  ;;  %v1763_v40 = vld [vmem:[%s6893_s1 + $0x4f8] sm:$0xff] }
 0x98f   :  { %v1836_v41 = vpop.permute.xlu0 %1835  ;;  %vm7074_vm6 = vmmov %vm7068_vm9 }
 0x990   :  { %v1869_v21 = vsel %vm7072_vm5, %v6120_v35, %v1836_v41  ;;  %v7091_v41 = vld [vmem:[#allocation20_spill] sm:$0xff]  ;;  %v1800_v35 = vld [vmem:[%s6893_s1 + $0x620] sm:$0xff] }
 0x991   :  { %v1844_v55 = vpop.permute.xlu1 %1843 }
 0x992   :  { %v1871_v46 = vsel %vm7066_vm7, %v1867_v58, %v1844_v55  ;;  %vm7076_vm7 = vmmov %vm7072_vm5  ;;  %vm7086_vm5 = vnez %v7085_v37  ;;  %v7093_v58 = vld [vmem:[#allocation21_spill] sm:$0xff]  ;;  %v1765_v55 = vld [vmem:[%s6893_s1 + $0x508] sm:$0xff] }
 0x993   :  { %v6145_v42 = vsel %vm7068_vm9, %v1871_v46, %v1856_v52  ;;  %v1848_v3 = vpop.permute.xlu0 %1847  ;;  %vm7077_vm9 = vmmov %vm7074_vm6  ;;  %v1767_v52 = vld [vmem:[%s6893_s1 + $0x518] sm:$0xff]  ;;  %v7095_v46 = vld [vmem:[#allocation22_spill] sm:$0xff] }
 0x994   :  { %4305 = vmatprep.mubr.msk.f32.mxu0 %vm5000_vm11, %v6145_v42  ;;  %4361 = vmatprep.mubr.msk.f32.mxu1 %vm5000_vm11, %v6145_v42  ;;  %v1873_v10 = vsel %vm7073_vm10, %v1869_v21, %v1848_v3  ;;  %vm7088_vm10 = vnez %v7087_v12  ;;  %v1809_v37 = vld [vmem:[%s6893_s1 + $0x668] sm:$0xff] }
 0x995   :  { %4306 = vmatmul.mubr.msk.f32.vlgmr.msra.gmra.mxu0 %vm5021_vm12, %v6148_v18  ;;  %4362 = vmatmul.mubr.msk.f32.vlgmr.msra.gmra.mxu1 %vm5021_vm12, %v6148_v18  ;;  %v1838_v13 = vpop.permute.xlu1 %1837 }
 0x996   :  { %4386 = vmatpush3.msra.mxu0 %v1778_v23  ;;  %v1870_v36 = vsel %vm7076_vm7, %v6128_v47, %v1838_v13  ;;  %v1769_v23 = vld [vmem:[%s6893_s1 + $0x528] sm:$0xff]  ;;  %vm7092_vm7 = vnez %v7091_v41  ;;  %v1824_v47 = vld [vmem:[%s6893_s1 + $0x6e0] sm:$0xff] }
 0x997   :  { %v1860_v0 = vpop.permute.xlu0 %1859  ;;  %4387 = vmatprep.subr.mxu0 %v1777_v45 }
 0x998   :  { %v6172_v5 = vsel %vm7074_vm6, %v1873_v10, %v1860_v0  ;;  %4388 = vmatpush3.msra.mxu0 %v1777_v45  ;;  %vm7090_vm6 = vnez %v7089_v44 }
 0x999   :  { %4308 = vmatprep.mubr.msk.f32.mxu0 %vm5057_vm13, %v6172_v5  ;;  %4364 = vmatprep.mubr.msk.f32.mxu1 %vm5057_vm13, %v6172_v5  ;;  %v1850_v16 = vpop.permute.xlu1 %1849 }
 0x99a   :  { %4389 = vmatprep.subr.mxu0 %v1776_v59  ;;  %v1874_v2 = vsel %vm7067_vm8, %v1870_v36, %v1850_v16  ;;  %vm7094_vm8 = vnez %v7093_v58 }
 0x99b   :  { %4390 = vmatpush3.msra.mxu0 %v1776_v59 }
 0x99c   :  { %4391 = vmatprep.subr.mxu0 %v1775_v28 }
 0x99d   :  { %v1862_v7 = vpop.permute.xlu1 %1861  ;;  %4392 = vmatpush3.msra.mxu0 %v1775_v28 }
 0x99e   :  { %v6190_v27 = vsel %vm7077_vm9, %v1874_v2, %v1862_v7  ;;  %4393 = vmatprep.subr.mxu0 %v1774_v26  ;;  %vm7096_vm9 = vnez %v7095_v46 }
 0x99f   :  { %4309 = vmatmul.mubr.msk.f32.gmra.mxu0 %vm5106_vm14, %v6190_v27  ;;  %4365 = vmatmul.mubr.msk.f32.gmra.mxu1 %vm5106_vm14, %v6190_v27 }
 0x9a0   :  { %4311 = vmatprep.mubr.msk.f32.mxu0 %vm5116_vm15, %v6145_v42  ;;  %4367 = vmatprep.mubr.msk.f32.mxu1 %vm5116_vm15, %v6145_v42 }
 0x9a1   :  { %4394 = vmatpush3.msra.mxu0 %v1774_v26 }
 0x9a2   :  { %4395 = vmatprep.subr.mxu0 %v1773_v6 }
 0x9a3   :  { %4312 = vmatmul.mubr.msk.f32.gmra.mxu0 %vm5143_vm0, %v6148_v18  ;;  %4368 = vmatmul.mubr.msk.f32.gmra.mxu1 %vm5143_vm0, %v6148_v18 }
 0x9a4   :  { %4314 = vmatprep.mubr.msk.f32.mxu0 %vm5152_vm1, %v6172_v5  ;;  %4370 = vmatprep.mubr.msk.f32.mxu1 %vm5152_vm1, %v6172_v5 }
 0x9a5   :  { %4396 = vmatpush3.msra.mxu0 %v1773_v6 }
 0x9a6   :  { %4397 = vmatprep.subr.mxu0 %v1772_v63 }
 0x9a7   :  { %4315 = vmatmul.mubr.msk.f32.gmra.mxu0 %vm5176_vm2, %v6190_v27  ;;  %4371 = vmatmul.mubr.msk.f32.gmra.mxu1 %vm5176_vm2, %v6190_v27 }
 0x9a8   :  { %4317 = vmatprep.mubr.msk.f32.mxu0 %vm5185_vm3, %v6145_v42  ;;  %4373 = vmatprep.mubr.msk.f32.mxu1 %vm5185_vm3, %v6145_v42 }
 0x9a9   :  { %4398 = vmatpush3.msra.mxu0 %v1772_v63 }
 0x9aa   :  { %4399 = vmatprep.subr.mxu0 %v1771_v33 }
 0x9ab   :  { %4400 = vmatpush3.msra.mxu0 %v1771_v33  ;;  %4374 = vmatmul.mubr.msk.f32.gmra.mxu1 %vm5209_vm4, %v6148_v18 }
 0x9ac   :  { %4318 = vmatmul.mubr.msk.f32.gmra.mxu0 %vm5209_vm4, %v6148_v18  ;;  %4401 = vmatprep.subr.mxu0 %v1770_v22 }
 0x9ad   :  { %4320 = vmatprep.mubr.msk.f32.mxu0 %vm7086_vm5, %v6172_v5  ;;  %4376 = vmatprep.mubr.msk.f32.mxu1 %vm7086_vm5, %v6172_v5 }
 0x9ae   :  { %4402 = vmatpush3.msra.mxu0 %v1770_v22  ;;  %v1810_v22 = vld [vmem:[%s6893_s1 + $0x670] sm:$0xff] }
 0x9af   :  { %4403 = vmatprep.subr.mxu0 %v1769_v23  ;;  %4377 = vmatmul.mubr.msk.f32.gmra.mxu1 %vm7088_vm10, %v6190_v27 }
 0x9b0   :  { %4404 = vmatpush3.msra.mxu0 %v1769_v23  ;;  %4379 = vmatprep.mubr.msk.f32.mxu1 %vm7090_vm6, %v6145_v42 }
 0x9b1   :  { %4321 = vmatmul.mubr.msk.f32.gmra.mxu0 %vm7088_vm10, %v6190_v27  ;;  %4405 = vmatprep.subr.mxu0 %v1768_v8 }
 0x9b2   :  { %4323 = vmatprep.mubr.msk.f32.mxu0 %vm7090_vm6, %v6145_v42  ;;  %4406 = vmatpush3.msra.mxu0 %v1768_v8 }
 0x9b3   :  { %4407 = vmatprep.subr.mxu0 %v1767_v52  ;;  %4380 = vmatmul.mubr.msk.f32.gmra.mxu1 %vm7092_vm7, %v6148_v18 }
 0x9b4   :  { %4408 = vmatpush3.msra.mxu0 %v1767_v52  ;;  %4382 = vmatprep.mubr.msk.f32.mxu1 %vm7094_vm8, %v6172_v5 }
 0x9b5   :  { %4324 = vmatmul.mubr.msk.f32.gmra.mxu0 %vm7092_vm7, %v6148_v18  ;;  %4409 = vmatprep.subr.mxu0 %v1766_v20 }
 0x9b6   :  { %4326 = vmatprep.mubr.msk.f32.mxu0 %vm7094_vm8, %v6172_v5  ;;  %4410 = vmatpush3.msra.mxu0 %v1766_v20  ;;  %v1808_v20 = vld [vmem:[%s6893_s1 + $0x660] sm:$0xff] }
 0x9b7   :  { %4411 = vmatprep.subr.mxu0 %v1765_v55  ;;  %4383 = vmatmul.mubr.msk.f32.gmra.mxu1 %vm7096_vm9, %v6190_v27 }
 0x9b8   :  { %4412 = vmatpush3.msra.mxu0 %v1765_v55 }
 0x9b9   :  { %4327 = vmatmul.mubr.msk.f32.gmra.mxu0 %vm7096_vm9, %v6190_v27  ;;  %4413 = vmatprep.subr.mxu0 %v1764_v43 }
 0x9ba   :  { %4414 = vmatpush3.msra.mxu0 %v1764_v43  ;;  %4417 = vmatprep.mubr.msk.f32.mxu0 %vm5000_vm11, %v6145_v42  ;;  %vm7097_vm11 = vcmask 261120   ;;  %v1807_v43 = vld [vmem:[%s6893_s1 + $0x658] sm:$0xff] }
 0x9bb   :  { %4415 = vmatprep.subr.mxu0 %v1763_v40 }
 0x9bc   :  { %4416 = vmatpush3.msra.mxu0 %v1763_v40 }
 0x9bd   :  { %4418 = vmatmul.mubr.msk.f32.vlgmr.msra.gmra.mxu0 %vm5021_vm12, %v6148_v18  ;;  %vm7098_vm12 = vmmov %vm7097_vm11 }
 0x9be   :  { %4420 = vmatprep.mubr.msk.f32.mxu0 %vm5057_vm13, %v6172_v5  ;;  %vm7099_vm13 = vmmov %vm7097_vm11 }
 0x9c1   :  { %4421 = vmatmul.mubr.msk.f32.gmra.mxu0 %vm5106_vm14, %v6190_v27  ;;  %vm7100_vm14 = vmmov %vm7097_vm11 }
 0x9c2   :  { %4423 = vmatprep.mubr.msk.f32.mxu0 %vm5116_vm15, %v6145_v42  ;;  %vm7101_vm15 = vmmov %vm7097_vm11 }
 0x9c5   :  { %4424 = vmatmul.mubr.msk.f32.gmra.mxu0 %vm5143_vm0, %v6148_v18  ;;  %vm7102_vm0 = vmmov %vm7097_vm11 }
 0x9c6   :  { %4426 = vmatprep.mubr.msk.f32.mxu0 %vm5152_vm1, %v6172_v5  ;;  %vm7103_vm1 = vmmov %vm7102_vm0 }
 0x9c9   :  { %4427 = vmatmul.mubr.msk.f32.gmra.mxu0 %vm5176_vm2, %v6190_v27  ;;  %vm7104_vm2 = vmmov %vm7102_vm0 }
 0x9ca   :  { %4429 = vmatprep.mubr.msk.f32.mxu0 %vm5185_vm3, %v6145_v42  ;;  %vm7105_vm3 = vmmov %vm7102_vm0 }
 0x9cd   :  { %4430 = vmatmul.mubr.msk.f32.gmra.mxu0 %vm5209_vm4, %v6148_v18  ;;  %vm7106_vm4 = vmmov %vm7102_vm0 }
 0x9ce   :  { %4432 = vmatprep.mubr.msk.f32.mxu0 %vm7086_vm5, %v6172_v5  ;;  %vm7107_vm5 = vmmov %vm7102_vm0 }
 0x9d1   :  { %4433 = vmatmul.mubr.msk.f32.gmra.mxu0 %vm7088_vm10, %v6190_v27  ;;  %vm7108_vm10 = vmmov %vm7102_vm0 }
 0x9d2   :  { %4435 = vmatprep.mubr.msk.f32.mxu0 %vm7090_vm6, %v6145_v42  ;;  %vm7109_vm6 = vmmov %vm7102_vm0 }
 0x9d5   :  { %4436 = vmatmul.mubr.msk.f32.gmra.mxu0 %vm7092_vm7, %v6148_v18  ;;  %vm7110_vm7 = vmmov %vm7102_vm0 }
 0x9d6   :  { %4438 = vmatprep.mubr.msk.f32.mxu0 %vm7094_vm8, %v6172_v5  ;;  %vm7111_vm8 = vmmov %vm7102_vm0 }
 0x9d9   :  { %4439 = vmatmul.mubr.msk.f32.gmra.mxu0 %vm7096_vm9, %v6190_v27  ;;  %vm7112_vm9 = vmmov %vm7102_vm0 }
 0xa55   :  { %v6351_v3 = vpop.f32.mrf.mxu0  ;;  %v6356_v34 = vpop.f32.mrf.mxu1 }
 0xa57   :  { %v1961_v45 = vpop.f32.mrf.mxu0  ;;  %v6359_v18 = vpop.f32.mrf.mxu1 }
 0xa58   :  { %v1962_v42 = vadd.f32 %v1961_v45, %v1779_v29  ;;  %v1806_v45 = vld [vmem:[%s6893_s1 + $0x650] sm:$0xff] }
 0xa5a   :  { %4473 = vmatprep.mubr.msk.f32.mxu1 %vm7097_vm11, %v1962_v42  ;;  %vm7113_vm11 = vmmov %vm7102_vm0 }
 0xa5f   :  { %v6361_v13 = vpop.f32.mrf.mxu0  ;;  %v6363_v21 = vpop.f32.mrf.mxu1 }
 0xa61   :  { %v6365_v10 = vpop.f32.mrf.mxu0  ;;  %v6367_v0 = vpop.f32.mrf.mxu1 }
 0xa63   :  { %v6369_v59 = vpop.f32.mrf.mxu0  ;;  %v6371_v5 = vpop.f32.mrf.mxu1 }
 0xa65   :  { %v6373_v31 = vpop.f32.mrf.mxu0  ;;  %v6375_v16 = vpop.f32.mrf.mxu1 }
 0xa67   :  { %v6377_v28 = vpop.f32.mrf.mxu0  ;;  %v6379_v26 = vpop.f32.mrf.mxu1 }
 0xa69   :  { %v6381_v36 = vpop.f32.mrf.mxu0  ;;  %v6383_v2 = vpop.f32.mrf.mxu1 }
 0xa6b   :  { %v4375_v7 = vpop.f32.mrf.mxu1 }
 0xa6c   :  { %v6385_v27 = vpop.f32.mrf.mxu0 }
 0xa6d   :  { %v2146_v61 = vpop.f32.mrf.mxu1 }
 0xa6e   :  { %v6387_v6 = vpop.f32.mrf.mxu0 }
 0xa6f   :  { %v4378_v24 = vpop.f32.mrf.mxu1 }
 0xa71   :  { %v6389_v39 = vpop.f32.mrf.mxu0  ;;  %v2156_v63 = vpop.f32.mrf.mxu1 }
 0xa73   :  { %v6391_v17 = vpop.f32.mrf.mxu0  ;;  %v4381_v1 = vpop.f32.mrf.mxu1 }
 0xa74   :  { %v2172_v55 = vadd.f32 %v4381_v1, %v1808_v20 }
 0xa75   :  { %v6393_v33 = vpop.f32.mrf.mxu0  ;;  %v2166_v56 = vpop.f32.mrf.mxu1 }
 0xa76   :  { %v2167_v29 = vadd.f32 %v2166_v56, %v1807_v43 }
 0xa77   :  { %v6398_v50 = vpop.f32.mrf.mxu0  ;;  %v4384_v23 = vpop.f32.mrf.mxu1 }
 0xa78   :  { %v2182_v8 = vadd.f32 %v4384_v23, %v1810_v22  ;;  %v2162_v22 = vadd.f32 %v4378_v24, %v1806_v45  ;;  %v1805_v23 = vld [vmem:[%s6893_s1 + $0x648] sm:$0xff]  ;;  %v1802_v45 = vld [vmem:[%s6893_s1 + $0x630] sm:$0xff] }
 0xa79   :  { %v6403_v12 = vpop.f32.mrf.mxu0  ;;  %v2176_v44 = vpop.f32.mrf.mxu1 }
 0xa7a   :  { %v2177_v52 = vadd.f32 %v2176_v44, %v1809_v37  ;;  %4441 = vmatprep.subr.msk.mxu1 %vm7098_vm12, %v2182_v8  ;;  %v1804_v44 = vld [vmem:[%s6893_s1 + $0x640] sm:$0xff]  ;;  %vm7114_vm12 = vmmov %vm7102_vm0 }
 0xa7b   :  { %v6409_v41 = vpop.f32.mrf.mxu0  ;;  %4442 = vmatpush3.xpose.msk.msra.mxu1 %vm7099_vm13, %v2182_v8  ;;  %v2157_v8 = vadd.f32 %v2156_v63, %v1805_v23  ;;  %v2152_v20 = vadd.f32 %v4375_v7, %v1804_v44  ;;  %v2142_v23 = vadd.f32 %v6379_v26, %v1802_v45  ;;  %vm7115_vm13 = vmmov %vm7102_vm0 }
 0xa7c   :  { %4443 = vmatprep.subr.msk.mxu1 %vm7100_vm14, %v2177_v52  ;;  %vm7116_vm14 = vmmov %vm7102_vm0 }
 0xa7d   :  { %v6413_v58 = vpop.f32.mrf.mxu0 }
 0xa7f   :  { %v6418_v46 = vpop.f32.mrf.mxu0  ;;  %4444 = vmatpush3.xpose.msk.msra.mxu1 %vm7101_vm15, %v2177_v52  ;;  %vm7117_vm15 = vmmov %vm7102_vm0 }
 0xa80   :  { %4445 = vmatprep.subr.msk.mxu1 %vm7102_vm0, %v2172_v55 }
 0xa81   :  { %v6422_v40 = vpop.f32.mrf.mxu0 }
 0xa83   :  { %v6427_v42 = vpop.f32.mrf.mxu0  ;;  %4446 = vmatpush3.xpose.msk.msra.mxu1 %vm7103_vm1, %v2172_v55  ;;  %v1803_v55 = vld [vmem:[%s6893_s1 + $0x638] sm:$0xff]  ;;  %vm7118_vm1 = vmmov %vm7102_vm0 }
 0xa84   :  { %4447 = vmatprep.subr.msk.mxu1 %vm7104_vm2, %v2167_v29  ;;  %vm7119_vm2 = vmmov %vm7102_vm0 }
 0xa85   :  { %v6431_v1 = vpop.f32.mrf.mxu0 }
 0xa87   :  { %v6436_v37 = vpop.f32.mrf.mxu0  ;;  %4448 = vmatpush3.xpose.msk.msra.mxu1 %vm7105_vm3, %v2167_v29  ;;  %v2147_v29 = vadd.f32 %v2146_v61, %v1803_v55  ;;  %v1826_v61 = vld [vmem:[%s6893_s1 + $0x6f0] sm:$0xff]  ;;  %vm7120_vm3 = vmmov %vm7102_vm0 }
 0xa88   :  { %4449 = vmatprep.subr.msk.mxu1 %vm7106_vm4, %v2162_v22  ;;  %vm7121_vm4 = vmmov %vm7102_vm0 }
 0xa89   :  { %v6440_v56 = vpop.f32.mrf.mxu0 }
 0xa8b   :  { %v6445_v52 = vpop.f32.mrf.mxu0  ;;  %4450 = vmatpush3.xpose.msk.msra.mxu1 %vm7107_vm5, %v2162_v22  ;;  %vm7122_vm5 = vmmov %vm7102_vm0 }
 0xa8c   :  { %4451 = vmatprep.subr.msk.mxu1 %vm7108_vm10, %v2157_v8  ;;  %vm7123_vm10 = vmmov %vm7102_vm0 }
 0xa8d   :  { %v4431_v24 = vpop.f32.mrf.mxu0 }
 0xa8f   :  { %v2291_v43 = vpop.f32.mrf.mxu0  ;;  %4452 = vmatpush3.xpose.msk.msra.mxu1 %vm7109_vm6, %v2157_v8  ;;  %v1801_v8 = vld [vmem:[%s6893_s1 + $0x628] sm:$0xff]  ;;  %vm7124_vm6 = vmmov %vm7102_vm0 }
 0xa90   :  { %4453 = vmatprep.subr.msk.mxu1 %vm7110_vm7, %v2152_v20  ;;  %v2137_v26 = vadd.f32 %v6383_v2, %v1801_v8  ;;  %v1823_v2 = vld [vmem:[%s6893_s1 + $0x6d8] sm:$0xff]  ;;  %v2132_v8 = vadd.f32 %v6371_v5, %v1800_v35  ;;  %v1821_v35 = vld [vmem:[%s6893_s1 + $0x6c8] sm:$0xff]  ;;  %vm7125_vm7 = vmmov %vm7102_vm0 }
 0xa91   :  { %v4434_v63 = vpop.f32.mrf.mxu0 }
 0xa93   :  { %v2301_v22 = vpop.f32.mrf.mxu0  ;;  %4454 = vmatpush3.xpose.msk.msra.mxu1 %vm7111_vm8, %v2152_v20  ;;  %v1825_v20 = vld [vmem:[%s6893_s1 + $0x6e8] sm:$0xff]  ;;  %vm7126_vm8 = vmmov %vm7102_vm0 }
 0xa94   :  { %4455 = vmatprep.subr.msk.mxu1 %vm7112_vm9, %v2147_v29  ;;  %vm7127_vm9 = vmmov %vm7102_vm0 }
 0xa95   :  { %v4437_v7 = vpop.f32.mrf.mxu0 }
 0xa97   :  { %v2311_v44 = vpop.f32.mrf.mxu0  ;;  %4456 = vmatpush3.xpose.msk.msra.mxu1 %vm7113_vm11, %v2147_v29  ;;  %vm7128_vm11 = vmmov %vm7102_vm0 }
 0xa98   :  { %4457 = vmatprep.subr.msk.mxu1 %vm7114_vm12, %v2142_v23  ;;  %vm7129_vm12 = vmmov %vm7102_vm0 }
 0xa99   :  { %v4440_v55 = vpop.f32.mrf.mxu0 }
 0xa9a   :  { %v2327_v45 = vadd.f32 %v4440_v55, %v1826_v61  ;;  %v2317_v61 = vadd.f32 %v4437_v7, %v1824_v47  ;;  %v1799_v55 = vld [vmem:[%s6893_s1 + $0x618] sm:$0xff]  ;;  %v1798_v7 = vld [vmem:[%s6893_s1 + $0x610] sm:$0xff] }
 0xa9b   :  { %v2321_v14 = vpop.f32.mrf.mxu0  ;;  %4458 = vmatpush3.xpose.msk.msra.mxu1 %vm7115_vm13, %v2142_v23  ;;  %v2312_v23 = vadd.f32 %v2311_v44, %v1823_v2  ;;  %v2127_v47 = vadd.f32 %v6375_v16, %v1799_v55  ;;  %v1820_v44 = vld [vmem:[%s6893_s1 + $0x6c0] sm:$0xff]  ;;  %v1819_v16 = vld [vmem:[%s6893_s1 + $0x6b8] sm:$0xff]  ;;  %vm7130_vm13 = vmmov %vm7102_vm0 }
 0xa9c   :  { %v2322_v29 = vadd.f32 %v2321_v14, %v1825_v20  ;;  %4497 = vmatprep.subr.mxu0 %v2327_v45  ;;  %4459 = vmatprep.subr.msk.mxu1 %vm7116_vm14, %v2137_v26  ;;  %v1822_v14 = vld [vmem:[%s6893_s1 + $0x6d0] sm:$0xff]  ;;  %v2302_v20 = vadd.f32 %v2301_v22, %v1821_v35  ;;  %vm7131_vm14 = vmmov %vm7102_vm0 }
 0xa9d   :  { %4498 = vmatpush3.msra.mxu0 %v2327_v45  ;;  %v2307_v5 = vadd.f32 %v4434_v63, %v1822_v14  ;;  %v2122_v63 = vadd.f32 %v6363_v21, %v1798_v7  ;;  %v1797_v45 = vld [vmem:[%s6893_s1 + $0x608] sm:$0xff]  ;;  %v1818_v22 = vld [vmem:[%s6893_s1 + $0x6b0] sm:$0xff]  ;;  %v1795_v14 = vld [vmem:[%s6893_s1 + $0x5f8] sm:$0xff] }
 0xa9e   :  { %4499 = vmatprep.subr.mxu0 %v2322_v29  ;;  %v1817_v21 = vld [vmem:[%s6893_s1 + $0x6a8] sm:$0xff]  ;;  %v2287_v2 = vadd.f32 %v6440_v56, %v1818_v22 }
 0xa9f   :  { %4500 = vmatpush3.msra.mxu0 %v2322_v29  ;;  %4460 = vmatpush3.xpose.msk.msra.mxu1 %vm7117_vm15, %v2137_v26  ;;  %v2297_v26 = vadd.f32 %v4431_v24, %v1820_v44  ;;  %v2292_v29 = vadd.f32 %v2291_v43, %v1819_v16  ;;  %v2117_v24 = vadd.f32 %v6367_v0, %v1797_v45  ;;  %v1816_v43 = vld [vmem:[%s6893_s1 + $0x6a0] sm:$0xff]  ;;  %v1815_v0 = vld [vmem:[%s6893_s1 + $0x698] sm:$0xff]  ;;  %vm7132_vm15 = vmmov %vm7102_vm0 }
 0xaa0   :  { %4501 = vmatprep.subr.mxu0 %v2317_v61  ;;  %4461 = vmatprep.subr.msk.mxu1 %vm7102_vm0, %v2132_v8  ;;  %v2277_v55 = vadd.f32 %v6431_v1, %v1816_v43  ;;  %v2107_v1 = vadd.f32 %v6359_v18, %v1795_v14  ;;  %v1811_v18 = vld [vmem:[%s6893_s1 + $0x678] sm:$0xff] }
 0xaa1   :  { %4502 = vmatpush3.msra.mxu0 %v2317_v61  ;;  %v2282_v61 = vadd.f32 %v6445_v52, %v1817_v21  ;;  %v1814_v52 = vld [vmem:[%s6893_s1 + $0x690] sm:$0xff]  ;;  %v2252_v44 = vadd.f32 %v6418_v46, %v1811_v18  ;;  %v1784_v46 = vld [vmem:[%s6893_s1 + $0x5a0] sm:$0xff] }
 0xaa2   :  { %4503 = vmatprep.subr.mxu0 %v2312_v23  ;;  %v2267_v35 = vadd.f32 %v6422_v40, %v1814_v52  ;;  %v1781_v40 = vld [vmem:[%s6893_s1 + $0x588] sm:$0xff] }
 0xaa3   :  { %4504 = vmatpush3.msra.mxu0 %v2312_v23  ;;  %4462 = vmatpush3.xpose.msk.msra.mxu1 %vm7118_vm1, %v2132_v8  ;;  %v1796_v8 = vld [vmem:[%s6893_s1 + $0x600] sm:$0xff]  ;;  %v2272_v23 = vadd.f32 %v6436_v37, %v1815_v0  ;;  %v1972_v16 = vadd.f32 %v6365_v10, %v1781_v40  ;;  %v1785_v10 = vld [vmem:[%s6893_s1 + $0x5a8] sm:$0xff]  ;;  %vm7133_vm1 = vmmov %vm7102_vm0 }
 0xaa4   :  { %4505 = vmatprep.subr.mxu0 %v2307_v5  ;;  %4463 = vmatprep.subr.msk.mxu1 %vm7119_vm2, %v2127_v47  ;;  %v2112_v56 = vadd.f32 %v6356_v34, %v1796_v8  ;;  %v1813_v34 = vld [vmem:[%s6893_s1 + $0x688] sm:$0xff]  ;;  %v1992_v45 = vadd.f32 %v6381_v36, %v1785_v10  ;;  %vm7134_vm2 = vmmov %vm7102_vm0 }
 0xaa5   :  { %4506 = vmatpush3.msra.mxu0 %v2307_v5  ;;  %v2262_v37 = vadd.f32 %v6427_v42, %v1813_v34  ;;  %v1780_v5 = vld [vmem:[%s6893_s1 + $0x580] sm:$0xff]  ;;  %v1789_v36 = vld [vmem:[%s6893_s1 + $0x5c8] sm:$0xff] }
 0xaa6   :  { %4507 = vmatprep.subr.mxu0 %v2302_v20  ;;  %v1967_v42 = vadd.f32 %v6351_v3, %v1780_v5 }
 0xaa7   :  { %4508 = vmatpush3.msra.mxu0 %v2302_v20  ;;  %4464 = vmatpush3.xpose.msk.msra.mxu1 %vm7120_vm3, %v2127_v47  ;;  %v1812_v47 = vld [vmem:[%s6893_s1 + $0x680] sm:$0xff]  ;;  %v1782_v20 = vld [vmem:[%s6893_s1 + $0x590] sm:$0xff]  ;;  %vm7135_vm3 = vmmov %vm7102_vm0 }
 0xaa8   :  { %4509 = vmatprep.subr.mxu0 %v2297_v26  ;;  %4465 = vmatprep.subr.msk.mxu1 %vm7121_vm4, %v2122_v63  ;;  %v2257_v7 = vadd.f32 %v6413_v58, %v1812_v47  ;;  %v1783_v58 = vld [vmem:[%s6893_s1 + $0x598] sm:$0xff]  ;;  %v1977_v3 = vadd.f32 %v6361_v13, %v1782_v20  ;;  %v1786_v13 = vld [vmem:[%s6893_s1 + $0x5b0] sm:$0xff]  ;;  %vm7136_vm4 = vmmov %vm7102_vm0 }
 0xaa9   :  { %4510 = vmatpush3.msra.mxu0 %v2297_v26  ;;  %v1987_v26 = vadd.f32 %v6369_v59, %v1784_v46  ;;  %v1997_v22 = vadd.f32 %v6377_v28, %v1786_v13  ;;  %v1788_v59 = vld [vmem:[%s6893_s1 + $0x5c0] sm:$0xff]  ;;  %v1790_v28 = vld [vmem:[%s6893_s1 + $0x5d0] sm:$0xff] }
 0xaaa   :  { %4511 = vmatprep.subr.mxu0 %v2292_v29  ;;  %v2007_v21 = vadd.f32 %v6385_v27, %v1788_v59  ;;  %v1792_v27 = vld [vmem:[%s6893_s1 + $0x5e0] sm:$0xff] }
 0xaab   :  { %4512 = vmatpush3.msra.mxu0 %v2292_v29  ;;  %4466 = vmatpush3.xpose.msk.msra.mxu1 %vm7122_vm5, %v2122_v63  ;;  %v1982_v63 = vadd.f32 %v6373_v31, %v1783_v58  ;;  %v1787_v31 = vld [vmem:[%s6893_s1 + $0x5b8] sm:$0xff]  ;;  %vm7137_vm5 = vmmov %vm7102_vm0  ;;  %v2027_v43 = vadd.f32 %v6393_v33, %v1792_v27 }
 0xaac   :  { %4513 = vmatprep.subr.mxu0 %v2287_v2  ;;  %4467 = vmatprep.subr.msk.mxu1 %vm7123_vm10, %v2117_v24  ;;  %v2002_v29 = vadd.f32 %v6387_v6, %v1787_v31  ;;  %v1791_v6 = vld [vmem:[%s6893_s1 + $0x5d8] sm:$0xff]  ;;  %vm7138_vm10 = vmmov %vm7102_vm0 }
 0xaad   :  { %4514 = vmatpush3.msra.mxu0 %v2287_v2  ;;  %v2017_v2 = vadd.f32 %v6389_v39, %v1790_v28  ;;  %v2022_v8 = vadd.f32 %v6398_v50, %v1791_v6  ;;  %v1794_v39 = vld [vmem:[%s6893_s1 + $0x5f0] sm:$0xff] }
 0xaae   :  { %4515 = vmatprep.subr.mxu0 %v2282_v61  ;;  %v2037_v50 = vadd.f32 %v6403_v12, %v1794_v39 }
 0xaaf   :  { %4516 = vmatpush3.msra.mxu0 %v2282_v61  ;;  %4468 = vmatpush3.xpose.msk.msra.mxu1 %vm7124_vm6, %v2117_v24  ;;  %v2012_v24 = vadd.f32 %v6391_v17, %v1789_v36  ;;  %v1793_v17 = vld [vmem:[%s6893_s1 + $0x5e8] sm:$0xff]  ;;  %vm7139_vm6 = vmmov %vm7102_vm0 }
 0xab0   :  { %4517 = vmatprep.subr.mxu0 %v2277_v55  ;;  %4469 = vmatprep.subr.msk.mxu1 %vm7125_vm7, %v2112_v56  ;;  %v2032_v61 = vadd.f32 %v6409_v41, %v1793_v17  ;;  %vm7140_vm7 = vmmov %vm7102_vm0 }
 0xab1   :  { %4518 = vmatpush3.msra.mxu0 %v2277_v55 }
 0xab2   :  { %4519 = vmatprep.subr.mxu0 %v2272_v23 }
 0xab3   :  { %4520 = vmatpush3.msra.mxu0 %v2272_v23  ;;  %4470 = vmatpush3.xpose.msk.msra.mxu1 %vm7126_vm8, %v2112_v56  ;;  %vm7141_vm8 = vmmov %vm7102_vm0 }
 0xab4   :  { %4521 = vmatprep.subr.mxu0 %v2267_v35  ;;  %4471 = vmatprep.subr.msk.mxu1 %vm7127_vm9, %v2107_v1  ;;  %vm7142_vm9 = vmmov %vm7102_vm0 }
 0xab5   :  { %4522 = vmatpush3.msra.mxu0 %v2267_v35 }
 0xab6   :  { %4523 = vmatprep.subr.mxu0 %v2262_v37 }
 0xab7   :  { %4524 = vmatpush3.msra.mxu0 %v2262_v37  ;;  %4472 = vmatpush3.xpose.msk.msra.mxu1 %vm7128_vm11, %v2107_v1  ;;  %vm7143_vm11 = vmmov %vm7102_vm0 }
 0xab8   :  { %4525 = vmatprep.subr.mxu0 %v2257_v7 }
 0xab9   :  { %4526 = vmatpush3.msra.mxu0 %v2257_v7 }
 0xaba   :  { %4527 = vmatprep.subr.mxu0 %v2252_v44  ;;  %4474 = vmatmul.mubr.msk.f32.vlgmr.msra.gmra.mxu1 %vm7129_vm12, %v1967_v42  ;;  %vm7145_vm12 = vmmov %vm7102_vm0 }
 0xabb   :  { %4528 = vmatpush3.msra.mxu0 %v2252_v44  ;;  %4476 = vmatprep.mubr.msk.f32.mxu1 %vm7130_vm13, %v1972_v16  ;;  %vm7147_vm13 = vmmov %vm7102_vm0 }
 0xabe   :  { %4477 = vmatmul.mubr.msk.f32.gmra.mxu1 %vm7131_vm14, %v1977_v3  ;;  %vm7149_vm14 = vmmov %vm7102_vm0 }
 0xabf   :  { %4479 = vmatprep.mubr.msk.f32.mxu1 %vm7132_vm15, %v1982_v63  ;;  %vm7150_vm15 = vmmov %vm7102_vm0 }
 0xac2   :  { %4480 = vmatmul.mubr.msk.f32.gmra.mxu1 %vm7102_vm0, %v1987_v26 }
 0xac3   :  { %4482 = vmatprep.mubr.msk.f32.mxu1 %vm7133_vm1, %v1992_v45  ;;  %vm7151_vm1 = vmmov %vm7102_vm0 }
 0xac6   :  { %4483 = vmatmul.mubr.msk.f32.gmra.mxu1 %vm7134_vm2, %v1997_v22  ;;  %vm7152_vm2 = vmmov %vm7102_vm0 }
 0xac7   :  { %4485 = vmatprep.mubr.msk.f32.mxu1 %vm7135_vm3, %v2002_v29  ;;  %vm7153_vm3 = vmmov %vm7102_vm0 }
 0xaca   :  { %4486 = vmatmul.mubr.msk.f32.gmra.mxu1 %vm7136_vm4, %v2007_v21  ;;  %vm7154_vm4 = vmmov %vm7102_vm0 }
 0xacb   :  { %4488 = vmatprep.mubr.msk.f32.mxu1 %vm7137_vm5, %v2012_v24  ;;  %vm7155_vm5 = vmmov %vm7102_vm0 }
 0xace   :  { %4489 = vmatmul.mubr.msk.f32.gmra.mxu1 %vm7138_vm10, %v2017_v2  ;;  %vm7156_vm10 = vmmov %vm7102_vm0 }
 0xacf   :  { %4491 = vmatprep.mubr.msk.f32.mxu1 %vm7139_vm6, %v2022_v8  ;;  %vm7157_vm6 = vmmov %vm7102_vm0 }
 0xad2   :  { %4492 = vmatmul.mubr.msk.f32.gmra.mxu1 %vm7140_vm7, %v2027_v43  ;;  %vm7158_vm7 = vmmov %vm7102_vm0 }
 0xad3   :  { %4494 = vmatprep.mubr.msk.f32.mxu1 %vm7141_vm8, %v2032_v61  ;;  %vm7159_vm8 = vmmov %vm7102_vm0 }
 0xad6   :  { %4495 = vmatmul.mubr.msk.f32.gmra.mxu1 %vm7142_vm9, %v2037_v50  ;;  %vm7160_vm9 = vmmov %vm7102_vm0 }
 0xb7a   :  { %v4475_v0 = vpop.f32.mrf.mxu1 }
 0xb7b   :  { %v2498_v56 = vadd.f32 %v4475_v0, %v5644_v51 }
 0xb7c   :  { %v2492_v55 = vpop.f32.mrf.mxu1 }
 0xb7d   :  { %v2493_v33 = vadd.f32 %v2492_v55, %v5647_v9  ;;  %2573 = vmax.xlane.f32.xlu1 %v2498_v56 }
 0xb7e   :  { %v4478_v14 = vpop.f32.mrf.mxu1 }
 0xb7f   :  { %2571 = vmax.xlane.f32.xlu0 %v2493_v33  ;;  %v2508_v41 = vadd.f32 %v4478_v14, %v5671_v11 }
 0xb80   :  { %v2502_v52 = vpop.f32.mrf.mxu1 }
 0xb81   :  { %v2503_v12 = vadd.f32 %v2502_v52, %v5660_v49 }
 0xb82   :  { %v4481_v23 = vpop.f32.mrf.mxu1 }
 0xb83   :  { %v2518_v34 = vadd.f32 %v4481_v23, %v5688_v32  ;;  %2577 = vmax.xlane.f32.xlu0 %v2508_v41 }
 0xb84   :  { %v2512_v1 = vpop.f32.mrf.mxu1 }
 0xb85   :  { %2581 = vmax.xlane.f32.xlu1 %v2518_v34  ;;  %v2513_v9 = vadd.f32 %v2512_v1, %v5674_v62 }
 0xb86   :  { %v4484_v35 = vpop.f32.mrf.mxu1 }
 0xb87   :  { %v2528_v51 = vadd.f32 %v4484_v35, %v5706_v4  ;;  %2575 = vmax.xlane.f32.xlu0 %v2503_v12 }
 0xb88   :  { %v2522_v47 = vpop.f32.mrf.mxu1 }
 0xb89   :  { %2585 = vmax.xlane.f32.xlu1 %v2528_v51  ;;  %v2523_v32 = vadd.f32 %v2522_v47, %v5691_v54 }
 0xb8a   :  { %v4487_v37 = vpop.f32.mrf.mxu1 }
 0xb8b   :  { %v2538_v5 = vadd.f32 %v4487_v37, %v5724_v57  ;;  %2579 = vmax.xlane.f32.xlu0 %v2513_v9 }
 0xb8c   :  { %v2532_v11 = vpop.f32.mrf.mxu1 }
 0xb8d   :  { %2589 = vmax.xlane.f32.xlu1 %v2538_v5  ;;  %v6649_v4 = vadd.f32 %v2532_v11, %v5709_v48 }
 0xb8e   :  { %v4490_v18 = vpop.f32.mrf.mxu1 }
 0xb8f   :  { %v6646_v49 = vadd.f32 %v4490_v18, %v5742_v60  ;;  %2583 = vmax.xlane.f32.xlu0 %v2523_v32 }
 0xb90   :  { %v2542_v40 = vpop.f32.mrf.mxu1 }
 0xb91   :  { %2593 = vmax.xlane.f32.xlu1 %v6646_v49  ;;  %v6657_v54 = vadd.f32 %v2542_v40, %v5727_v53 }
 0xb92   :  { %v4493_v62 = vpop.f32.mrf.mxu1 }
 0xb93   :  { %v6653_v7 = vadd.f32 %v4493_v62, %v5759_v30  ;;  %2587 = vmax.xlane.f32.xlu0 %v6649_v4 }
 0xb94   :  { %v2552_v57 = vpop.f32.mrf.mxu1 }
 0xb95   :  { %2597 = vmax.xlane.f32.xlu1 %v6653_v7  ;;  %v6665_v48 = vadd.f32 %v2552_v57, %v5745_v19 }
 0xb96   :  { %v4496_v60 = vpop.f32.mrf.mxu1 }
 0xb97   :  { %v6661_v42 = vadd.f32 %v4496_v60, %v5774_v38  ;;  %2591 = vmax.xlane.f32.xlu0 %v6657_v54 }
 0xb98   :  { %v2562_v30 = vpop.f32.mrf.mxu1 }
 0xb99   :  { %2601 = vmax.xlane.f32.xlu1 %v6661_v42  ;;  %v6670_v44 = vadd.f32 %v2562_v30, %v5762_v25 }
 0xb9b   :  { %2595 = vmax.xlane.f32.xlu0 %v6665_v48 }
 0xb9f   :  { %2599 = vmax.xlane.f32.xlu0 %v6670_v44 }
 0xc06   :  { %v2574_v53 = vpop.xlane.xlu1 %2573 }
 0xc07   :  { %v2604_v20 = vsub.f32 %v2498_v56, %v2574_v53 }
 0xc08   :  { %v2572_v16 = vpop.xlane.xlu0 %2571 }
 0xc09   :  { %v2621_v38 = vmul.f32 1.442695, %v2604_v20  ;;  %v2603_v58 = vsub.f32 %v2493_v33, %v2572_v16 }
 0xc0b   :  { %4702 = vpow2.f32 %v2621_v38  ;;  %v2619_v3 = vmul.f32 1.442695, %v2603_v58 }
 0xc0c   :  { %v2578_v46 = vpop.xlane.xlu0 %2577 }
 0xc0d   :  { %4704 = vpow2.f32 %v2619_v3  ;;  %v2606_v19 = vsub.f32 %v2508_v41, %v2578_v46 }
 0xc0e   :  { %v2582_v63 = vpop.xlane.xlu1 %2581 }
 0xc0f   :  { %v2625_v10 = vmul.f32 1.442695, %v2606_v19  ;;  %v2608_v26 = vsub.f32 %v2518_v34, %v2582_v63 }
 0xc10   :  { %v2576_v13 = vpop.xlane.xlu0 %2575 }
 0xc11   :  { %4706 = vpow2.f32 %v2625_v10  ;;  %v2629_v45 = vmul.f32 1.442695, %v2608_v26  ;;  %v2605_v25 = vsub.f32 %v2503_v12, %v2576_v13 }
 0xc12   :  { %v2586_v31 = vpop.xlane.xlu1 %2585 }
 0xc13   :  { %v2623_v22 = vmul.f32 1.442695, %v2605_v25  ;;  %v2610_v59 = vsub.f32 %v2528_v51, %v2586_v31  ;;  %4708 = vpow2.f32 %v2629_v45 }
 0xc14   :  { %v2580_v29 = vpop.xlane.xlu0 %2579 }
 0xc15   :  { %4710 = vpow2.f32 %v2623_v22  ;;  %v2633_v36 = vmul.f32 1.442695, %v2610_v59  ;;  %v2607_v21 = vsub.f32 %v2513_v9, %v2580_v29 }
 0xc16   :  { %v2590_v28 = vpop.xlane.xlu1 %2589 }
 0xc17   :  { %v2627_v24 = vmul.f32 1.442695, %v2607_v21  ;;  %v2612_v6 = vsub.f32 %v2538_v5, %v2590_v28  ;;  %4712 = vpow2.f32 %v2633_v36 }
 0xc18   :  { %v6673_v2 = vpop.eup %4702  ;;  %v2584_v27 = vpop.xlane.xlu0 %2583 }
 0xc19   :  { %4714 = vpow2.f32 %v2627_v24  ;;  %v2637_v8 = vmul.f32 1.442695, %v2612_v6  ;;  %v2609_v17 = vsub.f32 %v2523_v32, %v2584_v27  ;;  %2653 = vadd.xlane.f32.xlu1 %v6673_v2 }
 0xc1a   :  { %v6676_v43 = vpop.eup %4704  ;;  %v2594_v39 = vpop.xlane.xlu1 %2593 }
 0xc1b   :  { %v2631_v61 = vmul.f32 1.442695, %v2609_v17  ;;  %v2614_v50 = vsub.f32 %v6646_v49, %v2594_v39  ;;  %2651 = vadd.xlane.f32.xlu0 %v6676_v43  ;;  %4716 = vpow2.f32 %v2637_v8 }
 0xc1c   :  { %v2588_v0 = vpop.xlane.xlu0 %2587 }
 0xc1d   :  { %4718 = vpow2.f32 %v2631_v61  ;;  %v2641_v56 = vmul.f32 1.442695, %v2614_v50  ;;  %v2611_v55 = vsub.f32 %v6649_v4, %v2588_v0 }
 0xc1e   :  { %v6681_v33 = vpop.eup %4706  ;;  %v2598_v14 = vpop.xlane.xlu1 %2597 }
 0xc1f   :  { %v2635_v52 = vmul.f32 1.442695, %v2611_v55  ;;  %v2616_v41 = vsub.f32 %v6653_v7, %v2598_v14  ;;  %2657 = vadd.xlane.f32.xlu1 %v6681_v33  ;;  %4720 = vpow2.f32 %v2641_v56 }
 0xc20   :  { %v2592_v23 = vpop.xlane.xlu0 %2591  ;;  %v6685_v34 = vpop.eup %4708 }
 0xc21   :  { %4722 = vpow2.f32 %v2635_v52  ;;  %v2645_v1 = vmul.f32 1.442695, %v2616_v41  ;;  %v2613_v12 = vsub.f32 %v6657_v54, %v2592_v23 }
 0xc22   :  { %v6688_v35 = vpop.eup %4710  ;;  %v2602_v51 = vpop.xlane.xlu1 %2601 }
 0xc23   :  { %v2639_v47 = vmul.f32 1.442695, %v2613_v12  ;;  %v2618_v9 = vsub.f32 %v6661_v42, %v2602_v51  ;;  %2661 = vadd.xlane.f32.xlu1 %v6685_v34  ;;  %2655 = vadd.xlane.f32.xlu0 %v6688_v35  ;;  %4724 = vpow2.f32 %v2645_v1 }
 0xc24   :  { %v2596_v37 = vpop.xlane.xlu0 %2595  ;;  %v6693_v5 = vpop.eup %4712 }
 0xc25   :  { %4726 = vpow2.f32 %v2639_v47  ;;  %v2649_v11 = vmul.f32 1.442695, %v2618_v9  ;;  %v2615_v32 = vsub.f32 %v6665_v48, %v2596_v37 }
 0xc26   :  { %v6696_v18 = vpop.eup %4714 }
 0xc27   :  { %v2643_v49 = vmul.f32 1.442695, %v2615_v32  ;;  %2665 = vadd.xlane.f32.xlu1 %v6693_v5  ;;  %2659 = vadd.xlane.f32.xlu0 %v6696_v18  ;;  %4728 = vpow2.f32 %v2649_v11 }
 0xc28   :  { %v2600_v40 = vpop.xlane.xlu0 %2599  ;;  %v6700_v4 = vpop.eup %4716 }
 0xc29   :  { %4730 = vpow2.f32 %v2643_v49  ;;  %v2617_v62 = vsub.f32 %v6670_v44, %v2600_v40 }
 0xc2a   :  { %v6703_v7 = vpop.eup %4718 }
 0xc2b   :  { %v2647_v57 = vmul.f32 1.442695, %v2617_v62  ;;  %2669 = vadd.xlane.f32.xlu1 %v6700_v4  ;;  %2663 = vadd.xlane.f32.xlu0 %v6703_v7 }
 0xc2c   :  { %v6707_v54 = vpop.eup %4720 }
 0xc2d   :  { %4732 = vpow2.f32 %v2647_v57 }
 0xc2e   :  { %v6709_v60 = vpop.eup %4722 }
 0xc2f   :  { %2673 = vadd.xlane.f32.xlu1 %v6707_v54  ;;  %2667 = vadd.xlane.f32.xlu0 %v6709_v60 }
 0xc30   :  { %v6713_v42 = vpop.eup %4724 }
 0xc32   :  { %v6715_v48 = vpop.eup %4726 }
 0xc33   :  { %2677 = vadd.xlane.f32.xlu1 %v6713_v42  ;;  %2671 = vadd.xlane.f32.xlu0 %v6715_v48 }
 0xc34   :  { %v6719_v30 = vpop.eup %4728 }
 0xc36   :  { %v6721_v44 = vpop.eup %4730 }
 0xc37   :  { %2681 = vadd.xlane.f32.xlu1 %v6719_v30  ;;  %2675 = vadd.xlane.f32.xlu0 %v6721_v44 }
 0xc3a   :  { %v6725_v53 = vpop.eup %4732 }
 0xc3b   :  { %2679 = vadd.xlane.f32.xlu0 %v6725_v53 }
 0xca2   :  { %v2654_v20 = vpop.xlane.xlu1 %2653 }
 0xca3   :  { %4734 = vrcp.f32 %v2654_v20 }
 0xca4   :  { %v2652_v16 = vpop.xlane.xlu0 %2651 }
 0xca5   :  { %4736 = vrcp.f32 %v2652_v16 }
 0xca8   :  { %v2658_v38 = vpop.xlane.xlu1 %2657 }
 0xca9   :  { %4738 = vrcp.f32 %v2658_v38 }
 0xcac   :  { %v2662_v58 = vpop.xlane.xlu1 %2661  ;;  %v2656_v3 = vpop.xlane.xlu0 %2655 }
 0xcad   :  { %4740 = vrcp.f32 %v2656_v3 }
 0xcae   :  { %4742 = vrcp.f32 %v2662_v58 }
 0xcb0   :  { %v2666_v46 = vpop.xlane.xlu1 %2665  ;;  %v2660_v19 = vpop.xlane.xlu0 %2659 }
 0xcb1   :  { %v4735_v63 = vpop.eup %4734  ;;  %4744 = vrcp.f32 %v2660_v19 }
 0xcb2   :  { %v4737_v10 = vpop.eup %4736  ;;  %v2716_v25 = vmul.f32 %v4735_v63, %v6673_v2  ;;  %4746 = vrcp.f32 %v2666_v46 }
 0xcb3   :  { %v2715_v26 = vmul.f32 %v4737_v10, %v6676_v43 }
 0xcb4   :  { %v2670_v13 = vpop.xlane.xlu1 %2669  ;;  %v2664_v45 = vpop.xlane.xlu0 %2663 }
 0xcb5   :  { %4529 = vmatprep.mubr.f32.mxu0 %v2715_v26  ;;  %4748 = vrcp.f32 %v2664_v45 }
 0xcb6   :  { %4530 = vmatmul.mubr.f32.vlgmr.msra.gmra.mxu0 %v2716_v25  ;;  %4750 = vrcp.f32 %v2670_v13  ;;  %v4739_v59 = vpop.eup %4738 }
 0xcb7   :  { %v2718_v24 = vmul.f32 %v4739_v59, %v6681_v33 }
 0xcb8   :  { %v2674_v31 = vpop.xlane.xlu1 %2673  ;;  %v2668_v22 = vpop.xlane.xlu0 %2667 }
 0xcb9   :  { %4752 = vrcp.f32 %v2668_v22 }
 0xcba   :  { %v4741_v29 = vpop.eup %4740  ;;  %4754 = vrcp.f32 %v2674_v31 }
 0xcbb   :  { %v2717_v28 = vmul.f32 %v4741_v29, %v6688_v35  ;;  %v4743_v6 = vpop.eup %4742 }
 0xcbc   :  { %v2678_v36 = vpop.xlane.xlu1 %2677  ;;  %v2672_v21 = vpop.xlane.xlu0 %2671  ;;  %v2720_v43 = vmul.f32 %v4743_v6, %v6685_v34 }
 0xcbd   :  { %4756 = vrcp.f32 %v2672_v21  ;;  %4532 = vmatprep.mubr.f32.mxu0 %v2717_v28  ;;  %v7144_v28 = vld [vmem:[#allocation18_spill] sm:$0xff] }
 0xcbe   :  { %v4745_v2 = vpop.eup %4744  ;;  %4533 = vmatmul.mubr.f32.gmra.mxu0 %v2718_v24  ;;  %4758 = vrcp.f32 %v2678_v36 }
 0xcbf   :  { %v2719_v8 = vmul.f32 %v4745_v2, %v6696_v18  ;;  %v4747_v39 = vpop.eup %4746 }
 0xcc0   :  { %v2676_v27 = vpop.xlane.xlu0 %2675  ;;  %v2682_v17 = vpop.xlane.xlu1 %2681  ;;  %v2722_v56 = vmul.f32 %v4747_v39, %v6693_v5 }
 0xcc1   :  { %4760 = vrcp.f32 %v2676_v27  ;;  %4535 = vmatprep.mubr.f32.mxu0 %v2719_v8  ;;  %v7146_v27 = vld [vmem:[#allocation2_spill] sm:$0xff] }
 0xcc2   :  { %v4749_v61 = vpop.eup %4748  ;;  %4536 = vmatmul.mubr.f32.gmra.mxu0 %v2720_v43  ;;  %4762 = vrcp.f32 %v2682_v17  ;;  %v7148_v43 = vld [vmem:[#allocation3_spill] sm:$0xff] }
 0xcc3   :  { %v2721_v0 = vmul.f32 %v4749_v61, %v6703_v7  ;;  %v4751_v55 = vpop.eup %4750  ;;  %v2974_v61 = vld [vmem:[%s6894_s2 + $0x40] sm:$0xff] }
 0xcc4   :  { %v2680_v50 = vpop.xlane.xlu0 %2679  ;;  %v2724_v52 = vmul.f32 %v4751_v55, %v6700_v4  ;;  %4553 = vmatprep.subr.mxu0 %v2974_v61 }
 0xcc5   :  { %4764 = vrcp.f32 %v2680_v50  ;;  %4538 = vmatprep.mubr.f32.mxu0 %v2721_v0  ;;  %4554 = vmatpush3.msra.mxu0 %v2974_v61 }
 0xcc6   :  { %v4753_v33 = vpop.eup %4752  ;;  %4539 = vmatmul.mubr.f32.gmra.mxu0 %v2722_v56 }
 0xcc7   :  { %v2723_v14 = vmul.f32 %v4753_v33, %v6709_v60  ;;  %v4755_v41 = vpop.eup %4754 }
 0xcc8   :  { %v2726_v1 = vmul.f32 %v4755_v41, %v6707_v54 }
 0xcc9   :  { %4541 = vmatprep.mubr.f32.mxu0 %v2723_v14 }
 0xcca   :  { %v4757_v23 = vpop.eup %4756  ;;  %4542 = vmatmul.mubr.f32.gmra.mxu0 %v2724_v52 }
 0xccb   :  { %v2725_v34 = vmul.f32 %v4757_v23, %v6715_v48  ;;  %v4759_v12 = vpop.eup %4758 }
 0xccc   :  { %v2728_v9 = vmul.f32 %v4759_v12, %v6713_v42 }
 0xccd   :  { %4544 = vmatprep.mubr.f32.mxu0 %v2725_v34 }
 0xcce   :  { %v4761_v35 = vpop.eup %4760  ;;  %4545 = vmatmul.mubr.f32.gmra.mxu0 %v2726_v1 }
 0xccf   :  { %v2727_v51 = vmul.f32 %v4761_v35, %v6721_v44  ;;  %v4763_v47 = vpop.eup %4762 }
 0xcd0   :  { %v2730_v11 = vmul.f32 %v4763_v47, %v6719_v30  ;;  %v3543_v30 = vld [vmem:[%s6893_s1 + $0x6f8] ss:$0 sm:$0xff] }
 0xcd1   :  { %4547 = vmatprep.mubr.f32.mxu0 %v2727_v51 }
 0xcd2   :  { %v4765_v37 = vpop.eup %4764  ;;  %4548 = vmatmul.mubr.f32.gmra.mxu0 %v2728_v9 }
 0xcd3   :  { %v2729_v5 = vmul.f32 %v4765_v37, %v6725_v53 }
 0xcd5   :  { %4550 = vmatprep.mubr.f32.mxu0 %v2729_v5 }
 0xcd6   :  { %4551 = vmatmul.mubr.f32.gmra.mxu0 %v2730_v11 }
 0xd76   :  { %v4531_v32 = vpop.f32.mrf.mxu0 }
 0xd78   :  { %v2797_v18 = vpop.f32.mrf.mxu0 }
 0xd7e   :  { %v4534_v49 = vpop.f32.mrf.mxu0 }
 0xd80   :  { %v2807_v40 = vpop.f32.mrf.mxu0 }
 0xd82   :  { %v4537_v4 = vpop.f32.mrf.mxu0 }
 0xd83   :  { %v2877_v48 = vadd.f32 %v4537_v4, %v4531_v32  ;;  %v3096_v4 = vld [vmem:[%s6893_s1 + $0x798] sm:$0xff] }
 0xd84   :  { %v2817_v62 = vpop.f32.mrf.mxu0  ;;  %4567 = vmatprep.subr.mxu1 %v3096_v4 }
 0xd85   :  { %v2876_v20 = vadd.f32 %v2817_v62, %v2797_v18  ;;  %v2973_v18 = vld [vmem:[%s6894_s2 + $0x38] sm:$0xff]  ;;  %v3095_v62 = vld [vmem:[%s6893_s1 + $0x790] sm:$0xff]  ;;  %4568 = vmatpush3.msra.mxu1 %v3096_v4 }
 0xd86   :  { %v4540_v7 = vpop.f32.mrf.mxu0  ;;  %4555 = vmatprep.subr.mxu0 %v2973_v18  ;;  %4569 = vmatprep.subr.mxu1 %v3095_v62 }
 0xd87   :  { %v2879_v38 = vadd.f32 %v4540_v7, %v4534_v49  ;;  %v2972_v49 = vld [vmem:[%s6894_s2 + $0x30] sm:$0xff]  ;;  %4556 = vmatpush3.msra.mxu0 %v2973_v18  ;;  %v3094_v7 = vld [vmem:[%s6893_s1 + $0x788] sm:$0xff]  ;;  %4570 = vmatpush3.msra.mxu1 %v3095_v62 }
 0xd88   :  { %v2827_v57 = vpop.f32.mrf.mxu0  ;;  %4557 = vmatprep.subr.mxu0 %v2972_v49  ;;  %4571 = vmatprep.subr.mxu1 %v3094_v7 }
 0xd89   :  { %v2878_v19 = vadd.f32 %v2827_v57, %v2807_v40  ;;  %v2971_v40 = vld [vmem:[%s6894_s2 + $0x28] sm:$0xff]  ;;  %4558 = vmatpush3.msra.mxu0 %v2972_v49  ;;  %v3093_v57 = vld [vmem:[%s6893_s1 + $0x780] sm:$0xff]  ;;  %4572 = vmatpush3.msra.mxu1 %v3094_v7 }
 0xd8a   :  { %v4543_v54 = vpop.f32.mrf.mxu0  ;;  %4559 = vmatprep.subr.mxu0 %v2971_v40  ;;  %4573 = vmatprep.subr.mxu1 %v3093_v57 }
 0xd8b   :  { %v2881_v16 = vadd.f32 %v4543_v54, %v2877_v48  ;;  %4560 = vmatpush3.msra.mxu0 %v2971_v40  ;;  %v3092_v54 = vld [vmem:[%s6893_s1 + $0x778] sm:$0xff]  ;;  %4574 = vmatpush3.msra.mxu1 %v3093_v57  ;;  %v3089_v48 = vld [vmem:[%s6893_s1 + $0x760] sm:$0xff] }
 0xd8c   :  { %v2837_v60 = vpop.f32.mrf.mxu0  ;;  %4575 = vmatprep.subr.mxu1 %v3092_v54 }
 0xd8d   :  { %v2880_v58 = vadd.f32 %v2876_v20, %v2837_v60  ;;  %v3091_v60 = vld [vmem:[%s6893_s1 + $0x770] sm:$0xff]  ;;  %4576 = vmatpush3.msra.mxu1 %v3092_v54 }
 0xd8e   :  { %v4546_v42 = vpop.f32.mrf.mxu0  ;;  %4577 = vmatprep.subr.mxu1 %v3091_v60  ;;  %v3087_v20 = vld [vmem:[%s6893_s1 + $0x750] sm:$0xff] }
 0xd8f   :  { %v2883_v63 = vadd.f32 %v4546_v42, %v2879_v38  ;;  %v3090_v42 = vld [vmem:[%s6893_s1 + $0x768] sm:$0xff]  ;;  %4578 = vmatpush3.msra.mxu1 %v3091_v60 }
 0xd90   :  { %v2847_v44 = vpop.f32.mrf.mxu0  ;;  %4579 = vmatprep.subr.mxu1 %v3090_v42 }
 0xd91   :  { %v2882_v45 = vadd.f32 %v2878_v19, %v2847_v44  ;;  %4580 = vmatpush3.msra.mxu1 %v3090_v42  ;;  %v3088_v44 = vld [vmem:[%s6893_s1 + $0x758] sm:$0xff] }
 0xd92   :  { %v4549_v53 = vpop.f32.mrf.mxu0  ;;  %4581 = vmatprep.subr.mxu1 %v3089_v48 }
 0xd93   :  { %v2885_v3 = vadd.f32 %v4549_v53, %v2881_v16  ;;  %4582 = vmatpush3.msra.mxu1 %v3089_v48  ;;  %v3086_v16 = vld [vmem:[%s6893_s1 + $0x748] sm:$0xff]  ;;  %v3085_v53 = vld [vmem:[%s6893_s1 + $0x740] sm:$0xff] }
 0xd94   :  { %v2857_v46 = vpop.f32.mrf.mxu0  ;;  %4583 = vmatprep.subr.mxu1 %v3088_v44 }
 0xd95   :  { %v2894_v10 = vadd.f32 %v3543_v30, %v2885_v3  ;;  %v2884_v26 = vadd.f32 %v2880_v58, %v2857_v46  ;;  %4584 = vmatpush3.msra.mxu1 %v3088_v44 }
 0xd96   :  { %v4552_v13 = vpop.f32.mrf.mxu0  ;;  %4585 = vmatprep.subr.mxu1 %v3087_v20 }
 0xd97   :  { %v2893_v25 = vadd.f32 %v3543_v30, %v2884_v26  ;;  %v2887_v31 = vadd.f32 %v4552_v13, %v2883_v63  ;;  %v2898_v22 = vadd.f32 %v2894_v10, %v6095_v15  ;;  %4586 = vmatpush3.msra.mxu1 %v3087_v20 }
 0xd98   :  { %v2867_v59 = vpop.f32.mrf.mxu0  ;;  %4587 = vmatprep.subr.mxu1 %v3086_v16 }
 0xd99   :  { %v2896_v29 = vadd.f32 %v3543_v30, %v2887_v31  ;;  %v2886_v36 = vadd.f32 %v2882_v45, %v2867_v59  ;;  %v2906_v21 = vsel %vm7143_vm11, %v2898_v22, 0.0  ;;  %v2897_v24 = vadd.f32 %v2893_v25, %v7144_v28  ;;  %4588 = vmatpush3.msra.mxu1 %v3086_v16  ;;  %vm7161_vm11 = vmmov %vm7102_vm0 }
 0xd9a   :  { %2907 = vadd.xlane.f32.xlu1 %v2906_v21  ;;  %4589 = vmatprep.subr.mxu1 %v3085_v53 }
 0xd9b   :  { %v2895_v6 = vadd.f32 %v3543_v30, %v2886_v36  ;;  %v2903_v2 = vsel %vm7145_vm12, %v2897_v24, 0.0  ;;  %v2900_v8 = vadd.f32 %v2896_v29, %v7146_v27  ;;  %v3084_v30 = vld [vmem:[%s6893_s1 + $0x738] sm:$0xff]  ;;  %4590 = vmatpush3.msra.mxu1 %v3085_v53  ;;  %v3544_v29 = vld [vmem:[%s6893_s1 + $0x700] ss:$0 sm:$0xff]  ;;  %vm7162_vm12 = vmmov %vm7102_vm0 }
 0xd9c   :  { %2904 = vadd.xlane.f32.xlu0 %v2903_v2  ;;  %4591 = vmatprep.subr.mxu1 %v3084_v30 }
 0xd9d   :  { %v2912_v17 = vsel %vm7147_vm13, %v2900_v8, 0.0  ;;  %v2899_v39 = vadd.f32 %v2895_v6, %v7148_v43  ;;  %4592 = vmatpush3.msra.mxu1 %v3084_v30  ;;  %v3545_v6 = vld [vmem:[%s6893_s1 + $0x708] ss:$0 sm:$0xff]  ;;  %vm7163_vm13 = vmmov %vm7102_vm0 }
 0xd9e   :  { %2913 = vadd.xlane.f32.xlu1 %v2912_v17 }
 0xd9f   :  { %v2909_v15 = vsel %vm7149_vm14, %v2899_v39, 0.0  ;;  %vm7164_vm14 = vmmov %vm7102_vm0 }
 0xda0   :  { %2910 = vadd.xlane.f32.xlu0 %v2909_v15 }
 0xe23   :  { %v2908_v50 = vpop.xlane.xlu1 %2907 }
 0xe24   :  { %v2916_v0 = vmul.f32 0.03125, %v2908_v50 }
 0xe25   :  { %v2905_v56 = vpop.xlane.xlu0 %2904 }
 0xe26   :  { %v6758_v55 = vsub.f32 %v2898_v22, %v2916_v0  ;;  %v2915_v33 = vmul.f32 0.03125, %v2905_v56  ;;  %v3083_v56 = vld [vmem:[%s6893_s1 + $0x730] sm:$0xff] }
 0xe27   :  { %v2914_v14 = vpop.xlane.xlu1 %2913  ;;  %4593 = vmatprep.subr.mxu1 %v3083_v56 }
 0xe28   :  { %v6760_v52 = vsub.f32 %v2897_v24, %v2915_v33  ;;  %v2918_v41 = vmul.f32 0.03125, %v2914_v14  ;;  %v2924_v23 = vmul.f32 %v6758_v55, %v6758_v55  ;;  %4594 = vmatpush3.msra.mxu1 %v3083_v56  ;;  %v3081_v33 = vld [vmem:[%s6893_s1 + $0x720] sm:$0xff]  ;;  %v3546_v14 = vld [vmem:[%s6894_s2 + $0x48] ss:$0 sm:$0xff] }
 0xe29   :  { %v2911_v34 = vpop.xlane.xlu0 %2910 }
 0xe2a   :  { %v6764_v1 = vsub.f32 %v2900_v8, %v2918_v41  ;;  %v2917_v12 = vmul.f32 0.03125, %v2911_v34  ;;  %v2930_v35 = vsel %vm7150_vm15, %v2924_v23, 0.0  ;;  %v2923_v51 = vmul.f32 %v6760_v52, %v6760_v52 }
 0xe2b   :  { %2931 = vadd.xlane.f32.xlu1 %v2930_v35  ;;  %vm4793_vm15 = vmmov 0  }
 0xe2c   :  { %v6769_v47 = vsub.f32 %v2899_v39, %v2917_v12  ;;  %v2927_v9 = vsel %vm7102_vm0, %v2923_v51, 0.0  ;;  %v2926_v37 = vmul.f32 %v6764_v1, %v6764_v1 }
 0xe2d   :  { %2928 = vadd.xlane.f32.xlu0 %v2927_v9 }
 0xe2e   :  { %v2936_v5 = vsel %vm7151_vm1, %v2926_v37, 0.0  ;;  %v2925_v11 = vmul.f32 %v6769_v47, %v6769_v47  ;;  %vm7165_vm1 = vmmov %vm7102_vm0 }
 0xe2f   :  { %2937 = vadd.xlane.f32.xlu1 %v2936_v5 }
 0xe30   :  { %v2933_v32 = vsel %vm7152_vm2, %v2925_v11, 0.0  ;;  %vm7166_vm2 = vmmov %vm7102_vm0 }
 0xe31   :  { %2934 = vadd.xlane.f32.xlu0 %v2933_v32  ;;  %v3551_v32 = vld [vmem:[%s6893_s1 + $0x7a0] ss:$0 sm:$0xff] }
 0xeb4   :  { %v2932_v38 = vpop.xlane.xlu1 %2931 }
 0xeb5   :  { %v2940_v58 = vmul.f32 0.03125, %v2932_v38 }
 0xeb6   :  { %v2929_v3 = vpop.xlane.xlu0 %2928 }
 0xeb7   :  { %v2944_v46 = vadd.f32 1e-05, %v2940_v58  ;;  %v2939_v19 = vmul.f32 0.03125, %v2929_v3 }
 0xeb8   :  { %v2938_v63 = vpop.xlane.xlu1 %2937 }
 0xeb9   :  { %4766 = vrsqrt.f32 %v2944_v46  ;;  %v2943_v10 = vadd.f32 1e-05, %v2939_v19  ;;  %v2942_v26 = vmul.f32 0.03125, %v2938_v63 }
 0xeba   :  { %v2935_v13 = vpop.xlane.xlu0 %2934 }
 0xebb   :  { %4768 = vrsqrt.f32 %v2943_v10  ;;  %v2946_v45 = vadd.f32 1e-05, %v2942_v26  ;;  %v2941_v25 = vmul.f32 0.03125, %v2935_v13 }
 0xebd   :  { %4770 = vrsqrt.f32 %v2946_v45  ;;  %v2945_v31 = vadd.f32 1e-05, %v2941_v25 }
 0xebf   :  { %4772 = vrsqrt.f32 %v2945_v31 }
 0xec6   :  { %v4767_v22 = vpop.eup %4766 }
 0xec7   :  { %v2952_v59 = vmul.f32 %v4767_v22, %v6758_v55  ;;  %v3082_v55 = vld [vmem:[%s6893_s1 + $0x728] sm:$0xff] }
 0xec8   :  { %v4769_v36 = vpop.eup %4768  ;;  %4595 = vmatprep.subr.mxu1 %v3082_v55 }
 0xec9   :  { %v2951_v21 = vmul.f32 %v4769_v36, %v6760_v52  ;;  %v2960_v24 = vmul.f32 %v3544_v29, %v2952_v59  ;;  %4596 = vmatpush3.msra.mxu1 %v3082_v55 }
 0xeca   :  { %v4771_v28 = vpop.eup %4770  ;;  %4597 = vmatprep.subr.mxu1 %v3081_v33 }
 0xecb   :  { %v2959_v2 = vmul.f32 %v3544_v29, %v2951_v21  ;;  %v2954_v27 = vmul.f32 %v4771_v28, %v6764_v1  ;;  %v2968_v39 = vadd.f32 %v3545_v6, %v2960_v24  ;;  %4598 = vmatpush3.msra.mxu1 %v3081_v33 }
 0xecc   :  { %v4773_v8 = vpop.eup %4772 }
 0xecd   :  { %v2967_v17 = vadd.f32 %v3545_v6, %v2959_v2  ;;  %v2953_v43 = vmul.f32 %v4773_v8, %v6769_v47  ;;  %v2962_v15 = vmul.f32 %v3544_v29, %v2954_v27 }
 0xecf   :  { %4561 = vmatprep.mubr.msk.f32.mxu0 %vm7153_vm3, %v2967_v17  ;;  %v2961_v61 = vmul.f32 %v3544_v29, %v2953_v43  ;;  %v2970_v0 = vadd.f32 %v3545_v6, %v2962_v15  ;;  %vm7167_vm3 = vmmov %vm7102_vm0 }
 0xed0   :  { %4562 = vmatmul.mubr.msk.f32.vlgmr.msra.gmra.mxu0 %vm7154_vm4, %v2968_v39  ;;  %vm7168_vm4 = vmmov %vm7102_vm0 }
 0xed1   :  { %v2969_v50 = vadd.f32 %v3545_v6, %v2961_v61  ;;  %v4792_v6 = vmov 0.0  }
 0xed2   :  { %4605 = vmatprep.subr.mxu0 %v4792_v6 }
 0xed3   :  { %4564 = vmatprep.mubr.msk.f32.mxu0 %vm7155_vm5, %v2969_v50 }
 0xed4   :  { %4565 = vmatmul.mubr.msk.f32.gmra.mxu0 %vm7156_vm10, %v2970_v0  ;;  %vm3363_vm10 = vcmask 253952  }
 0xed5   :  { %4613 = vmatprep.mubr.msk.f32.mxu0 %vm4793_vm15, %v4792_v6 }
 0xf90   :  { %v4563_v52 = vpop.f32.mrf.mxu0 }
 0xf91   :  { %v3064_v41 = vadd.f32 %v4563_v52, %v3546_v14 }
 0xf92   :  { %v3058_v23 = vpop.f32.mrf.mxu0 }
 0xf93   :  { %v3059_v34 = vadd.f32 %v3546_v14, %v3058_v23  ;;  %v3078_v35 = vmax.f32 %v3064_v41, 0.0  ;;  %v3553_v23 = vld [vmem:[%s6893_s1 + $0x718] ss:$0 sm:$0xff] }
 0xf94   :  { %v4566_v1 = vpop.f32.mrf.mxu0 }
 0xf95   :  { %v3077_v12 = vmax.f32 %v3059_v34, 0.0  ;;  %v3074_v51 = vadd.f32 %v4566_v1, %v3546_v14 }
 0xf96   :  { %v3068_v47 = vpop.f32.mrf.mxu0 }
 0xf97   :  { %v3069_v9 = vadd.f32 %v3546_v14, %v3068_v47  ;;  %4599 = vmatprep.mubr.f32.mxu1 %v3077_v12  ;;  %v3080_v5 = vmax.f32 %v3074_v51, 0.0  ;;  %v3552_v14 = vld [vmem:[%s6893_s1 + $0x710] ss:$0 sm:$0xff] }
 0xf98   :  { %4600 = vmatmul.mubr.f32.vlgmr.msra.gmra.mxu1 %v3078_v35 }
 0xf99   :  { %v3079_v37 = vmax.f32 %v3069_v9, 0.0 }
 0xf9b   :  { %4602 = vmatprep.mubr.f32.mxu1 %v3079_v37 }
 0xf9c   :  { %4603 = vmatmul.mubr.f32.gmra.mxu1 %v3080_v5 }
0x1058   :  { %v4601_v11 = vpop.f32.mrf.mxu1 }
0x1059   :  { %v3174_v40 = vadd.f32 %v4601_v11, %v3551_v32 }
0x105a   :  { %v3168_v18 = vpop.f32.mrf.mxu1 }
0x105b   :  { %v3169_v7 = vadd.f32 %v3551_v32, %v3168_v18  ;;  %v3188_v60 = vadd.f32 %v3174_v40, %v2968_v39 }
0x105c   :  { %v4604_v49 = vpop.f32.mrf.mxu1 }
0x105d   :  { %v3184_v4 = vadd.f32 %v4604_v49, %v3551_v32  ;;  %v3187_v44 = vadd.f32 %v3169_v7, %v2967_v17  ;;  %v3196_v16 = vsel %vm7159_vm8, %v3188_v60, 0.0 }
0x105e   :  { %v3178_v62 = vpop.f32.mrf.mxu1 }
0x105f   :  { %v3190_v57 = vadd.f32 %v3184_v4, %v2970_v0  ;;  %v3179_v54 = vadd.f32 %v3551_v32, %v3178_v62  ;;  %v3193_v53 = vsel %vm7160_vm9, %v3187_v44, 0.0 }
0x1061   :  { %v3189_v42 = vadd.f32 %v3179_v54, %v2969_v50  ;;  %v3202_v48 = vsel %vm7157_vm6, %v3190_v57, 0.0  ;;  %v3266_v54 = vld [vmem:[%s6893_s1 + $0x40] sm:$0x1] }
0x1062   :  { %3203 = vadd.xlane.f32.xlu0 %v3202_v48 }
0x1063   :  { %v3199_v20 = vsel %vm7158_vm7, %v3189_v42, 0.0 }
0x1064   :  { %3200 = vadd.xlane.f32.xlu1 %v3199_v20 }
0x1066   :  { %3197 = vadd.xlane.f32.xlu0 %v3196_v16 }
0x1068   :  { %3194 = vadd.xlane.f32.xlu1 %v3193_v53 }
0x10eb   :  { %v3204_v30 = vpop.xlane.xlu0 %3203 }
0x10ec   :  { %v3208_v38 = vmul.f32 0.03125, %v3204_v30  ;;  %v4786_v30 = vld [vmem:[%s6892_s0] sm:$0x1] }
0x10ed   :  { %v3201_v58 = vpop.xlane.xlu1 %3200 }
0x10ee   :  { %v3212_v3 = vsub.f32 %v3190_v57, %v3208_v38  ;;  %v3207_v46 = vmul.f32 0.03125, %v3201_v58  ;;  %v3265_v57 = vld [vmem:[%s6893_s1 + $0x38] sm:$0x1]  ;;  %v3358_v38 = vand.u32 2147483647, %v4786_v30 }
0x10ef   :  { %v3198_v19 = vpop.xlane.xlu0 %3197 }
0x10f0   :  { %v3211_v63 = vsub.f32 %v3189_v42, %v3207_v46  ;;  %v3206_v10 = vmul.f32 0.03125, %v3198_v19  ;;  %v3216_v26 = vmul.f32 %v3212_v3, %v3212_v3  ;;  %vm3359_vm5 = vcmp.lt.f32.partialorder %v3358_v38, 0.5 }
0x10f1   :  { %v3195_v13 = vpop.xlane.xlu1 %3194  ;;  %v3559_v58 = vsel %vm3359_vm5, 1.0, %v4792_v6 }
0x10f2   :  { %v3210_v45 = vsub.f32 %v3188_v60, %v3206_v10  ;;  %v3205_v25 = vmul.f32 0.03125, %v3195_v13  ;;  %v3226_v31 = vsel %vm7161_vm11, %v3216_v26, 0.0  ;;  %v3215_v22 = vmul.f32 %v3211_v63, %v3211_v63 }
0x10f3   :  { %3227 = vadd.xlane.f32.xlu0 %v3226_v31 }
0x10f4   :  { %v3209_v59 = vsub.f32 %v3187_v44, %v3205_v25  ;;  %v3223_v29 = vsel %vm7162_vm12, %v3215_v22, 0.0  ;;  %v3214_v36 = vmul.f32 %v3210_v45, %v3210_v45 }
0x10f5   :  { %3224 = vadd.xlane.f32.xlu1 %v3223_v29 }
0x10f6   :  { %v3220_v21 = vsel %vm7163_vm13, %v3214_v36, 0.0  ;;  %v3213_v28 = vmul.f32 %v3209_v59, %v3209_v59 }
0x10f7   :  { %3221 = vadd.xlane.f32.xlu0 %v3220_v21 }
0x10f8   :  { %v3217_v24 = vsel %vm7164_vm14, %v3213_v28, 0.0 }
0x10f9   :  { %3218 = vadd.xlane.f32.xlu1 %v3217_v24 }
0x117c   :  { %v3228_v2 = vpop.xlane.xlu0 %3227 }
0x117d   :  { %v3232_v27 = vmul.f32 0.03125, %v3228_v2 }
0x117e   :  { %v3225_v8 = vpop.xlane.xlu1 %3224 }
0x117f   :  { %v3236_v17 = vadd.f32 1e-05, %v3232_v27  ;;  %v3231_v43 = vmul.f32 0.03125, %v3225_v8 }
0x1180   :  { %v3222_v39 = vpop.xlane.xlu0 %3221 }
0x1181   :  { %4774 = vrsqrt.f32 %v3236_v17  ;;  %v3235_v15 = vadd.f32 1e-05, %v3231_v43  ;;  %v3230_v61 = vmul.f32 0.03125, %v3222_v39 }
0x1182   :  { %v3219_v50 = vpop.xlane.xlu1 %3218 }
0x1183   :  { %4776 = vrsqrt.f32 %v3235_v15  ;;  %v3234_v0 = vadd.f32 1e-05, %v3230_v61  ;;  %v3229_v56 = vmul.f32 0.03125, %v3219_v50 }
0x1185   :  { %4778 = vrsqrt.f32 %v3234_v0  ;;  %v3233_v55 = vadd.f32 1e-05, %v3229_v56 }
0x1187   :  { %4780 = vrsqrt.f32 %v3233_v55 }
0x118e   :  { %v4775_v33 = vpop.eup %4774 }
0x118f   :  { %v3244_v52 = vmul.f32 %v4775_v33, %v3212_v3 }
0x1190   :  { %v4777_v41 = vpop.eup %4776 }
0x1191   :  { %v3243_v34 = vmul.f32 %v4777_v41, %v3211_v63  ;;  %v3252_v1 = vmul.f32 %v3552_v14, %v3244_v52 }
0x1192   :  { %v4779_v12 = vpop.eup %4778 }
0x1193   :  { %v3242_v35 = vmul.f32 %v4779_v12, %v3210_v45  ;;  %v3260_v51 = vadd.f32 %v3553_v23, %v3252_v1  ;;  %v3251_v47 = vmul.f32 %v3552_v14, %v3243_v34 }
0x1194   :  { %v4781_v9 = vpop.eup %4780 }
0x1195   :  { %v3241_v37 = vmul.f32 %v4781_v9, %v3209_v59  ;;  %v3264_v5 = vmax.f32 %v3260_v51, 0.0  ;;  %v3259_v11 = vadd.f32 %v3553_v23, %v3251_v47  ;;  %v3250_v32 = vmul.f32 %v3552_v14, %v3242_v35 }
0x1197   :  { %4606 = vmatpush3.xpose.msk.msra.mxu0 %vm7102_vm0, %v3264_v5  ;;  %v3263_v18 = vmax.f32 %v3259_v11, 0.0  ;;  %v3258_v49 = vadd.f32 %v3553_v23, %v3250_v32  ;;  %v3249_v40 = vmul.f32 %v3552_v14, %v3241_v37 }
0x1198   :  { %4607 = vmatprep.subr.mxu0 %v4792_v6 }
0x1199   :  { %v3262_v4 = vmax.f32 %v3258_v49, 0.0  ;;  %v3257_v62 = vadd.f32 %v3553_v23, %v3249_v40 }
0x119b   :  { %4608 = vmatpush3.xpose.msk.msra.mxu0 %vm7165_vm1, %v3263_v18  ;;  %v3261_v7 = vmax.f32 %v3257_v62, 0.0 }
0x119c   :  { %4609 = vmatprep.subr.mxu0 %v4792_v6 }
0x119f   :  { %4610 = vmatpush3.xpose.msk.msra.mxu0 %vm7166_vm2, %v3262_v4 }
0x11a0   :  { %4611 = vmatprep.subr.mxu0 %v4792_v6 }
0x11a3   :  { %4612 = vmatpush3.xpose.msk.msra.mxu0 %vm7167_vm3, %v3261_v7 }
0x11a6   :  { %4614 = vmatmul.mubr.msk.f32.vlgmr.msra.gmra.mxu0 %vm7168_vm4, %v3265_v57 }
0x1266   :  { %v3348_v60 = vpop.f32.mrf.mxu0 }
0x1267   :  { %v3349_v42 = vadd.f32 %v3348_v60, %v3266_v54 }
0x1268   :  { %v4615_v48 = vpop.f32.mrf.mxu0 }
0x1269   :  { %v3352_v44 = vsub.f32 0.0, %v3349_v42 }
0x126b   :  { %v3353_v20 = vmul.f32 1.442695, %v3352_v44 }
0x126d   :  { %4782 = vpow2.f32 %v3353_v20 }
0x127a   :  { %v4783_v16 = vpop.eup %4782 }
0x127b   :  { %v3355_v53 = vadd.f32 1.0, %v4783_v16 }
0x127d   :  { %4784 = vrcp.f32 %v3355_v53 }
0x128a   :  { %v4785_v3 = vpop.eup %4784 }
0x128b   :  { %v3362_v46 = vmul.f32 %v4785_v3, %v3559_v58 }
0x128d   :  { %3364 = vst.msk [vmem:[%s6895_s3] sm:$0x1] %vm3363_vm10, %v3362_v46 }

</bundles_post_ra>
